<compile_context>
chip_gen: v7x
topology: tpu7x:2x2x1
jax: 0.10.0
libtpu: 0.0.40
codegen_flags: <defaults>
</compile_context>

<pallas_src>
import functools

import numpy as np
import jax
import jax.numpy as jnp
from jax import lax
from jax.experimental import pallas as pl
from jax.experimental.pallas import tpu as pltpu


# ------------------------------ fused kernel ------------------------------- #

def _msa_kernel(x_ref, w_qkv_ref, w_pool_ref, gam_ref, bet_ref, gmat_ref,
                w_proj_ref, b_proj_ref, o_ref, pad_ref, *,
                num_heads, head_dim, thw, ksize, stride_q, stride_kv, eps):
    """One batch element: QKV proj -> pool+LN (q,k,v) -> attention -> proj.

    x_ref:      (1, N, C_in)
    w_qkv_ref:  (3, C_in, C)      stacked q/k/v projection weights (transposed)
    w_pool_ref: (3, kt, kh, kw, C) head-tiled depthwise conv weights
    gam_ref/bet_ref: (3, C)        head-tiled LN gamma/beta (k row pre-scaled)
    gmat_ref:   (C, C)             block-diagonal per-head averaging matrix
    w_proj_ref: (C, C)             output projection (transposed)
    b_proj_ref: (1, C)
    o_ref:      (1, Nq, C)
    pad_ref:    VMEM scratch (Tp, Hp, Wp, C) for the conv halo
    """
    C = num_heads * head_dim
    T, H, W = thw
    kt, kh, kw = ksize
    pt, ph, pw = kt // 2, kh // 2, kw // 2

    x = x_ref[0].astype(jnp.float32)                        # (N, C_in)
    G = gmat_ref[...].astype(jnp.float32)                   # (C, C)

    # Zero the padded-volume scratch once per invocation; only the interior is
    # rewritten per tensor below, the halo stays zero.
    pad_ref[...] = jnp.zeros(pad_ref.shape, pad_ref.dtype)

    def subsample(arr, axis, stride, out_size):
        # Stride applied with unit contiguous slices (no strided indexers).
        if stride == 1:
            return arr
        parts = [lax.slice_in_dim(arr, o * stride, o * stride + 1, axis=axis)
                 for o in range(out_size)]
        return jnp.concatenate(parts, axis=axis)

    def pool_layernorm(t, i, stride):
        """Depthwise strided conv3d on the body + cls concat + grouped LN."""
        st, sh, sw = stride
        To = (T + 2 * pt - kt) // st + 1
        Ho = (H + 2 * ph - kh) // sh + 1
        Wo = (W + 2 * pw - kw) // sw + 1

        cls = t[0:1, :]                                     # (1, C)
        body = t[1:, :].reshape(T, H, W, C)
        pad_ref[pt:pt + T, ph:ph + H, pw:pw + W, :] = body  # halo stays zero
        xp = pad_ref[...]                                   # (Tp, Hp, Wp, C)

        # Hoisted bulk weight load: one (kt*kh*kw, C) value, indexed statically.
        w = w_pool_ref[i].astype(jnp.float32).reshape(kt * kh * kw, C)

        # Dense (stride-1) shift-accumulate conv, all contiguous loads.
        acc = jnp.zeros((T, H, W, C), jnp.float32)
        r = 0
        for it in range(kt):
            for ih in range(kh):
                for iw in range(kw):
                    xs = xp[it:it + T, ih:ih + H, iw:iw + W, :]
                    acc = acc + xs * w[r:r + 1, :]
                    r += 1
        out = subsample(acc, 0, st, To)
        out = subsample(out, 1, sh, Ho)
        out = subsample(out, 2, sw, Wo)

        y = jnp.concatenate([cls, out.reshape(To * Ho * Wo, C)], axis=0)
        # Per-head LayerNorm in the full-C layout: per-head mean/var via the
        # block-diagonal averaging matmul (lane-parallel, no head reshapes).
        mean = jnp.dot(y, G, preferred_element_type=jnp.float32)
        yc = y - mean
        var = jnp.dot(yc * yc, G, preferred_element_type=jnp.float32)
        yn = yc * lax.rsqrt(var + eps)
        g = gam_ref[i:i + 1, :].astype(jnp.float32)
        b = bet_ref[i:i + 1, :].astype(jnp.float32)
        return yn * g + b                                   # (1+To*Ho*Wo, C)

    def project(i):
        wv = w_qkv_ref[i].astype(jnp.float32)               # (C_in, C)
        return jnp.dot(x, wv, preferred_element_type=jnp.float32)

    q = pool_layernorm(project(0), 0, stride_q)             # (Nq, C)
    k = pool_layernorm(project(1), 1, stride_kv)            # (Nk, C) pre-scaled
    v = pool_layernorm(project(2), 2, stride_kv)            # (Nk, C)

    # Per-head attention: 2-D lane-slice matmuls, no 3-D transposes.
    D = head_dim
    o_heads = []
    for h in range(num_heads):
        qh = q[:, h * D:(h + 1) * D]                        # (Nq, D)
        ks = k[:, h * D:(h + 1) * D]                        # (Nk, D)
        vs = v[:, h * D:(h + 1) * D]                        # (Nk, D)
        s = lax.dot_general(qh, ks, (((1,), (1,)), ((), ())),
                            preferred_element_type=jnp.float32)   # (Nq, Nk)
        s = s - jnp.max(s, axis=-1, keepdims=True)
        p = jnp.exp(s)
        p = p / jnp.sum(p, axis=-1, keepdims=True)          # exact reciprocal
        o_heads.append(jnp.dot(p, vs, preferred_element_type=jnp.float32))
    o = jnp.concatenate(o_heads, axis=1) + q                # residual_pool

    out = jnp.dot(o, w_proj_ref[...].astype(jnp.float32),
                  preferred_element_type=jnp.float32)
    out = out + b_proj_ref[...].astype(jnp.float32)
    o_ref[0] = out.astype(o_ref.dtype)                      # lane-dense store


# --------------------------------- wrapper --------------------------------- #

def multi_scale_attention_forward(x, thw_shape, params, *, num_heads,
                                  stride_q, stride_kv):
    B, N, C_in = x.shape
    dim_out = params["wq"].shape[0]
    hd = dim_out // num_heads
    scale = hd ** (-0.5)
    T, H, W = thw_shape

    kt, kh, kw = params["pool_q_w"].shape[:3]
    # TODO(synk): support kernel_q != kernel_kv (needs separate halo sizes).
    assert tuple(params["pool_k_w"].shape[:3]) == (kt, kh, kw)
    pt, ph, pw = kt // 2, kh // 2, kw // 2

    def out_thw(stride):
        st, sh, sw = stride
        return ((T + 2 * pt - kt) // st + 1,
                (H + 2 * ph - kh) // sh + 1,
                (W + 2 * pw - kw) // sw + 1)

    q_thw = out_thw(stride_q)
    Nq = 1 + q_thw[0] * q_thw[1] * q_thw[2]
    Tp, Hp, Wp = T + 2 * pt, H + 2 * ph, W + 2 * pw

    # Stacked projection weights (transposed for x @ W^T).
    w_qkv = jnp.stack([params["wq"].T, params["wk"].T, params["wv"].T])

    # Depthwise conv / LN act per head on head_dim channels; in the flat
    # head-major C layout that is the per-head weight tiled across heads.
    def tile_c(w_head):
        return jnp.tile(w_head, (1, 1, 1, num_heads))

    w_pool = jnp.stack([tile_c(params["pool_q_w"]),
                        tile_c(params["pool_k_w"]),
                        tile_c(params["pool_v_w"])])         # (3, kt, kh, kw, C)

    # Softmax scale folded exactly into k's LayerNorm affine (k is only used
    # in QK^T, q stays unscaled for the pooling residual).
    gam = jnp.stack([jnp.tile(params["norm_q_g"], num_heads),
                     jnp.tile(params["norm_k_g"], num_heads) * scale,
                     jnp.tile(params["norm_v_g"], num_heads)])
    bet = jnp.stack([jnp.tile(params["norm_q_b"], num_heads),
                     jnp.tile(params["norm_k_b"], num_heads) * scale,
                     jnp.tile(params["norm_v_b"], num_heads)])

    # Block-diagonal per-head averaging matrix for the grouped LayerNorm.
    gidx = jnp.arange(dim_out) // hd
    gmat = (gidx[:, None] == gidx[None, :]).astype(jnp.float32) / hd

    w_proj_t = params["w_proj"].T
    b_proj = params["b_proj"].reshape(1, dim_out)

    kern = functools.partial(
        _msa_kernel, num_heads=num_heads, head_dim=hd, thw=(T, H, W),
        ksize=(kt, kh, kw), stride_q=tuple(stride_q),
        stride_kv=tuple(stride_kv), eps=1e-5)

    out = pl.pallas_call(
        kern,
        out_shape=jax.ShapeDtypeStruct((B, Nq, dim_out), x.dtype),
        grid=(B,),
        in_specs=[
            pl.BlockSpec((1, N, C_in), lambda b: (b, 0, 0)),
            pl.BlockSpec((3, C_in, dim_out), lambda b: (0, 0, 0)),
            pl.BlockSpec((3, kt, kh, kw, dim_out), lambda b: (0, 0, 0, 0, 0)),
            pl.BlockSpec((3, dim_out), lambda b: (0, 0)),
            pl.BlockSpec((3, dim_out), lambda b: (0, 0)),
            pl.BlockSpec((dim_out, dim_out), lambda b: (0, 0)),
            pl.BlockSpec((dim_out, dim_out), lambda b: (0, 0)),
            pl.BlockSpec((1, dim_out), lambda b: (0, 0)),
        ],
        out_specs=pl.BlockSpec((1, Nq, dim_out), lambda b: (b, 0, 0)),
        scratch_shapes=[pltpu.VMEM((Tp, Hp, Wp, dim_out), jnp.float32)],
        compiler_params=pltpu.CompilerParams(dimension_semantics=("parallel",)),
    )(x, w_qkv, w_pool, gam, bet, gmat, w_proj_t, b_proj)
    return out, q_thw


# ---------------------------- pure-JAX reference ---------------------------- #

def reference_forward(x, thw_shape, params, *, num_heads, stride_q, stride_kv):
    B, N, _ = x.shape
    dim_out = params["wq"].shape[0]
    hd = dim_out // num_heads
    scale = hd ** (-0.5)
    T, H, W = thw_shape

    def proj(w):
        y = jnp.einsum("bnc,oc->bno", x, w)
        return y.reshape(B, N, num_heads, hd).transpose(0, 2, 1, 3)

    def pool(t, w, stride, g, bvec):
        cls_tok = t[:, :, :1, :]
        body = t[:, :, 1:, :].reshape(B * num_heads, T, H, W, hd)
        body = body.transpose(0, 4, 1, 2, 3)                       # NCDHW
        w_oidhw = w.transpose(3, 0, 1, 2)[:, None]                 # (C,1,kt,kh,kw)
        y = lax.conv_general_dilated(
            body, w_oidhw, window_strides=stride, padding=[(1, 1)] * 3,
            dimension_numbers=("NCDHW", "OIDHW", "NCDHW"),
            feature_group_count=hd)
        To, Ho, Wo = y.shape[2:]
        y = y.reshape(B, num_heads, hd, To * Ho * Wo).transpose(0, 1, 3, 2)
        y = jnp.concatenate([cls_tok, y], axis=2)
        mean = jnp.mean(y, axis=-1, keepdims=True)
        var = jnp.mean(jnp.square(y - mean), axis=-1, keepdims=True)
        y = (y - mean) / jnp.sqrt(var + 1e-5) * g + bvec
        return y, (To, Ho, Wo)

    q = proj(params["wq"]); k = proj(params["wk"]); v = proj(params["wv"])
    q, q_shape = pool(q, params["pool_q_w"], stride_q,
                      params["norm_q_g"], params["norm_q_b"])
    k, _ = pool(k, params["pool_k_w"], stride_kv,
                params["norm_k_g"], params["norm_k_b"])
    v, _ = pool(v, params["pool_v_w"], stride_kv,
                params["norm_v_g"], params["norm_v_b"])
    attn = jax.nn.softmax(jnp.einsum("bhqd,bhkd->bhqk", q * scale, k), axis=-1)
    o = jnp.einsum("bhqk,bhkd->bhqd", attn, v) + q
    o = o.transpose(0, 2, 1, 3).reshape(B, -1, dim_out)
    o = jnp.einsum("bnc,oc->bno", o, params["w_proj"]) + params["b_proj"]
    return o, q_shape


# ----------------------------------- main ----------------------------------- #

if __name__ == "__main__":
    B = 2
    dim = 64
    dim_out = 64
    num_heads = 4
    head_dim = dim_out // num_heads
    thw_shape = (2, 4, 4)                     # T, H, W
    N = 1 + thw_shape[0] * thw_shape[1] * thw_shape[2]   # cls token + patches
    stride_q = (1, 1, 1)
    stride_kv = (1, 2, 2)

    key = jax.random.PRNGKey(0)
    ks = jax.random.split(key, 10)
    params = {
        "wq": 0.02 * jax.random.normal(ks[0], (dim_out, dim), jnp.float32),
        "wk": 0.02 * jax.random.normal(ks[1], (dim_out, dim), jnp.float32),
        "wv": 0.02 * jax.random.normal(ks[2], (dim_out, dim), jnp.float32),
        "w_proj": 0.02 * jax.random.normal(ks[3], (dim_out, dim_out), jnp.float32),
        "b_proj": 0.02 * jax.random.normal(ks[4], (dim_out,), jnp.float32),
        # depthwise conv weights, layout (kt, kh, kw, head_dim)
        "pool_q_w": 0.1 * jax.random.normal(ks[5], (3, 3, 3, head_dim), jnp.float32),
        "pool_k_w": 0.1 * jax.random.normal(ks[6], (3, 3, 3, head_dim), jnp.float32),
        "pool_v_w": 0.1 * jax.random.normal(ks[7], (3, 3, 3, head_dim), jnp.float32),
        # LayerNorm(head_dim) params (PyTorch default init: ones / zeros)
        "norm_q_g": jnp.ones((head_dim,), jnp.float32),
        "norm_q_b": jnp.zeros((head_dim,), jnp.float32),
        "norm_k_g": jnp.ones((head_dim,), jnp.float32),
        "norm_k_b": jnp.zeros((head_dim,), jnp.float32),
        "norm_v_g": jnp.ones((head_dim,), jnp.float32),
        "norm_v_b": jnp.zeros((head_dim,), jnp.float32),
    }

    x = jax.random.normal(ks[8], (B, N, dim), jnp.float32)

    out, q_shape = multi_scale_attention_forward(
        x, thw_shape, params,
        num_heads=num_heads, stride_q=stride_q, stride_kv=stride_kv)
    out = jax.block_until_ready(out)

    ref_out, ref_q_shape = reference_forward(
        x, thw_shape, params,
        num_heads=num_heads, stride_q=stride_q, stride_kv=stride_kv)
    ref_out = jax.block_until_ready(ref_out)

    assert tuple(q_shape) == tuple(ref_q_shape), (q_shape, ref_q_shape)
    assert out.shape == (B, 1 + thw_shape[0] * thw_shape[1] * thw_shape[2], dim_out)
    # Exact-reciprocal softmax + f32 everywhere -> tight tolerance (covers the
    # TPU MXU f32 matmul pass accumulation differences vs. XLA).
    np.testing.assert_allclose(np.asarray(out), np.asarray(ref_out),
                               rtol=1e-3, atol=1e-3)
    print("KERNEL_OK")
</pallas_src>

<mosaic_0001>
module attributes {stable_mosaic.version = 11 : i64} {
  func.func @_msa_kernel(%arg0: i32, %arg1: memref<1x33x64xf32, #tpu.memory_space<vmem>>, %arg2: memref<3x64x64xf32, #tpu.memory_space<vmem>>, %arg3: memref<3x3x3x3x64xf32, #tpu.memory_space<vmem>>, %arg4: memref<3x64xf32, #tpu.memory_space<vmem>>, %arg5: memref<3x64xf32, #tpu.memory_space<vmem>>, %arg6: memref<64x64xf32, #tpu.memory_space<vmem>>, %arg7: memref<64x64xf32, #tpu.memory_space<vmem>>, %arg8: memref<1x64xf32, #tpu.memory_space<vmem>>, %arg9: memref<1x33x64xf32, #tpu.memory_space<vmem>>, %arg10: memref<4x6x6x64xf32, #tpu.memory_space<vmem>>) attributes {dimension_semantics = [#tpu.dimension_semantics<parallel>], iteration_bounds = array<i64: 2>, scalar_prefetch = 0 : i64, scratch_operands = 1 : i64, tpu.core_type = #tpu.core_type<tc>, window_params = [{transform_indices = @transform_0, window_bounds = array<i64: 1, 33, 64>}, {pipeline_mode = #tpu.pipeline_mode<synchronous>, transform_indices = @transform_1, window_bounds = array<i64: 3, 64, 64>}, {pipeline_mode = #tpu.pipeline_mode<synchronous>, transform_indices = @transform_2, window_bounds = array<i64: 3, 3, 3, 3, 64>}, {pipeline_mode = #tpu.pipeline_mode<synchronous>, transform_indices = @transform_3, window_bounds = array<i64: 3, 64>}, {pipeline_mode = #tpu.pipeline_mode<synchronous>, transform_indices = @transform_4, window_bounds = array<i64: 3, 64>}, {pipeline_mode = #tpu.pipeline_mode<synchronous>, transform_indices = @transform_5, window_bounds = array<i64: 64, 64>}, {pipeline_mode = #tpu.pipeline_mode<synchronous>, transform_indices = @transform_6, window_bounds = array<i64: 64, 64>}, {pipeline_mode = #tpu.pipeline_mode<synchronous>, transform_indices = @transform_7, window_bounds = array<i64: 1, 64>}, {transform_indices = @transform_8, window_bounds = array<i64: 1, 33, 64>}]} {
    %c0 = arith.constant 0 : index
    %c0_0 = arith.constant 0 : index
    %c0_1 = arith.constant 0 : index
    %0 = vector.load %arg1[%c0, %c0_0, %c0_1] : memref<1x33x64xf32, #tpu.memory_space<vmem>>, vector<1x33x64xf32>
    %1 = vector.shape_cast %0 : vector<1x33x64xf32> to vector<33x64xf32>
    %c0_2 = arith.constant 0 : index
    %c0_3 = arith.constant 0 : index
    %2 = vector.load %arg6[%c0_2, %c0_3] : memref<64x64xf32, #tpu.memory_space<vmem>>, vector<64x64xf32>
    %cst = arith.constant 0.000000e+00 : f32
    %3 = vector.broadcast %cst : f32 to vector<4x6x6x64xf32>
    %c0_4 = arith.constant 0 : index
    %c0_5 = arith.constant 0 : index
    %c0_6 = arith.constant 0 : index
    %c0_7 = arith.constant 0 : index
    %4 = vector.load %arg10[%c0_4, %c0_5, %c0_6, %c0_7] : memref<4x6x6x64xf32, #tpu.memory_space<vmem>>, vector<4x6x6x64xf32>
    tpu.vector_store %arg10[%c0_4, %c0_5, %c0_6, %c0_7], %3 {strides = array<i32>} : memref<4x6x6x64xf32, #tpu.memory_space<vmem>>, vector<4x6x6x64xf32>,
    %c0_8 = arith.constant 0 : index
    %c0_9 = arith.constant 0 : index
    %c0_10 = arith.constant 0 : index
    %5 = vector.load %arg2[%c0_8, %c0_9, %c0_10] : memref<3x64x64xf32, #tpu.memory_space<vmem>>, vector<1x64x64xf32>
    %6 = vector.shape_cast %5 : vector<1x64x64xf32> to vector<64x64xf32>
    %cst_11 = arith.constant dense<0.000000e+00> : vector<33x64xf32>
    %7 = tpu.matmul %1, %6, %cst_11 {dimension_numbers = #tpu.dot_dimension_numbers<[1], [0], [0], [1], [0, 0, 1, 1], [], []>} : vector<33x64xf32>, vector<64x64xf32>, vector<33x64xf32> -> vector<33x64xf32>
    %8 = vector.extract_strided_slice %7 {offsets = [0, 0], sizes = [1, 64], strides = [1, 1]} : vector<33x64xf32> to vector<1x64xf32>
    %9 = vector.extract_strided_slice %7 {offsets = [1, 0], sizes = [32, 64], strides = [1, 1]} : vector<33x64xf32> to vector<32x64xf32>
    %10 = vector.shape_cast %9 : vector<32x64xf32> to vector<2x4x4x64xf32>
    %c1 = arith.constant 1 : index
    %c1_12 = arith.constant 1 : index
    %c1_13 = arith.constant 1 : index
    %c0_14 = arith.constant 0 : index
    %11 = vector.load %arg10[%c1, %c1_12, %c1_13, %c0_14] : memref<4x6x6x64xf32, #tpu.memory_space<vmem>>, vector<2x4x4x64xf32>
    tpu.vector_store %arg10[%c1, %c1_12, %c1_13, %c0_14], %10 {strides = array<i32>} : memref<4x6x6x64xf32, #tpu.memory_space<vmem>>, vector<2x4x4x64xf32>,
    %c0_15 = arith.constant 0 : index
    %c0_16 = arith.constant 0 : index
    %c0_17 = arith.constant 0 : index
    %c0_18 = arith.constant 0 : index
    %12 = vector.load %arg10[%c0_15, %c0_16, %c0_17, %c0_18] : memref<4x6x6x64xf32, #tpu.memory_space<vmem>>, vector<4x6x6x64xf32>
    %c0_19 = arith.constant 0 : index
    %c0_20 = arith.constant 0 : index
    %c0_21 = arith.constant 0 : index
    %c0_22 = arith.constant 0 : index
    %c0_23 = arith.constant 0 : index
    %13 = vector.load %arg3[%c0_19, %c0_20, %c0_21, %c0_22, %c0_23] : memref<3x3x3x3x64xf32, #tpu.memory_space<vmem>>, vector<1x3x3x3x64xf32>
    %14 = vector.shape_cast %13 : vector<1x3x3x3x64xf32> to vector<3x3x3x64xf32>
    %15 = vector.shape_cast %14 : vector<3x3x3x64xf32> to vector<27x64xf32>
    %cst_24 = arith.constant 0.000000e+00 : f32
    %16 = vector.broadcast %cst_24 : f32 to vector<2x4x4x64xf32>
    %17 = vector.extract_strided_slice %12 {offsets = [0, 0, 0, 0], sizes = [2, 4, 4, 64], strides = [1, 1, 1, 1]} : vector<4x6x6x64xf32> to vector<2x4x4x64xf32>
    %18 = vector.extract_strided_slice %15 {offsets = [0, 0], sizes = [1, 64], strides = [1, 1]} : vector<27x64xf32> to vector<1x64xf32>
    %19 = vector.shape_cast %18 : vector<1x64xf32> to vector<1x1x1x64xf32>
    %20 = vector.broadcast %19 : vector<1x1x1x64xf32> to vector<2x4x4x64xf32>
    %21 = arith.mulf %17, %20 : vector<2x4x4x64xf32>
    %22 = arith.addf %16, %21 : vector<2x4x4x64xf32>
    %23 = vector.extract_strided_slice %12 {offsets = [0, 0, 1, 0], sizes = [2, 4, 4, 64], strides = [1, 1, 1, 1]} : vector<4x6x6x64xf32> to vector<2x4x4x64xf32>
    %24 = vector.extract_strided_slice %15 {offsets = [1, 0], sizes = [1, 64], strides = [1, 1]} : vector<27x64xf32> to vector<1x64xf32>
    %25 = vector.shape_cast %24 : vector<1x64xf32> to vector<1x1x1x64xf32>
    %26 = vector.broadcast %25 : vector<1x1x1x64xf32> to vector<2x4x4x64xf32>
    %27 = arith.mulf %23, %26 : vector<2x4x4x64xf32>
    %28 = arith.addf %22, %27 : vector<2x4x4x64xf32>
    %29 = vector.extract_strided_slice %12 {offsets = [0, 0, 2, 0], sizes = [2, 4, 4, 64], strides = [1, 1, 1, 1]} : vector<4x6x6x64xf32> to vector<2x4x4x64xf32>
    %30 = vector.extract_strided_slice %15 {offsets = [2, 0], sizes = [1, 64], strides = [1, 1]} : vector<27x64xf32> to vector<1x64xf32>
    %31 = vector.shape_cast %30 : vector<1x64xf32> to vector<1x1x1x64xf32>
    %32 = vector.broadcast %31 : vector<1x1x1x64xf32> to vector<2x4x4x64xf32>
    %33 = arith.mulf %29, %32 : vector<2x4x4x64xf32>
    %34 = arith.addf %28, %33 : vector<2x4x4x64xf32>
    %35 = vector.extract_strided_slice %12 {offsets = [0, 1, 0, 0], sizes = [2, 4, 4, 64], strides = [1, 1, 1, 1]} : vector<4x6x6x64xf32> to vector<2x4x4x64xf32>
    %36 = vector.extract_strided_slice %15 {offsets = [3, 0], sizes = [1, 64], strides = [1, 1]} : vector<27x64xf32> to vector<1x64xf32>
    %37 = vector.shape_cast %36 : vector<1x64xf32> to vector<1x1x1x64xf32>
    %38 = vector.broadcast %37 : vector<1x1x1x64xf32> to vector<2x4x4x64xf32>
    %39 = arith.mulf %35, %38 : vector<2x4x4x64xf32>
    %40 = arith.addf %34, %39 : vector<2x4x4x64xf32>
    %41 = vector.extract_strided_slice %12 {offsets = [0, 1, 1, 0], sizes = [2, 4, 4, 64], strides = [1, 1, 1, 1]} : vector<4x6x6x64xf32> to vector<2x4x4x64xf32>
    %42 = vector.extract_strided_slice %15 {offsets = [4, 0], sizes = [1, 64], strides = [1, 1]} : vector<27x64xf32> to vector<1x64xf32>
    %43 = vector.shape_cast %42 : vector<1x64xf32> to vector<1x1x1x64xf32>
    %44 = vector.broadcast %43 : vector<1x1x1x64xf32> to vector<2x4x4x64xf32>
    %45 = arith.mulf %41, %44 : vector<2x4x4x64xf32>
    %46 = arith.addf %40, %45 : vector<2x4x4x64xf32>
    %47 = vector.extract_strided_slice %12 {offsets = [0, 1, 2, 0], sizes = [2, 4, 4, 64], strides = [1, 1, 1, 1]} : vector<4x6x6x64xf32> to vector<2x4x4x64xf32>
    %48 = vector.extract_strided_slice %15 {offsets = [5, 0], sizes = [1, 64], strides = [1, 1]} : vector<27x64xf32> to vector<1x64xf32>
    %49 = vector.shape_cast %48 : vector<1x64xf32> to vector<1x1x1x64xf32>
    %50 = vector.broadcast %49 : vector<1x1x1x64xf32> to vector<2x4x4x64xf32>
    %51 = arith.mulf %47, %50 : vector<2x4x4x64xf32>
    %52 = arith.addf %46, %51 : vector<2x4x4x64xf32>
    %53 = vector.extract_strided_slice %12 {offsets = [0, 2, 0, 0], sizes = [2, 4, 4, 64], strides = [1, 1, 1, 1]} : vector<4x6x6x64xf32> to vector<2x4x4x64xf32>
    %54 = vector.extract_strided_slice %15 {offsets = [6, 0], sizes = [1, 64], strides = [1, 1]} : vector<27x64xf32> to vector<1x64xf32>
    %55 = vector.shape_cast %54 : vector<1x64xf32> to vector<1x1x1x64xf32>
    %56 = vector.broadcast %55 : vector<1x1x1x64xf32> to vector<2x4x4x64xf32>
    %57 = arith.mulf %53, %56 : vector<2x4x4x64xf32>
    %58 = arith.addf %52, %57 : vector<2x4x4x64xf32>
    %59 = vector.extract_strided_slice %12 {offsets = [0, 2, 1, 0], sizes = [2, 4, 4, 64], strides = [1, 1, 1, 1]} : vector<4x6x6x64xf32> to vector<2x4x4x64xf32>
    %60 = vector.extract_strided_slice %15 {offsets = [7, 0], sizes = [1, 64], strides = [1, 1]} : vector<27x64xf32> to vector<1x64xf32>
    %61 = vector.shape_cast %60 : vector<1x64xf32> to vector<1x1x1x64xf32>
    %62 = vector.broadcast %61 : vector<1x1x1x64xf32> to vector<2x4x4x64xf32>
    %63 = arith.mulf %59, %62 : vector<2x4x4x64xf32>
    %64 = arith.addf %58, %63 : vector<2x4x4x64xf32>
    %65 = vector.extract_strided_slice %12 {offsets = [0, 2, 2, 0], sizes = [2, 4, 4, 64], strides = [1, 1, 1, 1]} : vector<4x6x6x64xf32> to vector<2x4x4x64xf32>
    %66 = vector.extract_strided_slice %15 {offsets = [8, 0], sizes = [1, 64], strides = [1, 1]} : vector<27x64xf32> to vector<1x64xf32>
    %67 = vector.shape_cast %66 : vector<1x64xf32> to vector<1x1x1x64xf32>
    %68 = vector.broadcast %67 : vector<1x1x1x64xf32> to vector<2x4x4x64xf32>
    %69 = arith.mulf %65, %68 : vector<2x4x4x64xf32>
    %70 = arith.addf %64, %69 : vector<2x4x4x64xf32>
    %71 = vector.extract_strided_slice %12 {offsets = [1, 0, 0, 0], sizes = [2, 4, 4, 64], strides = [1, 1, 1, 1]} : vector<4x6x6x64xf32> to vector<2x4x4x64xf32>
    %72 = vector.extract_strided_slice %15 {offsets = [9, 0], sizes = [1, 64], strides = [1, 1]} : vector<27x64xf32> to vector<1x64xf32>
    %73 = vector.shape_cast %72 : vector<1x64xf32> to vector<1x1x1x64xf32>
    %74 = vector.broadcast %73 : vector<1x1x1x64xf32> to vector<2x4x4x64xf32>
    %75 = arith.mulf %71, %74 : vector<2x4x4x64xf32>
    %76 = arith.addf %70, %75 : vector<2x4x4x64xf32>
    %77 = vector.extract_strided_slice %12 {offsets = [1, 0, 1, 0], sizes = [2, 4, 4, 64], strides = [1, 1, 1, 1]} : vector<4x6x6x64xf32> to vector<2x4x4x64xf32>
    %78 = vector.extract_strided_slice %15 {offsets = [10, 0], sizes = [1, 64], strides = [1, 1]} : vector<27x64xf32> to vector<1x64xf32>
    %79 = vector.shape_cast %78 : vector<1x64xf32> to vector<1x1x1x64xf32>
    %80 = vector.broadcast %79 : vector<1x1x1x64xf32> to vector<2x4x4x64xf32>
    %81 = arith.mulf %77, %80 : vector<2x4x4x64xf32>
    %82 = arith.addf %76, %81 : vector<2x4x4x64xf32>
    %83 = vector.extract_strided_slice %12 {offsets = [1, 0, 2, 0], sizes = [2, 4, 4, 64], strides = [1, 1, 1, 1]} : vector<4x6x6x64xf32> to vector<2x4x4x64xf32>
    %84 = vector.extract_strided_slice %15 {offsets = [11, 0], sizes = [1, 64], strides = [1, 1]} : vector<27x64xf32> to vector<1x64xf32>
    %85 = vector.shape_cast %84 : vector<1x64xf32> to vector<1x1x1x64xf32>
    %86 = vector.broadcast %85 : vector<1x1x1x64xf32> to vector<2x4x4x64xf32>
    %87 = arith.mulf %83, %86 : vector<2x4x4x64xf32>
    %88 = arith.addf %82, %87 : vector<2x4x4x64xf32>
    %89 = vector.extract_strided_slice %12 {offsets = [1, 1, 0, 0], sizes = [2, 4, 4, 64], strides = [1, 1, 1, 1]} : vector<4x6x6x64xf32> to vector<2x4x4x64xf32>
    %90 = vector.extract_strided_slice %15 {offsets = [12, 0], sizes = [1, 64], strides = [1, 1]} : vector<27x64xf32> to vector<1x64xf32>
    %91 = vector.shape_cast %90 : vector<1x64xf32> to vector<1x1x1x64xf32>
    %92 = vector.broadcast %91 : vector<1x1x1x64xf32> to vector<2x4x4x64xf32>
    %93 = arith.mulf %89, %92 : vector<2x4x4x64xf32>
    %94 = arith.addf %88, %93 : vector<2x4x4x64xf32>
    %95 = vector.extract_strided_slice %12 {offsets = [1, 1, 1, 0], sizes = [2, 4, 4, 64], strides = [1, 1, 1, 1]} : vector<4x6x6x64xf32> to vector<2x4x4x64xf32>
    %96 = vector.extract_strided_slice %15 {offsets = [13, 0], sizes = [1, 64], strides = [1, 1]} : vector<27x64xf32> to vector<1x64xf32>
    %97 = vector.shape_cast %96 : vector<1x64xf32> to vector<1x1x1x64xf32>
    %98 = vector.broadcast %97 : vector<1x1x1x64xf32> to vector<2x4x4x64xf32>
    %99 = arith.mulf %95, %98 : vector<2x4x4x64xf32>
    %100 = arith.addf %94, %99 : vector<2x4x4x64xf32>
    %101 = vector.extract_strided_slice %12 {offsets = [1, 1, 2, 0], sizes = [2, 4, 4, 64], strides = [1, 1, 1, 1]} : vector<4x6x6x64xf32> to vector<2x4x4x64xf32>
    %102 = vector.extract_strided_slice %15 {offsets = [14, 0], sizes = [1, 64], strides = [1, 1]} : vector<27x64xf32> to vector<1x64xf32>
    %103 = vector.shape_cast %102 : vector<1x64xf32> to vector<1x1x1x64xf32>
    %104 = vector.broadcast %103 : vector<1x1x1x64xf32> to vector<2x4x4x64xf32>
    %105 = arith.mulf %101, %104 : vector<2x4x4x64xf32>
    %106 = arith.addf %100, %105 : vector<2x4x4x64xf32>
    %107 = vector.extract_strided_slice %12 {offsets = [1, 2, 0, 0], sizes = [2, 4, 4, 64], strides = [1, 1, 1, 1]} : vector<4x6x6x64xf32> to vector<2x4x4x64xf32>
    %108 = vector.extract_strided_slice %15 {offsets = [15, 0], sizes = [1, 64], strides = [1, 1]} : vector<27x64xf32> to vector<1x64xf32>
    %109 = vector.shape_cast %108 : vector<1x64xf32> to vector<1x1x1x64xf32>
    %110 = vector.broadcast %109 : vector<1x1x1x64xf32> to vector<2x4x4x64xf32>
    %111 = arith.mulf %107, %110 : vector<2x4x4x64xf32>
    %112 = arith.addf %106, %111 : vector<2x4x4x64xf32>
    %113 = vector.extract_strided_slice %12 {offsets = [1, 2, 1, 0], sizes = [2, 4, 4, 64], strides = [1, 1, 1, 1]} : vector<4x6x6x64xf32> to vector<2x4x4x64xf32>
    %114 = vector.extract_strided_slice %15 {offsets = [16, 0], sizes = [1, 64], strides = [1, 1]} : vector<27x64xf32> to vector<1x64xf32>
    %115 = vector.shape_cast %114 : vector<1x64xf32> to vector<1x1x1x64xf32>
    %116 = vector.broadcast %115 : vector<1x1x1x64xf32> to vector<2x4x4x64xf32>
    %117 = arith.mulf %113, %116 : vector<2x4x4x64xf32>
    %118 = arith.addf %112, %117 : vector<2x4x4x64xf32>
    %119 = vector.extract_strided_slice %12 {offsets = [1, 2, 2, 0], sizes = [2, 4, 4, 64], strides = [1, 1, 1, 1]} : vector<4x6x6x64xf32> to vector<2x4x4x64xf32>
    %120 = vector.extract_strided_slice %15 {offsets = [17, 0], sizes = [1, 64], strides = [1, 1]} : vector<27x64xf32> to vector<1x64xf32>
    %121 = vector.shape_cast %120 : vector<1x64xf32> to vector<1x1x1x64xf32>
    %122 = vector.broadcast %121 : vector<1x1x1x64xf32> to vector<2x4x4x64xf32>
    %123 = arith.mulf %119, %122 : vector<2x4x4x64xf32>
    %124 = arith.addf %118, %123 : vector<2x4x4x64xf32>
    %125 = vector.extract_strided_slice %12 {offsets = [2, 0, 0, 0], sizes = [2, 4, 4, 64], strides = [1, 1, 1, 1]} : vector<4x6x6x64xf32> to vector<2x4x4x64xf32>
    %126 = vector.extract_strided_slice %15 {offsets = [18, 0], sizes = [1, 64], strides = [1, 1]} : vector<27x64xf32> to vector<1x64xf32>
    %127 = vector.shape_cast %126 : vector<1x64xf32> to vector<1x1x1x64xf32>
    %128 = vector.broadcast %127 : vector<1x1x1x64xf32> to vector<2x4x4x64xf32>
    %129 = arith.mulf %125, %128 : vector<2x4x4x64xf32>
    %130 = arith.addf %124, %129 : vector<2x4x4x64xf32>
    %131 = vector.extract_strided_slice %12 {offsets = [2, 0, 1, 0], sizes = [2, 4, 4, 64], strides = [1, 1, 1, 1]} : vector<4x6x6x64xf32> to vector<2x4x4x64xf32>
    %132 = vector.extract_strided_slice %15 {offsets = [19, 0], sizes = [1, 64], strides = [1, 1]} : vector<27x64xf32> to vector<1x64xf32>
    %133 = vector.shape_cast %132 : vector<1x64xf32> to vector<1x1x1x64xf32>
    %134 = vector.broadcast %133 : vector<1x1x1x64xf32> to vector<2x4x4x64xf32>
    %135 = arith.mulf %131, %134 : vector<2x4x4x64xf32>
    %136 = arith.addf %130, %135 : vector<2x4x4x64xf32>
    %137 = vector.extract_strided_slice %12 {offsets = [2, 0, 2, 0], sizes = [2, 4, 4, 64], strides = [1, 1, 1, 1]} : vector<4x6x6x64xf32> to vector<2x4x4x64xf32>
    %138 = vector.extract_strided_slice %15 {offsets = [20, 0], sizes = [1, 64], strides = [1, 1]} : vector<27x64xf32> to vector<1x64xf32>
    %139 = vector.shape_cast %138 : vector<1x64xf32> to vector<1x1x1x64xf32>
    %140 = vector.broadcast %139 : vector<1x1x1x64xf32> to vector<2x4x4x64xf32>
    %141 = arith.mulf %137, %140 : vector<2x4x4x64xf32>
    %142 = arith.addf %136, %141 : vector<2x4x4x64xf32>
    %143 = vector.extract_strided_slice %12 {offsets = [2, 1, 0, 0], sizes = [2, 4, 4, 64], strides = [1, 1, 1, 1]} : vector<4x6x6x64xf32> to vector<2x4x4x64xf32>
    %144 = vector.extract_strided_slice %15 {offsets = [21, 0], sizes = [1, 64], strides = [1, 1]} : vector<27x64xf32> to vector<1x64xf32>
    %145 = vector.shape_cast %144 : vector<1x64xf32> to vector<1x1x1x64xf32>
    %146 = vector.broadcast %145 : vector<1x1x1x64xf32> to vector<2x4x4x64xf32>
    %147 = arith.mulf %143, %146 : vector<2x4x4x64xf32>
    %148 = arith.addf %142, %147 : vector<2x4x4x64xf32>
    %149 = vector.extract_strided_slice %12 {offsets = [2, 1, 1, 0], sizes = [2, 4, 4, 64], strides = [1, 1, 1, 1]} : vector<4x6x6x64xf32> to vector<2x4x4x64xf32>
    %150 = vector.extract_strided_slice %15 {offsets = [22, 0], sizes = [1, 64], strides = [1, 1]} : vector<27x64xf32> to vector<1x64xf32>
    %151 = vector.shape_cast %150 : vector<1x64xf32> to vector<1x1x1x64xf32>
    %152 = vector.broadcast %151 : vector<1x1x1x64xf32> to vector<2x4x4x64xf32>
    %153 = arith.mulf %149, %152 : vector<2x4x4x64xf32>
    %154 = arith.addf %148, %153 : vector<2x4x4x64xf32>
    %155 = vector.extract_strided_slice %12 {offsets = [2, 1, 2, 0], sizes = [2, 4, 4, 64], strides = [1, 1, 1, 1]} : vector<4x6x6x64xf32> to vector<2x4x4x64xf32>
    %156 = vector.extract_strided_slice %15 {offsets = [23, 0], sizes = [1, 64], strides = [1, 1]} : vector<27x64xf32> to vector<1x64xf32>
    %157 = vector.shape_cast %156 : vector<1x64xf32> to vector<1x1x1x64xf32>
    %158 = vector.broadcast %157 : vector<1x1x1x64xf32> to vector<2x4x4x64xf32>
    %159 = arith.mulf %155, %158 : vector<2x4x4x64xf32>
    %160 = arith.addf %154, %159 : vector<2x4x4x64xf32>
    %161 = vector.extract_strided_slice %12 {offsets = [2, 2, 0, 0], sizes = [2, 4, 4, 64], strides = [1, 1, 1, 1]} : vector<4x6x6x64xf32> to vector<2x4x4x64xf32>
    %162 = vector.extract_strided_slice %15 {offsets = [24, 0], sizes = [1, 64], strides = [1, 1]} : vector<27x64xf32> to vector<1x64xf32>
    %163 = vector.shape_cast %162 : vector<1x64xf32> to vector<1x1x1x64xf32>
    %164 = vector.broadcast %163 : vector<1x1x1x64xf32> to vector<2x4x4x64xf32>
    %165 = arith.mulf %161, %164 : vector<2x4x4x64xf32>
    %166 = arith.addf %160, %165 : vector<2x4x4x64xf32>
    %167 = vector.extract_strided_slice %12 {offsets = [2, 2, 1, 0], sizes = [2, 4, 4, 64], strides = [1, 1, 1, 1]} : vector<4x6x6x64xf32> to vector<2x4x4x64xf32>
    %168 = vector.extract_strided_slice %15 {offsets = [25, 0], sizes = [1, 64], strides = [1, 1]} : vector<27x64xf32> to vector<1x64xf32>
    %169 = vector.shape_cast %168 : vector<1x64xf32> to vector<1x1x1x64xf32>
    %170 = vector.broadcast %169 : vector<1x1x1x64xf32> to vector<2x4x4x64xf32>
    %171 = arith.mulf %167, %170 : vector<2x4x4x64xf32>
    %172 = arith.addf %166, %171 : vector<2x4x4x64xf32>
    %173 = vector.extract_strided_slice %12 {offsets = [2, 2, 2, 0], sizes = [2, 4, 4, 64], strides = [1, 1, 1, 1]} : vector<4x6x6x64xf32> to vector<2x4x4x64xf32>
    %174 = vector.extract_strided_slice %15 {offsets = [26, 0], sizes = [1, 64], strides = [1, 1]} : vector<27x64xf32> to vector<1x64xf32>
    %175 = vector.shape_cast %174 : vector<1x64xf32> to vector<1x1x1x64xf32>
    %176 = vector.broadcast %175 : vector<1x1x1x64xf32> to vector<2x4x4x64xf32>
    %177 = arith.mulf %173, %176 : vector<2x4x4x64xf32>
    %178 = arith.addf %172, %177 : vector<2x4x4x64xf32>
    %179 = vector.shape_cast %178 : vector<2x4x4x64xf32> to vector<32x64xf32>
    %180 = tpu.concatenate %8, %179 in 0 : vector<1x64xf32>, vector<32x64xf32> -> vector<33x64xf32>
    %cst_25 = arith.constant dense<0.000000e+00> : vector<33x64xf32>
    %181 = tpu.matmul %180, %2, %cst_25 {dimension_numbers = #tpu.dot_dimension_numbers<[1], [0], [0], [1], [0, 0, 1, 1], [], []>} : vector<33x64xf32>, vector<64x64xf32>, vector<33x64xf32> -> vector<33x64xf32>
    %182 = arith.subf %180, %181 : vector<33x64xf32>
    %183 = arith.mulf %182, %182 : vector<33x64xf32>
    %cst_26 = arith.constant dense<0.000000e+00> : vector<33x64xf32>
    %184 = tpu.matmul %183, %2, %cst_26 {dimension_numbers = #tpu.dot_dimension_numbers<[1], [0], [0], [1], [0, 0, 1, 1], [], []>} : vector<33x64xf32>, vector<64x64xf32>, vector<33x64xf32> -> vector<33x64xf32>
    %cst_27 = arith.constant 9.99999974E-6 : f32
    %185 = vector.broadcast %cst_27 : f32 to vector<33x64xf32>
    %186 = arith.addf %184, %185 : vector<33x64xf32>
    %187 = math.rsqrt %186 : vector<33x64xf32>
    %188 = arith.mulf %182, %187 : vector<33x64xf32>
    %c0_28 = arith.constant 0 : index
    %c0_29 = arith.constant 0 : index
    %189 = vector.load %arg4[%c0_28, %c0_29] : memref<3x64xf32, #tpu.memory_space<vmem>>, vector<1x64xf32>
    %c0_30 = arith.constant 0 : index
    %c0_31 = arith.constant 0 : index
    %190 = vector.load %arg5[%c0_30, %c0_31] : memref<3x64xf32, #tpu.memory_space<vmem>>, vector<1x64xf32>
    %191 = vector.broadcast %189 : vector<1x64xf32> to vector<33x64xf32>
    %192 = arith.mulf %188, %191 : vector<33x64xf32>
    %193 = vector.broadcast %190 : vector<1x64xf32> to vector<33x64xf32>
    %194 = arith.addf %192, %193 : vector<33x64xf32>
    %c1_32 = arith.constant 1 : index
    %c0_33 = arith.constant 0 : index
    %c0_34 = arith.constant 0 : index
    %195 = vector.load %arg2[%c1_32, %c0_33, %c0_34] : memref<3x64x64xf32, #tpu.memory_space<vmem>>, vector<1x64x64xf32>
    %196 = vector.shape_cast %195 : vector<1x64x64xf32> to vector<64x64xf32>
    %cst_35 = arith.constant dense<0.000000e+00> : vector<33x64xf32>
    %197 = tpu.matmul %1, %196, %cst_35 {dimension_numbers = #tpu.dot_dimension_numbers<[1], [0], [0], [1], [0, 0, 1, 1], [], []>} : vector<33x64xf32>, vector<64x64xf32>, vector<33x64xf32> -> vector<33x64xf32>
    %198 = vector.extract_strided_slice %197 {offsets = [0, 0], sizes = [1, 64], strides = [1, 1]} : vector<33x64xf32> to vector<1x64xf32>
    %199 = vector.extract_strided_slice %197 {offsets = [1, 0], sizes = [32, 64], strides = [1, 1]} : vector<33x64xf32> to vector<32x64xf32>
    %200 = vector.shape_cast %199 : vector<32x64xf32> to vector<2x4x4x64xf32>
    %c1_36 = arith.constant 1 : index
    %c1_37 = arith.constant 1 : index
    %c1_38 = arith.constant 1 : index
    %c0_39 = arith.constant 0 : index
    %201 = vector.load %arg10[%c1_36, %c1_37, %c1_38, %c0_39] : memref<4x6x6x64xf32, #tpu.memory_space<vmem>>, vector<2x4x4x64xf32>
    tpu.vector_store %arg10[%c1_36, %c1_37, %c1_38, %c0_39], %200 {strides = array<i32>} : memref<4x6x6x64xf32, #tpu.memory_space<vmem>>, vector<2x4x4x64xf32>,
    %c0_40 = arith.constant 0 : index
    %c0_41 = arith.constant 0 : index
    %c0_42 = arith.constant 0 : index
    %c0_43 = arith.constant 0 : index
    %202 = vector.load %arg10[%c0_40, %c0_41, %c0_42, %c0_43] : memref<4x6x6x64xf32, #tpu.memory_space<vmem>>, vector<4x6x6x64xf32>
    %c1_44 = arith.constant 1 : index
    %c0_45 = arith.constant 0 : index
    %c0_46 = arith.constant 0 : index
    %c0_47 = arith.constant 0 : index
    %c0_48 = arith.constant 0 : index
    %203 = vector.load %arg3[%c1_44, %c0_45, %c0_46, %c0_47, %c0_48] : memref<3x3x3x3x64xf32, #tpu.memory_space<vmem>>, vector<1x3x3x3x64xf32>
    %204 = vector.shape_cast %203 : vector<1x3x3x3x64xf32> to vector<3x3x3x64xf32>
    %205 = vector.shape_cast %204 : vector<3x3x3x64xf32> to vector<27x64xf32>
    %cst_49 = arith.constant 0.000000e+00 : f32
    %206 = vector.broadcast %cst_49 : f32 to vector<2x4x4x64xf32>
    %207 = vector.extract_strided_slice %202 {offsets = [0, 0, 0, 0], sizes = [2, 4, 4, 64], strides = [1, 1, 1, 1]} : vector<4x6x6x64xf32> to vector<2x4x4x64xf32>
    %208 = vector.extract_strided_slice %205 {offsets = [0, 0], sizes = [1, 64], strides = [1, 1]} : vector<27x64xf32> to vector<1x64xf32>
    %209 = vector.shape_cast %208 : vector<1x64xf32> to vector<1x1x1x64xf32>
    %210 = vector.broadcast %209 : vector<1x1x1x64xf32> to vector<2x4x4x64xf32>
    %211 = arith.mulf %207, %210 : vector<2x4x4x64xf32>
    %212 = arith.addf %206, %211 : vector<2x4x4x64xf32>
    %213 = vector.extract_strided_slice %202 {offsets = [0, 0, 1, 0], sizes = [2, 4, 4, 64], strides = [1, 1, 1, 1]} : vector<4x6x6x64xf32> to vector<2x4x4x64xf32>
    %214 = vector.extract_strided_slice %205 {offsets = [1, 0], sizes = [1, 64], strides = [1, 1]} : vector<27x64xf32> to vector<1x64xf32>
    %215 = vector.shape_cast %214 : vector<1x64xf32> to vector<1x1x1x64xf32>
    %216 = vector.broadcast %215 : vector<1x1x1x64xf32> to vector<2x4x4x64xf32>
    %217 = arith.mulf %213, %216 : vector<2x4x4x64xf32>
    %218 = arith.addf %212, %217 : vector<2x4x4x64xf32>
    %219 = vector.extract_strided_slice %202 {offsets = [0, 0, 2, 0], sizes = [2, 4, 4, 64], strides = [1, 1, 1, 1]} : vector<4x6x6x64xf32> to vector<2x4x4x64xf32>
    %220 = vector.extract_strided_slice %205 {offsets = [2, 0], sizes = [1, 64], strides = [1, 1]} : vector<27x64xf32> to vector<1x64xf32>
    %221 = vector.shape_cast %220 : vector<1x64xf32> to vector<1x1x1x64xf32>
    %222 = vector.broadcast %221 : vector<1x1x1x64xf32> to vector<2x4x4x64xf32>
    %223 = arith.mulf %219, %222 : vector<2x4x4x64xf32>
    %224 = arith.addf %218, %223 : vector<2x4x4x64xf32>
    %225 = vector.extract_strided_slice %202 {offsets = [0, 1, 0, 0], sizes = [2, 4, 4, 64], strides = [1, 1, 1, 1]} : vector<4x6x6x64xf32> to vector<2x4x4x64xf32>
    %226 = vector.extract_strided_slice %205 {offsets = [3, 0], sizes = [1, 64], strides = [1, 1]} : vector<27x64xf32> to vector<1x64xf32>
    %227 = vector.shape_cast %226 : vector<1x64xf32> to vector<1x1x1x64xf32>
    %228 = vector.broadcast %227 : vector<1x1x1x64xf32> to vector<2x4x4x64xf32>
    %229 = arith.mulf %225, %228 : vector<2x4x4x64xf32>
    %230 = arith.addf %224, %229 : vector<2x4x4x64xf32>
    %231 = vector.extract_strided_slice %202 {offsets = [0, 1, 1, 0], sizes = [2, 4, 4, 64], strides = [1, 1, 1, 1]} : vector<4x6x6x64xf32> to vector<2x4x4x64xf32>
    %232 = vector.extract_strided_slice %205 {offsets = [4, 0], sizes = [1, 64], strides = [1, 1]} : vector<27x64xf32> to vector<1x64xf32>
    %233 = vector.shape_cast %232 : vector<1x64xf32> to vector<1x1x1x64xf32>
    %234 = vector.broadcast %233 : vector<1x1x1x64xf32> to vector<2x4x4x64xf32>
    %235 = arith.mulf %231, %234 : vector<2x4x4x64xf32>
    %236 = arith.addf %230, %235 : vector<2x4x4x64xf32>
    %237 = vector.extract_strided_slice %202 {offsets = [0, 1, 2, 0], sizes = [2, 4, 4, 64], strides = [1, 1, 1, 1]} : vector<4x6x6x64xf32> to vector<2x4x4x64xf32>
    %238 = vector.extract_strided_slice %205 {offsets = [5, 0], sizes = [1, 64], strides = [1, 1]} : vector<27x64xf32> to vector<1x64xf32>
    %239 = vector.shape_cast %238 : vector<1x64xf32> to vector<1x1x1x64xf32>
    %240 = vector.broadcast %239 : vector<1x1x1x64xf32> to vector<2x4x4x64xf32>
    %241 = arith.mulf %237, %240 : vector<2x4x4x64xf32>
    %242 = arith.addf %236, %241 : vector<2x4x4x64xf32>
    %243 = vector.extract_strided_slice %202 {offsets = [0, 2, 0, 0], sizes = [2, 4, 4, 64], strides = [1, 1, 1, 1]} : vector<4x6x6x64xf32> to vector<2x4x4x64xf32>
    %244 = vector.extract_strided_slice %205 {offsets = [6, 0], sizes = [1, 64], strides = [1, 1]} : vector<27x64xf32> to vector<1x64xf32>
    %245 = vector.shape_cast %244 : vector<1x64xf32> to vector<1x1x1x64xf32>
    %246 = vector.broadcast %245 : vector<1x1x1x64xf32> to vector<2x4x4x64xf32>
    %247 = arith.mulf %243, %246 : vector<2x4x4x64xf32>
    %248 = arith.addf %242, %247 : vector<2x4x4x64xf32>
    %249 = vector.extract_strided_slice %202 {offsets = [0, 2, 1, 0], sizes = [2, 4, 4, 64], strides = [1, 1, 1, 1]} : vector<4x6x6x64xf32> to vector<2x4x4x64xf32>
    %250 = vector.extract_strided_slice %205 {offsets = [7, 0], sizes = [1, 64], strides = [1, 1]} : vector<27x64xf32> to vector<1x64xf32>
    %251 = vector.shape_cast %250 : vector<1x64xf32> to vector<1x1x1x64xf32>
    %252 = vector.broadcast %251 : vector<1x1x1x64xf32> to vector<2x4x4x64xf32>
    %253 = arith.mulf %249, %252 : vector<2x4x4x64xf32>
    %254 = arith.addf %248, %253 : vector<2x4x4x64xf32>
    %255 = vector.extract_strided_slice %202 {offsets = [0, 2, 2, 0], sizes = [2, 4, 4, 64], strides = [1, 1, 1, 1]} : vector<4x6x6x64xf32> to vector<2x4x4x64xf32>
    %256 = vector.extract_strided_slice %205 {offsets = [8, 0], sizes = [1, 64], strides = [1, 1]} : vector<27x64xf32> to vector<1x64xf32>
    %257 = vector.shape_cast %256 : vector<1x64xf32> to vector<1x1x1x64xf32>
    %258 = vector.broadcast %257 : vector<1x1x1x64xf32> to vector<2x4x4x64xf32>
    %259 = arith.mulf %255, %258 : vector<2x4x4x64xf32>
    %260 = arith.addf %254, %259 : vector<2x4x4x64xf32>
    %261 = vector.extract_strided_slice %202 {offsets = [1, 0, 0, 0], sizes = [2, 4, 4, 64], strides = [1, 1, 1, 1]} : vector<4x6x6x64xf32> to vector<2x4x4x64xf32>
    %262 = vector.extract_strided_slice %205 {offsets = [9, 0], sizes = [1, 64], strides = [1, 1]} : vector<27x64xf32> to vector<1x64xf32>
    %263 = vector.shape_cast %262 : vector<1x64xf32> to vector<1x1x1x64xf32>
    %264 = vector.broadcast %263 : vector<1x1x1x64xf32> to vector<2x4x4x64xf32>
    %265 = arith.mulf %261, %264 : vector<2x4x4x64xf32>
    %266 = arith.addf %260, %265 : vector<2x4x4x64xf32>
    %267 = vector.extract_strided_slice %202 {offsets = [1, 0, 1, 0], sizes = [2, 4, 4, 64], strides = [1, 1, 1, 1]} : vector<4x6x6x64xf32> to vector<2x4x4x64xf32>
    %268 = vector.extract_strided_slice %205 {offsets = [10, 0], sizes = [1, 64], strides = [1, 1]} : vector<27x64xf32> to vector<1x64xf32>
    %269 = vector.shape_cast %268 : vector<1x64xf32> to vector<1x1x1x64xf32>
    %270 = vector.broadcast %269 : vector<1x1x1x64xf32> to vector<2x4x4x64xf32>
    %271 = arith.mulf %267, %270 : vector<2x4x4x64xf32>
    %272 = arith.addf %266, %271 : vector<2x4x4x64xf32>
    %273 = vector.extract_strided_slice %202 {offsets = [1, 0, 2, 0], sizes = [2, 4, 4, 64], strides = [1, 1, 1, 1]} : vector<4x6x6x64xf32> to vector<2x4x4x64xf32>
    %274 = vector.extract_strided_slice %205 {offsets = [11, 0], sizes = [1, 64], strides = [1, 1]} : vector<27x64xf32> to vector<1x64xf32>
    %275 = vector.shape_cast %274 : vector<1x64xf32> to vector<1x1x1x64xf32>
    %276 = vector.broadcast %275 : vector<1x1x1x64xf32> to vector<2x4x4x64xf32>
    %277 = arith.mulf %273, %276 : vector<2x4x4x64xf32>
    %278 = arith.addf %272, %277 : vector<2x4x4x64xf32>
    %279 = vector.extract_strided_slice %202 {offsets = [1, 1, 0, 0], sizes = [2, 4, 4, 64], strides = [1, 1, 1, 1]} : vector<4x6x6x64xf32> to vector<2x4x4x64xf32>
    %280 = vector.extract_strided_slice %205 {offsets = [12, 0], sizes = [1, 64], strides = [1, 1]} : vector<27x64xf32> to vector<1x64xf32>
    %281 = vector.shape_cast %280 : vector<1x64xf32> to vector<1x1x1x64xf32>
    %282 = vector.broadcast %281 : vector<1x1x1x64xf32> to vector<2x4x4x64xf32>
    %283 = arith.mulf %279, %282 : vector<2x4x4x64xf32>
    %284 = arith.addf %278, %283 : vector<2x4x4x64xf32>
    %285 = vector.extract_strided_slice %202 {offsets = [1, 1, 1, 0], sizes = [2, 4, 4, 64], strides = [1, 1, 1, 1]} : vector<4x6x6x64xf32> to vector<2x4x4x64xf32>
    %286 = vector.extract_strided_slice %205 {offsets = [13, 0], sizes = [1, 64], strides = [1, 1]} : vector<27x64xf32> to vector<1x64xf32>
    %287 = vector.shape_cast %286 : vector<1x64xf32> to vector<1x1x1x64xf32>
    %288 = vector.broadcast %287 : vector<1x1x1x64xf32> to vector<2x4x4x64xf32>
    %289 = arith.mulf %285, %288 : vector<2x4x4x64xf32>
    %290 = arith.addf %284, %289 : vector<2x4x4x64xf32>
    %291 = vector.extract_strided_slice %202 {offsets = [1, 1, 2, 0], sizes = [2, 4, 4, 64], strides = [1, 1, 1, 1]} : vector<4x6x6x64xf32> to vector<2x4x4x64xf32>
    %292 = vector.extract_strided_slice %205 {offsets = [14, 0], sizes = [1, 64], strides = [1, 1]} : vector<27x64xf32> to vector<1x64xf32>
    %293 = vector.shape_cast %292 : vector<1x64xf32> to vector<1x1x1x64xf32>
    %294 = vector.broadcast %293 : vector<1x1x1x64xf32> to vector<2x4x4x64xf32>
    %295 = arith.mulf %291, %294 : vector<2x4x4x64xf32>
    %296 = arith.addf %290, %295 : vector<2x4x4x64xf32>
    %297 = vector.extract_strided_slice %202 {offsets = [1, 2, 0, 0], sizes = [2, 4, 4, 64], strides = [1, 1, 1, 1]} : vector<4x6x6x64xf32> to vector<2x4x4x64xf32>
    %298 = vector.extract_strided_slice %205 {offsets = [15, 0], sizes = [1, 64], strides = [1, 1]} : vector<27x64xf32> to vector<1x64xf32>
    %299 = vector.shape_cast %298 : vector<1x64xf32> to vector<1x1x1x64xf32>
    %300 = vector.broadcast %299 : vector<1x1x1x64xf32> to vector<2x4x4x64xf32>
    %301 = arith.mulf %297, %300 : vector<2x4x4x64xf32>
    %302 = arith.addf %296, %301 : vector<2x4x4x64xf32>
    %303 = vector.extract_strided_slice %202 {offsets = [1, 2, 1, 0], sizes = [2, 4, 4, 64], strides = [1, 1, 1, 1]} : vector<4x6x6x64xf32> to vector<2x4x4x64xf32>
    %304 = vector.extract_strided_slice %205 {offsets = [16, 0], sizes = [1, 64], strides = [1, 1]} : vector<27x64xf32> to vector<1x64xf32>
    %305 = vector.shape_cast %304 : vector<1x64xf32> to vector<1x1x1x64xf32>
    %306 = vector.broadcast %305 : vector<1x1x1x64xf32> to vector<2x4x4x64xf32>
    %307 = arith.mulf %303, %306 : vector<2x4x4x64xf32>
    %308 = arith.addf %302, %307 : vector<2x4x4x64xf32>
    %309 = vector.extract_strided_slice %202 {offsets = [1, 2, 2, 0], sizes = [2, 4, 4, 64], strides = [1, 1, 1, 1]} : vector<4x6x6x64xf32> to vector<2x4x4x64xf32>
    %310 = vector.extract_strided_slice %205 {offsets = [17, 0], sizes = [1, 64], strides = [1, 1]} : vector<27x64xf32> to vector<1x64xf32>
    %311 = vector.shape_cast %310 : vector<1x64xf32> to vector<1x1x1x64xf32>
    %312 = vector.broadcast %311 : vector<1x1x1x64xf32> to vector<2x4x4x64xf32>
    %313 = arith.mulf %309, %312 : vector<2x4x4x64xf32>
    %314 = arith.addf %308, %313 : vector<2x4x4x64xf32>
    %315 = vector.extract_strided_slice %202 {offsets = [2, 0, 0, 0], sizes = [2, 4, 4, 64], strides = [1, 1, 1, 1]} : vector<4x6x6x64xf32> to vector<2x4x4x64xf32>
    %316 = vector.extract_strided_slice %205 {offsets = [18, 0], sizes = [1, 64], strides = [1, 1]} : vector<27x64xf32> to vector<1x64xf32>
    %317 = vector.shape_cast %316 : vector<1x64xf32> to vector<1x1x1x64xf32>
    %318 = vector.broadcast %317 : vector<1x1x1x64xf32> to vector<2x4x4x64xf32>
    %319 = arith.mulf %315, %318 : vector<2x4x4x64xf32>
    %320 = arith.addf %314, %319 : vector<2x4x4x64xf32>
    %321 = vector.extract_strided_slice %202 {offsets = [2, 0, 1, 0], sizes = [2, 4, 4, 64], strides = [1, 1, 1, 1]} : vector<4x6x6x64xf32> to vector<2x4x4x64xf32>
    %322 = vector.extract_strided_slice %205 {offsets = [19, 0], sizes = [1, 64], strides = [1, 1]} : vector<27x64xf32> to vector<1x64xf32>
    %323 = vector.shape_cast %322 : vector<1x64xf32> to vector<1x1x1x64xf32>
    %324 = vector.broadcast %323 : vector<1x1x1x64xf32> to vector<2x4x4x64xf32>
    %325 = arith.mulf %321, %324 : vector<2x4x4x64xf32>
    %326 = arith.addf %320, %325 : vector<2x4x4x64xf32>
    %327 = vector.extract_strided_slice %202 {offsets = [2, 0, 2, 0], sizes = [2, 4, 4, 64], strides = [1, 1, 1, 1]} : vector<4x6x6x64xf32> to vector<2x4x4x64xf32>
    %328 = vector.extract_strided_slice %205 {offsets = [20, 0], sizes = [1, 64], strides = [1, 1]} : vector<27x64xf32> to vector<1x64xf32>
    %329 = vector.shape_cast %328 : vector<1x64xf32> to vector<1x1x1x64xf32>
    %330 = vector.broadcast %329 : vector<1x1x1x64xf32> to vector<2x4x4x64xf32>
    %331 = arith.mulf %327, %330 : vector<2x4x4x64xf32>
    %332 = arith.addf %326, %331 : vector<2x4x4x64xf32>
    %333 = vector.extract_strided_slice %202 {offsets = [2, 1, 0, 0], sizes = [2, 4, 4, 64], strides = [1, 1, 1, 1]} : vector<4x6x6x64xf32> to vector<2x4x4x64xf32>
    %334 = vector.extract_strided_slice %205 {offsets = [21, 0], sizes = [1, 64], strides = [1, 1]} : vector<27x64xf32> to vector<1x64xf32>
    %335 = vector.shape_cast %334 : vector<1x64xf32> to vector<1x1x1x64xf32>
    %336 = vector.broadcast %335 : vector<1x1x1x64xf32> to vector<2x4x4x64xf32>
    %337 = arith.mulf %333, %336 : vector<2x4x4x64xf32>
    %338 = arith.addf %332, %337 : vector<2x4x4x64xf32>
    %339 = vector.extract_strided_slice %202 {offsets = [2, 1, 1, 0], sizes = [2, 4, 4, 64], strides = [1, 1, 1, 1]} : vector<4x6x6x64xf32> to vector<2x4x4x64xf32>
    %340 = vector.extract_strided_slice %205 {offsets = [22, 0], sizes = [1, 64], strides = [1, 1]} : vector<27x64xf32> to vector<1x64xf32>
    %341 = vector.shape_cast %340 : vector<1x64xf32> to vector<1x1x1x64xf32>
    %342 = vector.broadcast %341 : vector<1x1x1x64xf32> to vector<2x4x4x64xf32>
    %343 = arith.mulf %339, %342 : vector<2x4x4x64xf32>
    %344 = arith.addf %338, %343 : vector<2x4x4x64xf32>
    %345 = vector.extract_strided_slice %202 {offsets = [2, 1, 2, 0], sizes = [2, 4, 4, 64], strides = [1, 1, 1, 1]} : vector<4x6x6x64xf32> to vector<2x4x4x64xf32>
    %346 = vector.extract_strided_slice %205 {offsets = [23, 0], sizes = [1, 64], strides = [1, 1]} : vector<27x64xf32> to vector<1x64xf32>
    %347 = vector.shape_cast %346 : vector<1x64xf32> to vector<1x1x1x64xf32>
    %348 = vector.broadcast %347 : vector<1x1x1x64xf32> to vector<2x4x4x64xf32>
    %349 = arith.mulf %345, %348 : vector<2x4x4x64xf32>
    %350 = arith.addf %344, %349 : vector<2x4x4x64xf32>
    %351 = vector.extract_strided_slice %202 {offsets = [2, 2, 0, 0], sizes = [2, 4, 4, 64], strides = [1, 1, 1, 1]} : vector<4x6x6x64xf32> to vector<2x4x4x64xf32>
    %352 = vector.extract_strided_slice %205 {offsets = [24, 0], sizes = [1, 64], strides = [1, 1]} : vector<27x64xf32> to vector<1x64xf32>
    %353 = vector.shape_cast %352 : vector<1x64xf32> to vector<1x1x1x64xf32>
    %354 = vector.broadcast %353 : vector<1x1x1x64xf32> to vector<2x4x4x64xf32>
    %355 = arith.mulf %351, %354 : vector<2x4x4x64xf32>
    %356 = arith.addf %350, %355 : vector<2x4x4x64xf32>
    %357 = vector.extract_strided_slice %202 {offsets = [2, 2, 1, 0], sizes = [2, 4, 4, 64], strides = [1, 1, 1, 1]} : vector<4x6x6x64xf32> to vector<2x4x4x64xf32>
    %358 = vector.extract_strided_slice %205 {offsets = [25, 0], sizes = [1, 64], strides = [1, 1]} : vector<27x64xf32> to vector<1x64xf32>
    %359 = vector.shape_cast %358 : vector<1x64xf32> to vector<1x1x1x64xf32>
    %360 = vector.broadcast %359 : vector<1x1x1x64xf32> to vector<2x4x4x64xf32>
    %361 = arith.mulf %357, %360 : vector<2x4x4x64xf32>
    %362 = arith.addf %356, %361 : vector<2x4x4x64xf32>
    %363 = vector.extract_strided_slice %202 {offsets = [2, 2, 2, 0], sizes = [2, 4, 4, 64], strides = [1, 1, 1, 1]} : vector<4x6x6x64xf32> to vector<2x4x4x64xf32>
    %364 = vector.extract_strided_slice %205 {offsets = [26, 0], sizes = [1, 64], strides = [1, 1]} : vector<27x64xf32> to vector<1x64xf32>
    %365 = vector.shape_cast %364 : vector<1x64xf32> to vector<1x1x1x64xf32>
    %366 = vector.broadcast %365 : vector<1x1x1x64xf32> to vector<2x4x4x64xf32>
    %367 = arith.mulf %363, %366 : vector<2x4x4x64xf32>
    %368 = arith.addf %362, %367 : vector<2x4x4x64xf32>
    %369 = vector.extract_strided_slice %368 {offsets = [0, 0, 0, 0], sizes = [2, 1, 4, 64], strides = [1, 1, 1, 1]} : vector<2x4x4x64xf32> to vector<2x1x4x64xf32>
    %370 = vector.extract_strided_slice %368 {offsets = [0, 2, 0, 0], sizes = [2, 1, 4, 64], strides = [1, 1, 1, 1]} : vector<2x4x4x64xf32> to vector<2x1x4x64xf32>
    %371 = tpu.concatenate %369, %370 in 1 : vector<2x1x4x64xf32>, vector<2x1x4x64xf32> -> vector<2x2x4x64xf32>
    %372 = vector.extract_strided_slice %371 {offsets = [0, 0, 0, 0], sizes = [2, 2, 1, 64], strides = [1, 1, 1, 1]} : vector<2x2x4x64xf32> to vector<2x2x1x64xf32>
    %373 = vector.extract_strided_slice %371 {offsets = [0, 0, 2, 0], sizes = [2, 2, 1, 64], strides = [1, 1, 1, 1]} : vector<2x2x4x64xf32> to vector<2x2x1x64xf32>
    %374 = tpu.concatenate %372, %373 in 2 : vector<2x2x1x64xf32>, vector<2x2x1x64xf32> -> vector<2x2x2x64xf32>
    %375 = vector.shape_cast %374 : vector<2x2x2x64xf32> to vector<8x64xf32>
    %376 = tpu.concatenate %198, %375 in 0 : vector<1x64xf32>, vector<8x64xf32> -> vector<9x64xf32>
    %cst_50 = arith.constant dense<0.000000e+00> : vector<9x64xf32>
    %377 = tpu.matmul %376, %2, %cst_50 {dimension_numbers = #tpu.dot_dimension_numbers<[1], [0], [0], [1], [0, 0, 1, 1], [], []>} : vector<9x64xf32>, vector<64x64xf32>, vector<9x64xf32> -> vector<9x64xf32>
    %378 = arith.subf %376, %377 : vector<9x64xf32>
    %379 = arith.mulf %378, %378 : vector<9x64xf32>
    %cst_51 = arith.constant dense<0.000000e+00> : vector<9x64xf32>
    %380 = tpu.matmul %379, %2, %cst_51 {dimension_numbers = #tpu.dot_dimension_numbers<[1], [0], [0], [1], [0, 0, 1, 1], [], []>} : vector<9x64xf32>, vector<64x64xf32>, vector<9x64xf32> -> vector<9x64xf32>
    %cst_52 = arith.constant 9.99999974E-6 : f32
    %381 = vector.broadcast %cst_52 : f32 to vector<9x64xf32>
    %382 = arith.addf %380, %381 : vector<9x64xf32>
    %383 = math.rsqrt %382 : vector<9x64xf32>
    %384 = arith.mulf %378, %383 : vector<9x64xf32>
    %c1_53 = arith.constant 1 : index
    %c0_54 = arith.constant 0 : index
    %385 = vector.load %arg4[%c1_53, %c0_54] : memref<3x64xf32, #tpu.memory_space<vmem>>, vector<1x64xf32>
    %c1_55 = arith.constant 1 : index
    %c0_56 = arith.constant 0 : index
    %386 = vector.load %arg5[%c1_55, %c0_56] : memref<3x64xf32, #tpu.memory_space<vmem>>, vector<1x64xf32>
    %387 = vector.broadcast %385 : vector<1x64xf32> to vector<9x64xf32>
    %388 = arith.mulf %384, %387 : vector<9x64xf32>
    %389 = vector.broadcast %386 : vector<1x64xf32> to vector<9x64xf32>
    %390 = arith.addf %388, %389 : vector<9x64xf32>
    %c2 = arith.constant 2 : index
    %c0_57 = arith.constant 0 : index
    %c0_58 = arith.constant 0 : index
    %391 = vector.load %arg2[%c2, %c0_57, %c0_58] : memref<3x64x64xf32, #tpu.memory_space<vmem>>, vector<1x64x64xf32>
    %392 = vector.shape_cast %391 : vector<1x64x64xf32> to vector<64x64xf32>
    %cst_59 = arith.constant dense<0.000000e+00> : vector<33x64xf32>
    %393 = tpu.matmul %1, %392, %cst_59 {dimension_numbers = #tpu.dot_dimension_numbers<[1], [0], [0], [1], [0, 0, 1, 1], [], []>} : vector<33x64xf32>, vector<64x64xf32>, vector<33x64xf32> -> vector<33x64xf32>
    %394 = vector.extract_strided_slice %393 {offsets = [0, 0], sizes = [1, 64], strides = [1, 1]} : vector<33x64xf32> to vector<1x64xf32>
    %395 = vector.extract_strided_slice %393 {offsets = [1, 0], sizes = [32, 64], strides = [1, 1]} : vector<33x64xf32> to vector<32x64xf32>
    %396 = vector.shape_cast %395 : vector<32x64xf32> to vector<2x4x4x64xf32>
    %c1_60 = arith.constant 1 : index
    %c1_61 = arith.constant 1 : index
    %c1_62 = arith.constant 1 : index
    %c0_63 = arith.constant 0 : index
    %397 = vector.load %arg10[%c1_60, %c1_61, %c1_62, %c0_63] : memref<4x6x6x64xf32, #tpu.memory_space<vmem>>, vector<2x4x4x64xf32>
    tpu.vector_store %arg10[%c1_60, %c1_61, %c1_62, %c0_63], %396 {strides = array<i32>} : memref<4x6x6x64xf32, #tpu.memory_space<vmem>>, vector<2x4x4x64xf32>,
    %c0_64 = arith.constant 0 : index
    %c0_65 = arith.constant 0 : index
    %c0_66 = arith.constant 0 : index
    %c0_67 = arith.constant 0 : index
    %398 = vector.load %arg10[%c0_64, %c0_65, %c0_66, %c0_67] : memref<4x6x6x64xf32, #tpu.memory_space<vmem>>, vector<4x6x6x64xf32>
    %c2_68 = arith.constant 2 : index
    %c0_69 = arith.constant 0 : index
    %c0_70 = arith.constant 0 : index
    %c0_71 = arith.constant 0 : index
    %c0_72 = arith.constant 0 : index
    %399 = vector.load %arg3[%c2_68, %c0_69, %c0_70, %c0_71, %c0_72] : memref<3x3x3x3x64xf32, #tpu.memory_space<vmem>>, vector<1x3x3x3x64xf32>
    %400 = vector.shape_cast %399 : vector<1x3x3x3x64xf32> to vector<3x3x3x64xf32>
    %401 = vector.shape_cast %400 : vector<3x3x3x64xf32> to vector<27x64xf32>
    %cst_73 = arith.constant 0.000000e+00 : f32
    %402 = vector.broadcast %cst_73 : f32 to vector<2x4x4x64xf32>
    %403 = vector.extract_strided_slice %398 {offsets = [0, 0, 0, 0], sizes = [2, 4, 4, 64], strides = [1, 1, 1, 1]} : vector<4x6x6x64xf32> to vector<2x4x4x64xf32>
    %404 = vector.extract_strided_slice %401 {offsets = [0, 0], sizes = [1, 64], strides = [1, 1]} : vector<27x64xf32> to vector<1x64xf32>
    %405 = vector.shape_cast %404 : vector<1x64xf32> to vector<1x1x1x64xf32>
    %406 = vector.broadcast %405 : vector<1x1x1x64xf32> to vector<2x4x4x64xf32>
    %407 = arith.mulf %403, %406 : vector<2x4x4x64xf32>
    %408 = arith.addf %402, %407 : vector<2x4x4x64xf32>
    %409 = vector.extract_strided_slice %398 {offsets = [0, 0, 1, 0], sizes = [2, 4, 4, 64], strides = [1, 1, 1, 1]} : vector<4x6x6x64xf32> to vector<2x4x4x64xf32>
    %410 = vector.extract_strided_slice %401 {offsets = [1, 0], sizes = [1, 64], strides = [1, 1]} : vector<27x64xf32> to vector<1x64xf32>
    %411 = vector.shape_cast %410 : vector<1x64xf32> to vector<1x1x1x64xf32>
    %412 = vector.broadcast %411 : vector<1x1x1x64xf32> to vector<2x4x4x64xf32>
    %413 = arith.mulf %409, %412 : vector<2x4x4x64xf32>
    %414 = arith.addf %408, %413 : vector<2x4x4x64xf32>
    %415 = vector.extract_strided_slice %398 {offsets = [0, 0, 2, 0], sizes = [2, 4, 4, 64], strides = [1, 1, 1, 1]} : vector<4x6x6x64xf32> to vector<2x4x4x64xf32>
    %416 = vector.extract_strided_slice %401 {offsets = [2, 0], sizes = [1, 64], strides = [1, 1]} : vector<27x64xf32> to vector<1x64xf32>
    %417 = vector.shape_cast %416 : vector<1x64xf32> to vector<1x1x1x64xf32>
    %418 = vector.broadcast %417 : vector<1x1x1x64xf32> to vector<2x4x4x64xf32>
    %419 = arith.mulf %415, %418 : vector<2x4x4x64xf32>
    %420 = arith.addf %414, %419 : vector<2x4x4x64xf32>
    %421 = vector.extract_strided_slice %398 {offsets = [0, 1, 0, 0], sizes = [2, 4, 4, 64], strides = [1, 1, 1, 1]} : vector<4x6x6x64xf32> to vector<2x4x4x64xf32>
    %422 = vector.extract_strided_slice %401 {offsets = [3, 0], sizes = [1, 64], strides = [1, 1]} : vector<27x64xf32> to vector<1x64xf32>
    %423 = vector.shape_cast %422 : vector<1x64xf32> to vector<1x1x1x64xf32>
    %424 = vector.broadcast %423 : vector<1x1x1x64xf32> to vector<2x4x4x64xf32>
    %425 = arith.mulf %421, %424 : vector<2x4x4x64xf32>
    %426 = arith.addf %420, %425 : vector<2x4x4x64xf32>
    %427 = vector.extract_strided_slice %398 {offsets = [0, 1, 1, 0], sizes = [2, 4, 4, 64], strides = [1, 1, 1, 1]} : vector<4x6x6x64xf32> to vector<2x4x4x64xf32>
    %428 = vector.extract_strided_slice %401 {offsets = [4, 0], sizes = [1, 64], strides = [1, 1]} : vector<27x64xf32> to vector<1x64xf32>
    %429 = vector.shape_cast %428 : vector<1x64xf32> to vector<1x1x1x64xf32>
    %430 = vector.broadcast %429 : vector<1x1x1x64xf32> to vector<2x4x4x64xf32>
    %431 = arith.mulf %427, %430 : vector<2x4x4x64xf32>
    %432 = arith.addf %426, %431 : vector<2x4x4x64xf32>
    %433 = vector.extract_strided_slice %398 {offsets = [0, 1, 2, 0], sizes = [2, 4, 4, 64], strides = [1, 1, 1, 1]} : vector<4x6x6x64xf32> to vector<2x4x4x64xf32>
    %434 = vector.extract_strided_slice %401 {offsets = [5, 0], sizes = [1, 64], strides = [1, 1]} : vector<27x64xf32> to vector<1x64xf32>
    %435 = vector.shape_cast %434 : vector<1x64xf32> to vector<1x1x1x64xf32>
    %436 = vector.broadcast %435 : vector<1x1x1x64xf32> to vector<2x4x4x64xf32>
    %437 = arith.mulf %433, %436 : vector<2x4x4x64xf32>
    %438 = arith.addf %432, %437 : vector<2x4x4x64xf32>
    %439 = vector.extract_strided_slice %398 {offsets = [0, 2, 0, 0], sizes = [2, 4, 4, 64], strides = [1, 1, 1, 1]} : vector<4x6x6x64xf32> to vector<2x4x4x64xf32>
    %440 = vector.extract_strided_slice %401 {offsets = [6, 0], sizes = [1, 64], strides = [1, 1]} : vector<27x64xf32> to vector<1x64xf32>
    %441 = vector.shape_cast %440 : vector<1x64xf32> to vector<1x1x1x64xf32>
    %442 = vector.broadcast %441 : vector<1x1x1x64xf32> to vector<2x4x4x64xf32>
    %443 = arith.mulf %439, %442 : vector<2x4x4x64xf32>
    %444 = arith.addf %438, %443 : vector<2x4x4x64xf32>
    %445 = vector.extract_strided_slice %398 {offsets = [0, 2, 1, 0], sizes = [2, 4, 4, 64], strides = [1, 1, 1, 1]} : vector<4x6x6x64xf32> to vector<2x4x4x64xf32>
    %446 = vector.extract_strided_slice %401 {offsets = [7, 0], sizes = [1, 64], strides = [1, 1]} : vector<27x64xf32> to vector<1x64xf32>
    %447 = vector.shape_cast %446 : vector<1x64xf32> to vector<1x1x1x64xf32>
    %448 = vector.broadcast %447 : vector<1x1x1x64xf32> to vector<2x4x4x64xf32>
    %449 = arith.mulf %445, %448 : vector<2x4x4x64xf32>
    %450 = arith.addf %444, %449 : vector<2x4x4x64xf32>
    %451 = vector.extract_strided_slice %398 {offsets = [0, 2, 2, 0], sizes = [2, 4, 4, 64], strides = [1, 1, 1, 1]} : vector<4x6x6x64xf32> to vector<2x4x4x64xf32>
    %452 = vector.extract_strided_slice %401 {offsets = [8, 0], sizes = [1, 64], strides = [1, 1]} : vector<27x64xf32> to vector<1x64xf32>
    %453 = vector.shape_cast %452 : vector<1x64xf32> to vector<1x1x1x64xf32>
    %454 = vector.broadcast %453 : vector<1x1x1x64xf32> to vector<2x4x4x64xf32>
    %455 = arith.mulf %451, %454 : vector<2x4x4x64xf32>
    %456 = arith.addf %450, %455 : vector<2x4x4x64xf32>
    %457 = vector.extract_strided_slice %398 {offsets = [1, 0, 0, 0], sizes = [2, 4, 4, 64], strides = [1, 1, 1, 1]} : vector<4x6x6x64xf32> to vector<2x4x4x64xf32>
    %458 = vector.extract_strided_slice %401 {offsets = [9, 0], sizes = [1, 64], strides = [1, 1]} : vector<27x64xf32> to vector<1x64xf32>
    %459 = vector.shape_cast %458 : vector<1x64xf32> to vector<1x1x1x64xf32>
    %460 = vector.broadcast %459 : vector<1x1x1x64xf32> to vector<2x4x4x64xf32>
    %461 = arith.mulf %457, %460 : vector<2x4x4x64xf32>
    %462 = arith.addf %456, %461 : vector<2x4x4x64xf32>
    %463 = vector.extract_strided_slice %398 {offsets = [1, 0, 1, 0], sizes = [2, 4, 4, 64], strides = [1, 1, 1, 1]} : vector<4x6x6x64xf32> to vector<2x4x4x64xf32>
    %464 = vector.extract_strided_slice %401 {offsets = [10, 0], sizes = [1, 64], strides = [1, 1]} : vector<27x64xf32> to vector<1x64xf32>
    %465 = vector.shape_cast %464 : vector<1x64xf32> to vector<1x1x1x64xf32>
    %466 = vector.broadcast %465 : vector<1x1x1x64xf32> to vector<2x4x4x64xf32>
    %467 = arith.mulf %463, %466 : vector<2x4x4x64xf32>
    %468 = arith.addf %462, %467 : vector<2x4x4x64xf32>
    %469 = vector.extract_strided_slice %398 {offsets = [1, 0, 2, 0], sizes = [2, 4, 4, 64], strides = [1, 1, 1, 1]} : vector<4x6x6x64xf32> to vector<2x4x4x64xf32>
    %470 = vector.extract_strided_slice %401 {offsets = [11, 0], sizes = [1, 64], strides = [1, 1]} : vector<27x64xf32> to vector<1x64xf32>
    %471 = vector.shape_cast %470 : vector<1x64xf32> to vector<1x1x1x64xf32>
    %472 = vector.broadcast %471 : vector<1x1x1x64xf32> to vector<2x4x4x64xf32>
    %473 = arith.mulf %469, %472 : vector<2x4x4x64xf32>
    %474 = arith.addf %468, %473 : vector<2x4x4x64xf32>
    %475 = vector.extract_strided_slice %398 {offsets = [1, 1, 0, 0], sizes = [2, 4, 4, 64], strides = [1, 1, 1, 1]} : vector<4x6x6x64xf32> to vector<2x4x4x64xf32>
    %476 = vector.extract_strided_slice %401 {offsets = [12, 0], sizes = [1, 64], strides = [1, 1]} : vector<27x64xf32> to vector<1x64xf32>
    %477 = vector.shape_cast %476 : vector<1x64xf32> to vector<1x1x1x64xf32>
    %478 = vector.broadcast %477 : vector<1x1x1x64xf32> to vector<2x4x4x64xf32>
    %479 = arith.mulf %475, %478 : vector<2x4x4x64xf32>
    %480 = arith.addf %474, %479 : vector<2x4x4x64xf32>
    %481 = vector.extract_strided_slice %398 {offsets = [1, 1, 1, 0], sizes = [2, 4, 4, 64], strides = [1, 1, 1, 1]} : vector<4x6x6x64xf32> to vector<2x4x4x64xf32>
    %482 = vector.extract_strided_slice %401 {offsets = [13, 0], sizes = [1, 64], strides = [1, 1]} : vector<27x64xf32> to vector<1x64xf32>
    %483 = vector.shape_cast %482 : vector<1x64xf32> to vector<1x1x1x64xf32>
    %484 = vector.broadcast %483 : vector<1x1x1x64xf32> to vector<2x4x4x64xf32>
    %485 = arith.mulf %481, %484 : vector<2x4x4x64xf32>
    %486 = arith.addf %480, %485 : vector<2x4x4x64xf32>
    %487 = vector.extract_strided_slice %398 {offsets = [1, 1, 2, 0], sizes = [2, 4, 4, 64], strides = [1, 1, 1, 1]} : vector<4x6x6x64xf32> to vector<2x4x4x64xf32>
    %488 = vector.extract_strided_slice %401 {offsets = [14, 0], sizes = [1, 64], strides = [1, 1]} : vector<27x64xf32> to vector<1x64xf32>
    %489 = vector.shape_cast %488 : vector<1x64xf32> to vector<1x1x1x64xf32>
    %490 = vector.broadcast %489 : vector<1x1x1x64xf32> to vector<2x4x4x64xf32>
    %491 = arith.mulf %487, %490 : vector<2x4x4x64xf32>
    %492 = arith.addf %486, %491 : vector<2x4x4x64xf32>
    %493 = vector.extract_strided_slice %398 {offsets = [1, 2, 0, 0], sizes = [2, 4, 4, 64], strides = [1, 1, 1, 1]} : vector<4x6x6x64xf32> to vector<2x4x4x64xf32>
    %494 = vector.extract_strided_slice %401 {offsets = [15, 0], sizes = [1, 64], strides = [1, 1]} : vector<27x64xf32> to vector<1x64xf32>
    %495 = vector.shape_cast %494 : vector<1x64xf32> to vector<1x1x1x64xf32>
    %496 = vector.broadcast %495 : vector<1x1x1x64xf32> to vector<2x4x4x64xf32>
    %497 = arith.mulf %493, %496 : vector<2x4x4x64xf32>
    %498 = arith.addf %492, %497 : vector<2x4x4x64xf32>
    %499 = vector.extract_strided_slice %398 {offsets = [1, 2, 1, 0], sizes = [2, 4, 4, 64], strides = [1, 1, 1, 1]} : vector<4x6x6x64xf32> to vector<2x4x4x64xf32>
    %500 = vector.extract_strided_slice %401 {offsets = [16, 0], sizes = [1, 64], strides = [1, 1]} : vector<27x64xf32> to vector<1x64xf32>
    %501 = vector.shape_cast %500 : vector<1x64xf32> to vector<1x1x1x64xf32>
    %502 = vector.broadcast %501 : vector<1x1x1x64xf32> to vector<2x4x4x64xf32>
    %503 = arith.mulf %499, %502 : vector<2x4x4x64xf32>
    %504 = arith.addf %498, %503 : vector<2x4x4x64xf32>
    %505 = vector.extract_strided_slice %398 {offsets = [1, 2, 2, 0], sizes = [2, 4, 4, 64], strides = [1, 1, 1, 1]} : vector<4x6x6x64xf32> to vector<2x4x4x64xf32>
    %506 = vector.extract_strided_slice %401 {offsets = [17, 0], sizes = [1, 64], strides = [1, 1]} : vector<27x64xf32> to vector<1x64xf32>
    %507 = vector.shape_cast %506 : vector<1x64xf32> to vector<1x1x1x64xf32>
    %508 = vector.broadcast %507 : vector<1x1x1x64xf32> to vector<2x4x4x64xf32>
    %509 = arith.mulf %505, %508 : vector<2x4x4x64xf32>
    %510 = arith.addf %504, %509 : vector<2x4x4x64xf32>
    %511 = vector.extract_strided_slice %398 {offsets = [2, 0, 0, 0], sizes = [2, 4, 4, 64], strides = [1, 1, 1, 1]} : vector<4x6x6x64xf32> to vector<2x4x4x64xf32>
    %512 = vector.extract_strided_slice %401 {offsets = [18, 0], sizes = [1, 64], strides = [1, 1]} : vector<27x64xf32> to vector<1x64xf32>
    %513 = vector.shape_cast %512 : vector<1x64xf32> to vector<1x1x1x64xf32>
    %514 = vector.broadcast %513 : vector<1x1x1x64xf32> to vector<2x4x4x64xf32>
    %515 = arith.mulf %511, %514 : vector<2x4x4x64xf32>
    %516 = arith.addf %510, %515 : vector<2x4x4x64xf32>
    %517 = vector.extract_strided_slice %398 {offsets = [2, 0, 1, 0], sizes = [2, 4, 4, 64], strides = [1, 1, 1, 1]} : vector<4x6x6x64xf32> to vector<2x4x4x64xf32>
    %518 = vector.extract_strided_slice %401 {offsets = [19, 0], sizes = [1, 64], strides = [1, 1]} : vector<27x64xf32> to vector<1x64xf32>
    %519 = vector.shape_cast %518 : vector<1x64xf32> to vector<1x1x1x64xf32>
    %520 = vector.broadcast %519 : vector<1x1x1x64xf32> to vector<2x4x4x64xf32>
    %521 = arith.mulf %517, %520 : vector<2x4x4x64xf32>
    %522 = arith.addf %516, %521 : vector<2x4x4x64xf32>
    %523 = vector.extract_strided_slice %398 {offsets = [2, 0, 2, 0], sizes = [2, 4, 4, 64], strides = [1, 1, 1, 1]} : vector<4x6x6x64xf32> to vector<2x4x4x64xf32>
    %524 = vector.extract_strided_slice %401 {offsets = [20, 0], sizes = [1, 64], strides = [1, 1]} : vector<27x64xf32> to vector<1x64xf32>
    %525 = vector.shape_cast %524 : vector<1x64xf32> to vector<1x1x1x64xf32>
    %526 = vector.broadcast %525 : vector<1x1x1x64xf32> to vector<2x4x4x64xf32>
    %527 = arith.mulf %523, %526 : vector<2x4x4x64xf32>
    %528 = arith.addf %522, %527 : vector<2x4x4x64xf32>
    %529 = vector.extract_strided_slice %398 {offsets = [2, 1, 0, 0], sizes = [2, 4, 4, 64], strides = [1, 1, 1, 1]} : vector<4x6x6x64xf32> to vector<2x4x4x64xf32>
    %530 = vector.extract_strided_slice %401 {offsets = [21, 0], sizes = [1, 64], strides = [1, 1]} : vector<27x64xf32> to vector<1x64xf32>
    %531 = vector.shape_cast %530 : vector<1x64xf32> to vector<1x1x1x64xf32>
    %532 = vector.broadcast %531 : vector<1x1x1x64xf32> to vector<2x4x4x64xf32>
    %533 = arith.mulf %529, %532 : vector<2x4x4x64xf32>
    %534 = arith.addf %528, %533 : vector<2x4x4x64xf32>
    %535 = vector.extract_strided_slice %398 {offsets = [2, 1, 1, 0], sizes = [2, 4, 4, 64], strides = [1, 1, 1, 1]} : vector<4x6x6x64xf32> to vector<2x4x4x64xf32>
    %536 = vector.extract_strided_slice %401 {offsets = [22, 0], sizes = [1, 64], strides = [1, 1]} : vector<27x64xf32> to vector<1x64xf32>
    %537 = vector.shape_cast %536 : vector<1x64xf32> to vector<1x1x1x64xf32>
    %538 = vector.broadcast %537 : vector<1x1x1x64xf32> to vector<2x4x4x64xf32>
    %539 = arith.mulf %535, %538 : vector<2x4x4x64xf32>
    %540 = arith.addf %534, %539 : vector<2x4x4x64xf32>
    %541 = vector.extract_strided_slice %398 {offsets = [2, 1, 2, 0], sizes = [2, 4, 4, 64], strides = [1, 1, 1, 1]} : vector<4x6x6x64xf32> to vector<2x4x4x64xf32>
    %542 = vector.extract_strided_slice %401 {offsets = [23, 0], sizes = [1, 64], strides = [1, 1]} : vector<27x64xf32> to vector<1x64xf32>
    %543 = vector.shape_cast %542 : vector<1x64xf32> to vector<1x1x1x64xf32>
    %544 = vector.broadcast %543 : vector<1x1x1x64xf32> to vector<2x4x4x64xf32>
    %545 = arith.mulf %541, %544 : vector<2x4x4x64xf32>
    %546 = arith.addf %540, %545 : vector<2x4x4x64xf32>
    %547 = vector.extract_strided_slice %398 {offsets = [2, 2, 0, 0], sizes = [2, 4, 4, 64], strides = [1, 1, 1, 1]} : vector<4x6x6x64xf32> to vector<2x4x4x64xf32>
    %548 = vector.extract_strided_slice %401 {offsets = [24, 0], sizes = [1, 64], strides = [1, 1]} : vector<27x64xf32> to vector<1x64xf32>
    %549 = vector.shape_cast %548 : vector<1x64xf32> to vector<1x1x1x64xf32>
    %550 = vector.broadcast %549 : vector<1x1x1x64xf32> to vector<2x4x4x64xf32>
    %551 = arith.mulf %547, %550 : vector<2x4x4x64xf32>
    %552 = arith.addf %546, %551 : vector<2x4x4x64xf32>
    %553 = vector.extract_strided_slice %398 {offsets = [2, 2, 1, 0], sizes = [2, 4, 4, 64], strides = [1, 1, 1, 1]} : vector<4x6x6x64xf32> to vector<2x4x4x64xf32>
    %554 = vector.extract_strided_slice %401 {offsets = [25, 0], sizes = [1, 64], strides = [1, 1]} : vector<27x64xf32> to vector<1x64xf32>
    %555 = vector.shape_cast %554 : vector<1x64xf32> to vector<1x1x1x64xf32>
    %556 = vector.broadcast %555 : vector<1x1x1x64xf32> to vector<2x4x4x64xf32>
    %557 = arith.mulf %553, %556 : vector<2x4x4x64xf32>
    %558 = arith.addf %552, %557 : vector<2x4x4x64xf32>
    %559 = vector.extract_strided_slice %398 {offsets = [2, 2, 2, 0], sizes = [2, 4, 4, 64], strides = [1, 1, 1, 1]} : vector<4x6x6x64xf32> to vector<2x4x4x64xf32>
    %560 = vector.extract_strided_slice %401 {offsets = [26, 0], sizes = [1, 64], strides = [1, 1]} : vector<27x64xf32> to vector<1x64xf32>
    %561 = vector.shape_cast %560 : vector<1x64xf32> to vector<1x1x1x64xf32>
    %562 = vector.broadcast %561 : vector<1x1x1x64xf32> to vector<2x4x4x64xf32>
    %563 = arith.mulf %559, %562 : vector<2x4x4x64xf32>
    %564 = arith.addf %558, %563 : vector<2x4x4x64xf32>
    %565 = vector.extract_strided_slice %564 {offsets = [0, 0, 0, 0], sizes = [2, 1, 4, 64], strides = [1, 1, 1, 1]} : vector<2x4x4x64xf32> to vector<2x1x4x64xf32>
    %566 = vector.extract_strided_slice %564 {offsets = [0, 2, 0, 0], sizes = [2, 1, 4, 64], strides = [1, 1, 1, 1]} : vector<2x4x4x64xf32> to vector<2x1x4x64xf32>
    %567 = tpu.concatenate %565, %566 in 1 : vector<2x1x4x64xf32>, vector<2x1x4x64xf32> -> vector<2x2x4x64xf32>
    %568 = vector.extract_strided_slice %567 {offsets = [0, 0, 0, 0], sizes = [2, 2, 1, 64], strides = [1, 1, 1, 1]} : vector<2x2x4x64xf32> to vector<2x2x1x64xf32>
    %569 = vector.extract_strided_slice %567 {offsets = [0, 0, 2, 0], sizes = [2, 2, 1, 64], strides = [1, 1, 1, 1]} : vector<2x2x4x64xf32> to vector<2x2x1x64xf32>
    %570 = tpu.concatenate %568, %569 in 2 : vector<2x2x1x64xf32>, vector<2x2x1x64xf32> -> vector<2x2x2x64xf32>
    %571 = vector.shape_cast %570 : vector<2x2x2x64xf32> to vector<8x64xf32>
    %572 = tpu.concatenate %394, %571 in 0 : vector<1x64xf32>, vector<8x64xf32> -> vector<9x64xf32>
    %cst_74 = arith.constant dense<0.000000e+00> : vector<9x64xf32>
    %573 = tpu.matmul %572, %2, %cst_74 {dimension_numbers = #tpu.dot_dimension_numbers<[1], [0], [0], [1], [0, 0, 1, 1], [], []>} : vector<9x64xf32>, vector<64x64xf32>, vector<9x64xf32> -> vector<9x64xf32>
    %574 = arith.subf %572, %573 : vector<9x64xf32>
    %575 = arith.mulf %574, %574 : vector<9x64xf32>
    %cst_75 = arith.constant dense<0.000000e+00> : vector<9x64xf32>
    %576 = tpu.matmul %575, %2, %cst_75 {dimension_numbers = #tpu.dot_dimension_numbers<[1], [0], [0], [1], [0, 0, 1, 1], [], []>} : vector<9x64xf32>, vector<64x64xf32>, vector<9x64xf32> -> vector<9x64xf32>
    %cst_76 = arith.constant 9.99999974E-6 : f32
    %577 = vector.broadcast %cst_76 : f32 to vector<9x64xf32>
    %578 = arith.addf %576, %577 : vector<9x64xf32>
    %579 = math.rsqrt %578 : vector<9x64xf32>
    %580 = arith.mulf %574, %579 : vector<9x64xf32>
    %c2_77 = arith.constant 2 : index
    %c0_78 = arith.constant 0 : index
    %581 = vector.load %arg4[%c2_77, %c0_78] : memref<3x64xf32, #tpu.memory_space<vmem>>, vector<1x64xf32>
    %c2_79 = arith.constant 2 : index
    %c0_80 = arith.constant 0 : index
    %582 = vector.load %arg5[%c2_79, %c0_80] : memref<3x64xf32, #tpu.memory_space<vmem>>, vector<1x64xf32>
    %583 = vector.broadcast %581 : vector<1x64xf32> to vector<9x64xf32>
    %584 = arith.mulf %580, %583 : vector<9x64xf32>
    %585 = vector.broadcast %582 : vector<1x64xf32> to vector<9x64xf32>
    %586 = arith.addf %584, %585 : vector<9x64xf32>
    %587 = vector.extract_strided_slice %194 {offsets = [0, 0], sizes = [33, 16], strides = [1, 1]} : vector<33x64xf32> to vector<33x16xf32>
    %588 = vector.extract_strided_slice %390 {offsets = [0, 0], sizes = [9, 16], strides = [1, 1]} : vector<9x64xf32> to vector<9x16xf32>
    %589 = vector.extract_strided_slice %586 {offsets = [0, 0], sizes = [9, 16], strides = [1, 1]} : vector<9x64xf32> to vector<9x16xf32>
    %cst_81 = arith.constant dense<0.000000e+00> : vector<33x9xf32>
    %590 = tpu.matmul %587, %588, %cst_81 {dimension_numbers = #tpu.dot_dimension_numbers<[1], [1], [0], [0], [0, 0, 1, 0], [], []>} : vector<33x16xf32>, vector<9x16xf32>, vector<33x9xf32> -> vector<33x9xf32>
    %cst_82 = arith.constant dense<0xFF800000> : vector<33xf32>
    %591 = vector.multi_reduction <maximumf>, %590, %cst_82 [1] : vector<33x9xf32> to vector<33xf32>
    %592 = vector.shape_cast %591 : vector<33xf32> to vector<33x1xf32>
    %593 = vector.broadcast %592 : vector<33x1xf32> to vector<33x9xf32>
    %594 = arith.subf %590, %593 : vector<33x9xf32>
    %595 = math.exp %594 : vector<33x9xf32>
    %cst_83 = arith.constant dense<0.000000e+00> : vector<33xf32>
    %596 = vector.multi_reduction <add>, %595, %cst_83 [1] : vector<33x9xf32> to vector<33xf32>
    %597 = vector.shape_cast %596 : vector<33xf32> to vector<33x1xf32>
    %598 = vector.broadcast %597 : vector<33x1xf32> to vector<33x9xf32>
    %599 = arith.divf %595, %598 : vector<33x9xf32>
    %cst_84 = arith.constant dense<0.000000e+00> : vector<33x16xf32>
    %600 = tpu.matmul %599, %589, %cst_84 {dimension_numbers = #tpu.dot_dimension_numbers<[1], [0], [0], [1], [0, 0, 1, 1], [], []>} : vector<33x9xf32>, vector<9x16xf32>, vector<33x16xf32> -> vector<33x16xf32>
    %601 = vector.extract_strided_slice %194 {offsets = [0, 16], sizes = [33, 16], strides = [1, 1]} : vector<33x64xf32> to vector<33x16xf32>
    %602 = vector.extract_strided_slice %390 {offsets = [0, 16], sizes = [9, 16], strides = [1, 1]} : vector<9x64xf32> to vector<9x16xf32>
    %603 = vector.extract_strided_slice %586 {offsets = [0, 16], sizes = [9, 16], strides = [1, 1]} : vector<9x64xf32> to vector<9x16xf32>
    %cst_85 = arith.constant dense<0.000000e+00> : vector<33x9xf32>
    %604 = tpu.matmul %601, %602, %cst_85 {dimension_numbers = #tpu.dot_dimension_numbers<[1], [1], [0], [0], [0, 0, 1, 0], [], []>} : vector<33x16xf32>, vector<9x16xf32>, vector<33x9xf32> -> vector<33x9xf32>
    %cst_86 = arith.constant dense<0xFF800000> : vector<33xf32>
    %605 = vector.multi_reduction <maximumf>, %604, %cst_86 [1] : vector<33x9xf32> to vector<33xf32>
    %606 = vector.shape_cast %605 : vector<33xf32> to vector<33x1xf32>
    %607 = vector.broadcast %606 : vector<33x1xf32> to vector<33x9xf32>
    %608 = arith.subf %604, %607 : vector<33x9xf32>
    %609 = math.exp %608 : vector<33x9xf32>
    %cst_87 = arith.constant dense<0.000000e+00> : vector<33xf32>
    %610 = vector.multi_reduction <add>, %609, %cst_87 [1] : vector<33x9xf32> to vector<33xf32>
    %611 = vector.shape_cast %610 : vector<33xf32> to vector<33x1xf32>
    %612 = vector.broadcast %611 : vector<33x1xf32> to vector<33x9xf32>
    %613 = arith.divf %609, %612 : vector<33x9xf32>
    %cst_88 = arith.constant dense<0.000000e+00> : vector<33x16xf32>
    %614 = tpu.matmul %613, %603, %cst_88 {dimension_numbers = #tpu.dot_dimension_numbers<[1], [0], [0], [1], [0, 0, 1, 1], [], []>} : vector<33x9xf32>, vector<9x16xf32>, vector<33x16xf32> -> vector<33x16xf32>
    %615 = vector.extract_strided_slice %194 {offsets = [0, 32], sizes = [33, 16], strides = [1, 1]} : vector<33x64xf32> to vector<33x16xf32>
    %616 = vector.extract_strided_slice %390 {offsets = [0, 32], sizes = [9, 16], strides = [1, 1]} : vector<9x64xf32> to vector<9x16xf32>
    %617 = vector.extract_strided_slice %586 {offsets = [0, 32], sizes = [9, 16], strides = [1, 1]} : vector<9x64xf32> to vector<9x16xf32>
    %cst_89 = arith.constant dense<0.000000e+00> : vector<33x9xf32>
    %618 = tpu.matmul %615, %616, %cst_89 {dimension_numbers = #tpu.dot_dimension_numbers<[1], [1], [0], [0], [0, 0, 1, 0], [], []>} : vector<33x16xf32>, vector<9x16xf32>, vector<33x9xf32> -> vector<33x9xf32>
    %cst_90 = arith.constant dense<0xFF800000> : vector<33xf32>
    %619 = vector.multi_reduction <maximumf>, %618, %cst_90 [1] : vector<33x9xf32> to vector<33xf32>
    %620 = vector.shape_cast %619 : vector<33xf32> to vector<33x1xf32>
    %621 = vector.broadcast %620 : vector<33x1xf32> to vector<33x9xf32>
    %622 = arith.subf %618, %621 : vector<33x9xf32>
    %623 = math.exp %622 : vector<33x9xf32>
    %cst_91 = arith.constant dense<0.000000e+00> : vector<33xf32>
    %624 = vector.multi_reduction <add>, %623, %cst_91 [1] : vector<33x9xf32> to vector<33xf32>
    %625 = vector.shape_cast %624 : vector<33xf32> to vector<33x1xf32>
    %626 = vector.broadcast %625 : vector<33x1xf32> to vector<33x9xf32>
    %627 = arith.divf %623, %626 : vector<33x9xf32>
    %cst_92 = arith.constant dense<0.000000e+00> : vector<33x16xf32>
    %628 = tpu.matmul %627, %617, %cst_92 {dimension_numbers = #tpu.dot_dimension_numbers<[1], [0], [0], [1], [0, 0, 1, 1], [], []>} : vector<33x9xf32>, vector<9x16xf32>, vector<33x16xf32> -> vector<33x16xf32>
    %629 = vector.extract_strided_slice %194 {offsets = [0, 48], sizes = [33, 16], strides = [1, 1]} : vector<33x64xf32> to vector<33x16xf32>
    %630 = vector.extract_strided_slice %390 {offsets = [0, 48], sizes = [9, 16], strides = [1, 1]} : vector<9x64xf32> to vector<9x16xf32>
    %631 = vector.extract_strided_slice %586 {offsets = [0, 48], sizes = [9, 16], strides = [1, 1]} : vector<9x64xf32> to vector<9x16xf32>
    %cst_93 = arith.constant dense<0.000000e+00> : vector<33x9xf32>
    %632 = tpu.matmul %629, %630, %cst_93 {dimension_numbers = #tpu.dot_dimension_numbers<[1], [1], [0], [0], [0, 0, 1, 0], [], []>} : vector<33x16xf32>, vector<9x16xf32>, vector<33x9xf32> -> vector<33x9xf32>
    %cst_94 = arith.constant dense<0xFF800000> : vector<33xf32>
    %633 = vector.multi_reduction <maximumf>, %632, %cst_94 [1] : vector<33x9xf32> to vector<33xf32>
    %634 = vector.shape_cast %633 : vector<33xf32> to vector<33x1xf32>
    %635 = vector.broadcast %634 : vector<33x1xf32> to vector<33x9xf32>
    %636 = arith.subf %632, %635 : vector<33x9xf32>
    %637 = math.exp %636 : vector<33x9xf32>
    %cst_95 = arith.constant dense<0.000000e+00> : vector<33xf32>
    %638 = vector.multi_reduction <add>, %637, %cst_95 [1] : vector<33x9xf32> to vector<33xf32>
    %639 = vector.shape_cast %638 : vector<33xf32> to vector<33x1xf32>
    %640 = vector.broadcast %639 : vector<33x1xf32> to vector<33x9xf32>
    %641 = arith.divf %637, %640 : vector<33x9xf32>
    %cst_96 = arith.constant dense<0.000000e+00> : vector<33x16xf32>
    %642 = tpu.matmul %641, %631, %cst_96 {dimension_numbers = #tpu.dot_dimension_numbers<[1], [0], [0], [1], [0, 0, 1, 1], [], []>} : vector<33x9xf32>, vector<9x16xf32>, vector<33x16xf32> -> vector<33x16xf32>
    %643 = tpu.concatenate %600, %614, %628, %642 in 1 : vector<33x16xf32>, vector<33x16xf32>, vector<33x16xf32>, vector<33x16xf32> -> vector<33x64xf32>
    %644 = arith.addf %643, %194 : vector<33x64xf32>
    %c0_97 = arith.constant 0 : index
    %c0_98 = arith.constant 0 : index
    %645 = vector.load %arg7[%c0_97, %c0_98] : memref<64x64xf32, #tpu.memory_space<vmem>>, vector<64x64xf32>
    %cst_99 = arith.constant dense<0.000000e+00> : vector<33x64xf32>
    %646 = tpu.matmul %644, %645, %cst_99 {dimension_numbers = #tpu.dot_dimension_numbers<[1], [0], [0], [1], [0, 0, 1, 1], [], []>} : vector<33x64xf32>, vector<64x64xf32>, vector<33x64xf32> -> vector<33x64xf32>
    %c0_100 = arith.constant 0 : index
    %c0_101 = arith.constant 0 : index
    %647 = vector.load %arg8[%c0_100, %c0_101] : memref<1x64xf32, #tpu.memory_space<vmem>>, vector<1x64xf32>
    %648 = vector.broadcast %647 : vector<1x64xf32> to vector<33x64xf32>
    %649 = arith.addf %646, %648 : vector<33x64xf32>
    %c0_102 = arith.constant 0 : index
    %c0_103 = arith.constant 0 : index
    %c0_104 = arith.constant 0 : index
    %650 = vector.load %arg9[%c0_102, %c0_103, %c0_104] : memref<1x33x64xf32, #tpu.memory_space<vmem>>, vector<1x33x64xf32>
    %651 = vector.shape_cast %650 : vector<1x33x64xf32> to vector<33x64xf32>
    %652 = vector.shape_cast %649 : vector<33x64xf32> to vector<1x33x64xf32>
    tpu.vector_store %arg9[%c0_102, %c0_103, %c0_104], %652 {strides = array<i32>} : memref<1x33x64xf32, #tpu.memory_space<vmem>>, vector<1x33x64xf32>,
    return
  }
  func.func @transform_0(%arg0: i32) -> (i32, i32, i32) {
    %c0_i32 = arith.constant 0 : i32
    %c0_i32_0 = arith.constant 0 : i32
    %c0_i32_1 = arith.constant 0 : i32
    return %arg0, %c0_i32, %c0_i32_0 : i32, i32, i32
  }
  func.func @transform_1(%arg0: i32) -> (i32, i32, i32) {
    %c0_i32 = arith.constant 0 : i32
    %c0_i32_0 = arith.constant 0 : i32
    %c0_i32_1 = arith.constant 0 : i32
    %c0_i32_2 = arith.constant 0 : i32
    return %c0_i32, %c0_i32_0, %c0_i32_1 : i32, i32, i32
  }
  func.func @transform_2(%arg0: i32) -> (i32, i32, i32, i32, i32) {
    %c0_i32 = arith.constant 0 : i32
    %c0_i32_0 = arith.constant 0 : i32
    %c0_i32_1 = arith.constant 0 : i32
    %c0_i32_2 = arith.constant 0 : i32
    %c0_i32_3 = arith.constant 0 : i32
    %c0_i32_4 = arith.constant 0 : i32
    return %c0_i32, %c0_i32_0, %c0_i32_1, %c0_i32_2, %c0_i32_3 : i32, i32, i32, i32, i32
  }
  func.func @transform_3(%arg0: i32) -> (i32, i32) {
    %c0_i32 = arith.constant 0 : i32
    %c0_i32_0 = arith.constant 0 : i32
    %c0_i32_1 = arith.constant 0 : i32
    return %c0_i32, %c0_i32_0 : i32, i32
  }
  func.func @transform_4(%arg0: i32) -> (i32, i32) {
    %c0_i32 = arith.constant 0 : i32
    %c0_i32_0 = arith.constant 0 : i32
    %c0_i32_1 = arith.constant 0 : i32
    return %c0_i32, %c0_i32_0 : i32, i32
  }
  func.func @transform_5(%arg0: i32) -> (i32, i32) {
    %c0_i32 = arith.constant 0 : i32
    %c0_i32_0 = arith.constant 0 : i32
    %c0_i32_1 = arith.constant 0 : i32
    return %c0_i32, %c0_i32_0 : i32, i32
  }
  func.func @transform_6(%arg0: i32) -> (i32, i32) {
    %c0_i32 = arith.constant 0 : i32
    %c0_i32_0 = arith.constant 0 : i32
    %c0_i32_1 = arith.constant 0 : i32
    return %c0_i32, %c0_i32_0 : i32, i32
  }
  func.func @transform_7(%arg0: i32) -> (i32, i32) {
    %c0_i32 = arith.constant 0 : i32
    %c0_i32_0 = arith.constant 0 : i32
    %c0_i32_1 = arith.constant 0 : i32
    return %c0_i32, %c0_i32_0 : i32, i32
  }
  func.func @transform_8(%arg0: i32) -> (i32, i32, i32) {
    %c0_i32 = arith.constant 0 : i32
    %c0_i32_0 = arith.constant 0 : i32
    %c0_i32_1 = arith.constant 0 : i32
    return %arg0, %c0_i32, %c0_i32_0 : i32, i32, i32
  }
}

</mosaic_0001>

<bundles_post_ra>
// kernel: tpu_custom_call.1
= control target key start
LH: loop header
LB: loop body
LE: loop exit
PB: predicated region body
PF: predicated region fallthrough
CT: control target
= control target key end

     0   :  { %13 = vsyncpa [#allocation4], 0  ;;  %s8941_s0 = inlined_call_operand.vmem [shape: f32[2,33,64], index: 0, kind: input, shape index: {}]   ;;  %s8942_s1 = inlined_call_operand.hbm [shape: f32[3,64,64], index: 1, kind: input, shape index: {}]   ;;  %s8943_s2 = inlined_call_operand.vmem [shape: f32[3,3,3,3,64], index: 2, kind: input, shape index: {}]   ;;  %s8944_s3 = inlined_call_operand.vmem [shape: f32[3,64], index: 3, kind: input, shape index: {}]   ;;  %s8945_s4 = inlined_call_operand.vmem [shape: f32[3,64], index: 4, kind: input, shape index: {}]   ;;  %s8946_s5 = inlined_call_operand.hbm [shape: f32[64,64], index: 5, kind: input, shape index: {}]   ;;  %s8947_s6 = inlined_call_operand.hbm [shape: f32[64,64], index: 6, kind: input, shape index: {}]   ;;  %s8948_s7 = inlined_call_operand.vmem [shape: f32[1,64], index: 7, kind: input, shape index: {}]   ;;  %s8949_s8 = inlined_call_operand.vmem [shape: f32[2,33,64], index: 8, kind: output, shape index: {}]  }
   0x1   :  { %14 = vsyncpa [#allocation6], 0  ;;  %s6383_s27 = smov 0  }
   0x2 LB: > { %s6389_s28 = sadd.s32 4294967295, %s6320_s27   ;;  %p5147_p0 = scmp.ge.s32.totalorder %s6320_s27, 1  ;;  %s6320_s27 = sphi %s6383_s27, %s20_s27  }
   0x3   : > { %p224_p1 = scmp.lt.s32.totalorder %s6320_s27, 3  ;;  %p8950_p2 = scmp.eq.s32.totalorder %s6389_s28, 0 }
   0x4   : > { %s6322_s30 = smov [#allocation5]   ;;  %s6323_s10 = smov [#allocation3]  }
   0x5   : > { %p6394_p3 = pnand %p5147_p0, %p224_p1  ;;  %s258_s9 = sshll.u32 %s6322_s30, 4  ;;  %s259_s9 = int_to_ptr.vmem [resolvable:$true] %s258_s9 }
   0x6   : > { %s236_s11 = sshll.u32 %s6323_s10, 4  ;;  %s6324_s13 = smov [#allocation7]   ;;  %s6406_s11 = int_to_ptr.vmem [resolvable:$true] %s236_s11 }
   0x7   : > { %s9079_s29 = scalar_select %p6394_p3, 1, 0 }
   0x8   : > { %p6049_p4 = pneg %p6394_p3  ;;  %s271_s14 = sshll.u32 %s6324_s13, 4  ;;  %s6408_s14 = int_to_ptr.vmem [resolvable:$true] %s271_s14 }
   0x9   : > { %s6222_s17 = scalar_lea.hbm %s8946_s5, 1024 }
   0xa   : > { %p6402_p5 = pnand %p8950_p2, %p6049_p4  ;;  %p6223_p6 = scmp.ne.s32.totalorder %s8946_s5, %s6222_s17 }
   0xb   : > { %p6229_p10 = scmp.lt.u32.totalorder %s6222_s17, %s8946_s5 }
   0xc   : > { %p6418_p7 = pneg %p6402_p5 }
   0xe   : > { %p6225_p8 = pnand %p6418_p7, %p6223_p6 }
  0x10   : > { %p6226_p9 = pneg %p6225_p8 }
  0x12   : > { %p6231_p11 = pnand %p6229_p10, %p6226_p9 }
  0x14   : > { %6234 = shalt.err (!%p6231_p11)
}
  0x15   : > { %s6235_s23 = scalar_lea.vmem %s259_s9, 1024  ;;  %p6243_p1 = scmp.lt.s32.totalorder %s259_s9, %s259_s9 }
  0x16   : > { %p6236_p12 = scmp.ne.s32.totalorder %s259_s9, %s6235_s23  ;;  %p6244_p4 = scmp.lt.s32.totalorder %s6235_s23, %s6235_s23 }
  0x18   : > { %p6238_p13 = pnand %p6236_p12, %p6418_p7  ;;  %p6245_p2 = por %p6244_p4, %p6243_p1 }
  0x1a   : > { %p6239_p0 = pneg %p6238_p13 }
  0x1c   : > { %p6246_p3 = pnand %p6245_p2, %p6239_p0 }
  0x1e   : > { %6249 = shalt.err (!%p6246_p3)
}
  0x1f   : > { %s6325_s24 = smov 128   ;;  %s6326_s25 = smov 8  }
  0x20   : > { %6055 = dma.hbm_to_vmem [thread:$0]  (!%p6402_p5), %s8946_s5, 1024, %s259_s9, [#allocation6], %s6325_s24, %s6325_s24, %s6326_s25  }
  0x21   : > { %s6250_s15 = scalar_lea.hbm %s8942_s1, 3072 }
  0x22   : > { %p6251_p2 = scmp.ne.s32.totalorder %s8942_s1, %s6250_s15  ;;  %p6257_p8 = scmp.lt.u32.totalorder %s6250_s15, %s8942_s1 }
  0x24   : > { %p6253_p3 = pnand %p6251_p2, %p6418_p7 }
  0x26   : > { %p6254_p6 = pneg %p6253_p3 }
  0x28   : > { %p6259_p9 = pnand %p6257_p8, %p6254_p6 }
  0x2a   : > { %6262 = shalt.err (!%p6259_p9)
}
  0x2b   : > { %s6263_s9 = scalar_lea.vmem %s6406_s11, 3072  ;;  %p6271_p13 = scmp.lt.s32.totalorder %s6406_s11, %s6406_s11 }
  0x2c   : > { %p6264_p10 = scmp.ne.s32.totalorder %s6406_s11, %s6263_s9  ;;  %p6272_p0 = scmp.lt.s32.totalorder %s6263_s9, %s6263_s9 }
  0x2e   : > { %p6266_p11 = pnand %p6264_p10, %p6418_p7  ;;  %p6273_p1 = por %p6272_p0, %p6271_p13 }
  0x30   : > { %p6267_p12 = pneg %p6266_p11 }
  0x32   : > { %p6274_p4 = pnand %p6273_p1, %p6267_p12 }
  0x34   : > { %6277 = shalt.err (!%p6274_p4)
}
  0x35   : > { %6052 = dma.hbm_to_vmem [thread:$0]  (!%p6402_p5), %s8942_s1, 3072, %s6406_s11, [#allocation4], %s6325_s24, %s6325_s24, %s6326_s25  }
  0x36   : > { %s6278_s30 = scalar_lea.hbm %s8947_s6, 1024 }
  0x37   : > { %p6279_p2 = scmp.ne.s32.totalorder %s8947_s6, %s6278_s30  ;;  %p6285_p8 = scmp.lt.u32.totalorder %s6278_s30, %s8947_s6 }
  0x39   : > { %p6281_p3 = pnand %p6279_p2, %p6418_p7 }
  0x3b   : > { %p6282_p6 = pneg %p6281_p3 }
  0x3d   : > { %p6287_p9 = pnand %p6285_p8, %p6282_p6 }
  0x3f   : > { %6290 = shalt.err (!%p6287_p9)
}
  0x40   : > { %s6291_s11 = scalar_lea.vmem %s6408_s14, 1024  ;;  %p6299_p13 = scmp.lt.s32.totalorder %s6408_s14, %s6408_s14 }
  0x41   : > { %p6292_p10 = scmp.ne.s32.totalorder %s6408_s14, %s6291_s11  ;;  %p6300_p0 = scmp.lt.s32.totalorder %s6291_s11, %s6291_s11 }
  0x43   : > { %p6294_p11 = pnand %p6292_p10, %p6418_p7  ;;  %p6301_p1 = por %p6300_p0, %p6299_p13 }
  0x45   : > { %p6295_p12 = pneg %p6294_p11 }
  0x47   : > { %p6302_p4 = pnand %p6301_p1, %p6295_p12 }
  0x49   : > { %6305 = shalt.err (!%p6302_p4)
}
  0x4a   : > { %6058 = dma.hbm_to_vmem [thread:$0]  (!%p6402_p5), %s8947_s6, 1024, %s6408_s14, [#allocation6], %s6325_s24, %s6325_s24, %s6326_s25  }
  0x4b   : > { %p9082_p2 = scmp.ne.s32.totalorder %s9079_s29, 0 }
  0x4d   : > { %298 = sbr.rel (%p9082_p2) target bundleno = 2523 (0x9db), region = 52 }
  0x54   : > { %p9083_p7 = scmp.eq.s32.totalorder %s6389_s28, 0 }
  0x56   : > { %6311 = dma.done.wait (%p9083_p7), [#allocation4], 3072   ;;  %p9084_p3 = pmov %p9083_p7 }
  0x58   : > { %6313 = vsyncadd (%p9084_p3), [#allocation4], 4294964224  ;;  %p9085_p6 = pmov %p9084_p3 }
  0x59   : > { %p9086_p8 = pmov %p9084_p3 }
  0x5a   : > { %6315 = dma.done.wait (%p9085_p6), [#allocation6], 2048  }
  0x5b   : > { %6317 = vsyncadd (%p9086_p8), [#allocation6], 4294965248  ;;  %v8952_v0 = vmov 0.0|0.0   ;;  %vm6328_vm0 = vmmov 0   ;;  %v8954_v1 = vmov 0.0   ;;  %vm363_vm1 = vcmask 521216  }
  0x5c   : > { %5866 = vmatprep.subr.bf16.mxu0 %v8952_v0  ;;  %5468 = vmatprep.mubr.msk.f32.mxu0 %vm6328_vm0, %v8954_v1  ;;  %371 = vst.msk [vmem:[#allocation2 + $0x38] sm:$0x3f] %vm363_vm1, %v8954_v1  ;;  %364 = vst.msk [vmem:[#allocation2] sm:$0x3f] %vm363_vm1, %v8954_v1  ;;  %v388_v2 = vld [vmem:[#allocation3] sm:$0xff]  ;;  %v389_v3 = vld [vmem:[#allocation3 + $0x8] sm:$0xff]  ;;  %v590_v31 = vlaneseq }
  0x5d   : > { %365 = vst.msk [vmem:[#allocation2 + $0x8] sm:$0x3f] %vm363_vm1, %v8954_v1  ;;  %366 = vst.msk [vmem:[#allocation2 + $0x10] sm:$0x3f] %vm363_vm1, %v8954_v1  ;;  %5878 = vmatprep.subr.bf16.mxu1 %v8952_v0  ;;  %5499 = vmatprep.mubr.msk.f32.mxu1 %vm6328_vm0, %v8954_v1  ;;  %v390_v4 = vld [vmem:[#allocation3 + $0x10] sm:$0xff]  ;;  %p340_p5 = scmp.lt.s32.totalorder %s6389_s28, 1  ;;  %v5867_v5 = vpack.c.bf16 %v389_v3, %v388_v2 }
  0x5e   : > { %367 = vst.msk [vmem:[#allocation2 + $0x18] sm:$0x3f] %vm363_vm1, %v8954_v1  ;;  %368 = vst.msk [vmem:[#allocation2 + $0x20] sm:$0x3f] %vm363_vm1, %v8954_v1  ;;  %v391_v6 = vld [vmem:[#allocation3 + $0x18] sm:$0xff]  ;;  %v392_v8 = vld [vmem:[#allocation3 + $0x20] sm:$0xff] }
  0x5f   : > { %369 = vst.msk [vmem:[#allocation2 + $0x28] sm:$0x3f] %vm363_vm1, %v8954_v1  ;;  %370 = vst.msk [vmem:[#allocation2 + $0x30] sm:$0x3f] %vm363_vm1, %v8954_v1  ;;  %5868 = vmatpush3.bf16.msra.mxu0 %v5867_v5  ;;  %v5870_v7 = vpack.c.bf16 %v391_v6, %v390_v4  ;;  %v393_v9 = vld [vmem:[#allocation3 + $0x28] sm:$0xff]  ;;  %s9334_s28 = smov (!%p340_p5, %s6389_s28), 1 }
  0x60   : > { %372 = vst.msk [vmem:[#allocation2 + $0x40] sm:$0x3f] %vm363_vm1, %v8954_v1  ;;  %373 = vst.msk [vmem:[#allocation2 + $0x48] sm:$0x3f] %vm363_vm1, %v8954_v1  ;;  %5869 = vmatprep.subr.bf16.mxu0 %v8952_v0  ;;  %v5873_v10 = vpack.c.bf16 %v393_v9, %v392_v8  ;;  %v394_v11 = vld [vmem:[#allocation3 + $0x30] sm:$0xff]  ;;  %v395_v12 = vld [vmem:[#allocation3 + $0x38] sm:$0xff] }
  0x61   : > { %374 = vst.msk [vmem:[#allocation2 + $0x50] sm:$0x3f] %vm363_vm1, %v8954_v1  ;;  %375 = vst.msk [vmem:[#allocation2 + $0x58] sm:$0x3f] %vm363_vm1, %v8954_v1  ;;  %s6036_s29 = smul.u32 40, %s9334_s28  ;;  %v5876_v13 = vpack.c.bf16 %v395_v12, %v394_v11  ;;  %vm396_vm2 = vcmask 523264  }
  0x62   : > { %376 = vst.msk [vmem:[#allocation2 + $0x60] sm:$0x3f] %vm363_vm1, %v8954_v1  ;;  %377 = vst.msk [vmem:[#allocation2 + $0x68] sm:$0x3f] %vm363_vm1, %v8954_v1  ;;  %v355_v19 = vld [vmem:[#allocation5] sm:$0xff]  ;;  %v356_v20 = vld [vmem:[#allocation5 + $0x8] sm:$0xff] }
  0x63   : > { %378 = vst.msk [vmem:[#allocation2 + $0x70] sm:$0x3f] %vm363_vm1, %v8954_v1  ;;  %379 = vst.msk [vmem:[#allocation2 + $0x78] sm:$0x3f] %vm363_vm1, %v8954_v1  ;;  %5871 = vmatpush3.bf16.msra.mxu0 %v5870_v7  ;;  %s6566_s20 = scalar_lea.vmem %s8941_s0, %s6036_s29  ;;  %v357_v21 = vld [vmem:[#allocation5 + $0x10] sm:$0xff]  ;;  %v6589_v22 = vpack.c.bf16 %v356_v20, %v355_v19  ;;  %v358_v23 = vld [vmem:[#allocation5 + $0x18] sm:$0xff]  ;;  %s349_s24 = scalar_lea.vmem %s8949_s8, %s6036_s29 }
  0x64   : > { %380 = vst.msk [vmem:[#allocation2 + $0x80] sm:$0x3f] %vm363_vm1, %v8954_v1  ;;  %381 = vst.msk [vmem:[#allocation2 + $0x88] sm:$0x3f] %vm363_vm1, %v8954_v1  ;;  %5872 = vmatprep.subr.bf16.mxu0 %v8952_v0  ;;  %v350_v14 = vld [vmem:[%s6566_s20] sm:$0xff]  ;;  %v351_v15 = vld [vmem:[%s6566_s20 + $0x8] sm:$0xff]  ;;  %v6592_v24 = vpack.c.bf16 %v358_v23, %v357_v21 }
  0x65   : > { %382 = vst.msk [vmem:[#allocation2 + $0x90] sm:$0x3f] %vm363_vm1, %v8954_v1  ;;  %383 = vst.msk [vmem:[#allocation2 + $0x98] sm:$0x3f] %vm363_vm1, %v8954_v1  ;;  %v352_v16 = vld [vmem:[%s6566_s20 + $0x10] sm:$0xff]  ;;  %v353_v17 = vld [vmem:[%s6566_s20 + $0x18] sm:$0xff]  ;;  %5880 = vmatpush3.bf16.msra.mxu1 %v6589_v22 }
  0x66   : > { %384 = vst.msk [vmem:[#allocation2 + $0xa0] sm:$0x3f] %vm363_vm1, %v8954_v1  ;;  %385 = vst.msk [vmem:[#allocation2 + $0xa8] sm:$0x3f] %vm363_vm1, %v8954_v1  ;;  %v354_v18 = vld [vmem:[%s6566_s20 + $0x20] sm:$0x1]  ;;  %5881 = vmatprep.subr.bf16.mxu1 %v8952_v0 }
  0x67   : > { %386 = vst.msk [vmem:[#allocation2 + $0xb0] sm:$0x3f] %vm363_vm1, %v8954_v1  ;;  %387 = vst.msk [vmem:[#allocation2 + $0xb8] sm:$0x3f] %vm363_vm1, %v8954_v1  ;;  %5874 = vmatpush3.bf16.msra.mxu0 %v5873_v10  ;;  %v359_v25 = vld [vmem:[#allocation5 + $0x20] sm:$0xff]  ;;  %v360_v26 = vld [vmem:[#allocation5 + $0x28] sm:$0xff] }
  0x68   : > { %5875 = vmatprep.subr.bf16.mxu0 %v8952_v0  ;;  %9087 = vst [vmem:[#allocation10_spill] sm:$0xff] %v6589_v22  ;;  %9088 = vst [vmem:[#allocation11_spill] sm:$0xff] %v6592_v24  ;;  %v6598_v27 = vpack.c.bf16 %v360_v26, %v359_v25  ;;  %v361_v28 = vld [vmem:[#allocation5 + $0x30] sm:$0xff]  ;;  %v362_v29 = vld [vmem:[#allocation5 + $0x38] sm:$0xff]  ;;  %v6613_v32 = vshrl.u32 %v590_v31, 7  ;;  %vm511_vm3 = vcmask 1042432  }
  0x69   : > { %5883 = vmatpush3.bf16.msra.mxu1 %v6592_v24  ;;  %v6604_v30 = vpack.c.bf16 %v362_v29, %v361_v28  ;;  %v581_v34 = vld [vmem:[%s8943_s2] sm:$0x7]  ;;  %v557_v38 = vld [vmem:[#allocation2] sm:$0x3f]  ;;  %v582_v45 = vld [vmem:[%s8943_s2 + $0x4] sm:$0x7] }
  0x6a   : > { %9089 = vst [vmem:[#allocation12_spill] sm:$0xff] %v6598_v27  ;;  %5884 = vmatprep.subr.bf16.mxu1 %v8952_v0  ;;  %9091 = vst [vmem:[#allocation14_spill] sm:$0xff] %v6613_v32  ;;  %v6616_v33 = vsub.s32 1, %v6613_v32  ;;  %v6622_v35 = vsub.s32 0, %v6613_v32  ;;  %v6628_v37 = vsub.s32 2, %v6613_v32  ;;  %vm512_vm4 = vcmask 1046532  }
  0x6b   : > { %5877 = vmatpush3.bf16.msra.mxu0 %v5876_v13  ;;  %9090 = vst [vmem:[#allocation13_spill] sm:$0xff] %v6604_v30  ;;  %v558_v46 = vld [vmem:[#allocation2 + $0x8] sm:$0x3f]  ;;  %v559_v59 = vld [vmem:[#allocation2 + $0x10] sm:$0x3f]  ;;  %vm548_vm5 = vcmask 519168   ;;  %vm6864_vm6 = vmor %vm511_vm3, %vm512_vm4 }
  0x6c   : > { %5890 = vmatprep.subr.bf16.mxu0 %v8952_v0  ;;  %9092 = vst [vmem:[#allocation15_spill] sm:$0xff] %v6616_v33  ;;  %9093 = vst [vmem:[#allocation16_spill] sm:$0xff] %v6622_v35  ;;  %v6625_v36 = vrot.slane %v581_v34, %v6616_v33  ;;  %v6631_v39 = vrot.slane %v581_v34, %v6622_v35  ;;  %v6635_v41 = vrot.slane %v581_v34, %v6628_v37  ;;  %v6656_v60 = vld [vmem:[#allocation2 + $0x18] sm:$0x3f]  ;;  %vm1574_vm7 = vcmask 1040384   ;;  %s6331_s19 = smov 112  }
  0x6d   : > { %5886 = vmatpush3.bf16.msra.mxu1 %v6598_v27  ;;  %9094 = vst [vmem:[#allocation17_spill] sm:$0xff] %v6628_v37  ;;  %v6643_v49 = vrot.slane %v582_v45, %v6622_v35  ;;  %v6646_v50 = vrot.slane %v582_v45, %v6616_v33  ;;  %v6652_v55 = vrot.slane %v582_v45, %v6628_v37  ;;  %v583_v2 = vld [vmem:[%s8943_s2 + $0x8] sm:$0x7]  ;;  %v561_v45 = vld [vmem:[#allocation2 + $0x20] sm:$0x3f]  ;;  %s6332_s9 = smov 96  }
  0x6e   : > { %5469 = vmatmul.mubr.msk.f32.vlgmr.msra.gmra.mrb[0].mxu0 %vm396_vm2, %v350_v14  ;;  %5887 = vmatprep.subr.bf16.mxu1 %v8952_v0  ;;  %v614_v40 = vmul.f32 %v6625_v36, %v557_v38  ;;  %v594_v42 = vmul.f32 %v6631_v39, %v557_v38  ;;  %v658_v44 = vmul.f32 %v6635_v41, %v557_v38  ;;  %s6333_s21 = smov 80   ;;  %vm3718_vm8 = vcmask 130048  }
  0x6f   : > { %5471 = vmatprep.mubr.msk.f32.mxu0 %vm6328_vm0, %v8954_v1  ;;  %5892 = vmatpush3.bf16.msra.mxu0 %v6589_v22  ;;  %v615_v51 = vmul.f32 %v6625_v36, %v558_v46  ;;  %v702_v53 = vmul.f32 %v6643_v49, %v558_v46  ;;  %v722_v54 = vmul.f32 %v6646_v50, %v558_v46  ;;  %vm8464_vm9 = vmpackc.low %vm3718_vm8, %vm3718_vm8  ;;  %vm3830_vm10 = vcmask 72704  }
  0x70   : > { %5893 = vmatprep.subr.bf16.mxu0 %v8952_v0  ;;  %v630_v43 = vrot.slane %v614_v40, 1  ;;  %v674_v48 = vrot.slane %v658_v44, 2  ;;  %9095 = vst [vmem:[#allocation18_spill] sm:$0xff] %v6652_v55  ;;  %v595_v56 = vmul.f32 %v6631_v39, %v558_v46  ;;  %v659_v58 = vmul.f32 %v6635_v41, %v558_v46 }
  0x71   : > { %5889 = vmatpush3.bf16.msra.mxu1 %v6604_v30  ;;  %v631_v57 = vrot.slane %v615_v51, 1  ;;  %v738_v62 = vrot.slane %v722_v54, 1  ;;  %v766_v63 = vmul.f32 %v6652_v55, %v558_v46  ;;  %v616_v5 = vmul.f32 %v6625_v36, %v559_v59  ;;  %v584_v46 = vld [vmem:[%s8943_s2 + $0xc] sm:$0x7] }
  0x72   : > { %5472 = vmatmul.mubr.msk.f32.gmra.mrb[2].mxu0 %vm396_vm2, %v351_v15  ;;  %5902 = vmatprep.subr.bf16.mxu1 %v8952_v0  ;;  %v646_v47 = vadd.f32 %v630_v43, %v594_v42  ;;  %v675_v4 = vrot.slane %v659_v58, 2  ;;  %v617_v6 = vmul.f32 %v6625_v36, %v6656_v60  ;;  %v6666_v9 = vrot.slane %v583_v2, %v6622_v35 }
  0x73   : > { %5474 = vmatprep.mubr.msk.f32.mxu0 %vm6328_vm0, %v8954_v1  ;;  %5895 = vmatpush3.bf16.msra.mxu0 %v6592_v24  ;;  %v647_v3 = vadd.f32 %v631_v57, %v595_v56  ;;  %v782_v8 = vrot.slane %v766_v63, 2  ;;  %v6669_v10 = vrot.slane %v583_v2, %v6616_v33  ;;  %v703_v12 = vmul.f32 %v6643_v49, %v559_v59  ;;  %v6701_v63 = vld [vmem:[#allocation2 + $0x30] sm:$0x3f] }
  0x74   : > { %5896 = vmatprep.subr.bf16.mxu0 %v8952_v0  ;;  %v690_v52 = vadd.f32 %v674_v48, %v646_v47  ;;  %9096 = vst [vmem:[#allocation19_spill] sm:$0xff] %v6666_v9  ;;  %v723_v13 = vmul.f32 %v6646_v50, %v559_v59  ;;  %v596_v14 = vmul.f32 %v6631_v39, %v559_v59  ;;  %v632_v15 = vrot.slane %v616_v5, 1 }
  0x75   : > { %9097 = vst [vmem:[#allocation20_spill] sm:$0xff] %v6669_v10  ;;  %v691_v11 = vadd.f32 %v675_v4, %v647_v3  ;;  %v661_v19 = vmul.f32 %v6635_v41, %v6656_v60  ;;  %v810_v21 = vmul.f32 %v6666_v9, %v559_v59  ;;  %v830_v23 = vmul.f32 %v6669_v10, %v559_v59 }
  0x76   : > { %5475 = vmatmul.mubr.msk.f32.gmra.mrb[4].mxu0 %vm396_vm2, %v352_v16  ;;  %v710_v61 = vadd.f32 %v702_v53, %v690_v52  ;;  %v660_v16 = vmul.f32 %v6635_v41, %v559_v59  ;;  %v6682_v25 = vrot.slane %v583_v2, %v6628_v37  ;;  %v739_v28 = vrot.slane %v723_v13, 1 }
  0x77   : > { %5477 = vmatprep.mubr.msk.f32.mxu0 %vm6328_vm0, %v8954_v1  ;;  %5898 = vmatpush3.bf16.msra.mxu0 %v6598_v27  ;;  %v711_v26 = vadd.f32 %v703_v12, %v691_v11  ;;  %v767_v29 = vmul.f32 %v6652_v55, %v559_v59  ;;  %v648_v31 = vadd.f32 %v632_v15, %v596_v14  ;;  %v677_v40 = vrot.slane %v661_v19, 2 }
  0x78   : > { %5899 = vmatprep.subr.bf16.mxu0 %v8952_v0  ;;  %v754_v7 = vadd.f32 %v738_v62, %v710_v61  ;;  %9098 = vst [vmem:[#allocation21_spill] sm:$0xff] %v6682_v25  ;;  %v676_v34 = vrot.slane %v660_v16, 2  ;;  %v846_v43 = vrot.slane %v830_v23, 1  ;;  %v874_v44 = vmul.f32 %v6682_v25, %v559_v59 }
  0x79   : > { %v755_v47 = vadd.f32 %v739_v28, %v711_v26  ;;  %v783_v48 = vrot.slane %v767_v29, 2  ;;  %v704_v52 = vmul.f32 %v6643_v49, %v6656_v60  ;;  %v724_v53 = vmul.f32 %v6646_v50, %v6656_v60 }
  0x7a   : > { %5478 = vmatmul.mubr.msk.f32.gmra.mrb[6].mxu0 %vm396_vm2, %v353_v17  ;;  %v597_v17 = vmul.f32 %v6631_v39, %v6656_v60  ;;  %v798_v20 = vadd.f32 %v782_v8, %v754_v7  ;;  %v692_v51 = vadd.f32 %v676_v34, %v648_v31  ;;  %v705_v56 = vmul.f32 %v6643_v49, %v561_v45 }
  0x7b   : > { %5480 = vmatprep.mubr.msk.f32.mxu0 %vm6328_vm0, %v8954_v1  ;;  %5901 = vmatpush3.bf16.msra.mxu0 %v6604_v30  ;;  %v725_v57 = vmul.f32 %v6646_v50, %v561_v45  ;;  %v890_v59 = vrot.slane %v874_v44, 2  ;;  %v6696_v61 = vrot.slane %v584_v46, %v6622_v35  ;;  %v6699_v62 = vrot.slane %v584_v46, %v6616_v33  ;;  %v576_v30 = vld [vmem:[#allocation2 + $0x98] sm:$0x3f] }
  0x7c   : > { %5915 = vmatprep.subr.bf16.mxu0 %v6589_v22  ;;  %v818_v42 = vadd.f32 %v810_v21, %v798_v20  ;;  %v799_v2 = vadd.f32 %v783_v48, %v755_v47  ;;  %v811_v3 = vmul.f32 %v6666_v9, %v6656_v60  ;;  %v831_v4 = vmul.f32 %v6669_v10, %v6656_v60 }
  0x7d   : > { %9099 = vst [vmem:[#allocation22_spill] sm:$0xff] %v6696_v61  ;;  %9100 = vst [vmem:[#allocation23_spill] sm:$0xff] %v6699_v62  ;;  %v712_v5 = vadd.f32 %v704_v52, %v692_v51  ;;  %v768_v7 = vmul.f32 %v6652_v55, %v6656_v60  ;;  %v741_v11 = vrot.slane %v725_v57, 1  ;;  %v769_v12 = vmul.f32 %v6652_v55, %v561_v45 }
  0x7e   : > { %5481 = vmatmul.mubr.msk.f32.gmra.mrb[8].mxu0 %vm396_vm2, %v354_v18  ;;  %v633_v18 = vrot.slane %v617_v6, 1  ;;  %v862_v58 = vadd.f32 %v846_v43, %v818_v42  ;;  %v740_v6 = vrot.slane %v724_v53, 1  ;;  %v918_v14 = vmul.f32 %v6696_v61, %v6701_v63  ;;  %v587_v53 = vld [vmem:[%s8943_s2 + $0x18] sm:$0x7] }
  0x7f   : > { %5530 = vmatprep.mubr.msk.f32.mxu0 %vm6328_vm0, %v8954_v1  ;;  %v938_v15 = vmul.f32 %v6699_v62, %v6701_v63  ;;  %v6715_v16 = vrot.slane %v584_v46, %v6628_v37  ;;  %v784_v20 = vrot.slane %v768_v7, 2  ;;  %v875_v21 = vmul.f32 %v6682_v25, %v6656_v60  ;;  %v6730_v46 = vld [vmem:[#allocation2 + $0x60] sm:$0x3f] }
  0x80   : > { %v649_v38 = vadd.f32 %v633_v18, %v597_v17  ;;  %v906_v13 = vadd.f32 %v890_v59, %v862_v58  ;;  %v819_v17 = vadd.f32 %v811_v3, %v799_v2  ;;  %v847_v18 = vrot.slane %v831_v4, 1  ;;  %v586_v59 = vld [vmem:[%s8943_s2 + $0x14] sm:$0x7] }
  0x81   : > { %9101 = vst [vmem:[#allocation24_spill] sm:$0xff] %v6715_v16  ;;  %v756_v19 = vadd.f32 %v740_v6, %v712_v5  ;;  %v785_v26 = vrot.slane %v769_v12, 2  ;;  %v6721_v28 = vmul.f32 %v6625_v36, %v6701_v63  ;;  %v954_v31 = vrot.slane %v938_v15, 1  ;;  %v588_v15 = vld [vmem:[%s8943_s2 + $0x1c] sm:$0x7] }
  0x82   : > { %v693_v54 = vadd.f32 %v677_v40, %v649_v38  ;;  %v926_v29 = vadd.f32 %v918_v14, %v906_v13  ;;  %v982_v34 = vmul.f32 %v6715_v16, %v6701_v63  ;;  %v562_v38 = vld [vmem:[#allocation2 + $0x28] sm:$0x3f]  ;;  %v585_v40 = vld [vmem:[%s8943_s2 + $0x10] sm:$0x7]  ;;  %v863_v42 = vadd.f32 %v847_v18, %v819_v17 }
  0x83   : > { %v800_v43 = vadd.f32 %v784_v20, %v756_v19  ;;  %v812_v60 = vmul.f32 %v6666_v9, %v561_v45  ;;  %v832_v44 = vmul.f32 %v6669_v10, %v561_v45  ;;  %v891_v47 = vrot.slane %v875_v21, 2  ;;  %v589_v21 = vld [vmem:[%s8943_s2 + $0x20] sm:$0x7] }
  0x84   : > { %v713_v8 = vadd.f32 %v705_v56, %v693_v54  ;;  %v813_v51 = vmul.f32 %v6666_v9, %v562_v38  ;;  %v833_v52 = vmul.f32 %v6669_v10, %v562_v38  ;;  %v598_v54 = vmul.f32 %v6631_v39, %v6701_v63 }
  0x85   : > { %v634_v56 = vrot.slane %v6721_v28, 1  ;;  %v970_v57 = vadd.f32 %v954_v31, %v926_v29  ;;  %v998_v58 = vrot.slane %v982_v34, 2  ;;  %v6744_v2 = vrot.slane %v585_v40, %v6622_v35 }
  0x86   : > { %v757_v23 = vadd.f32 %v741_v11, %v713_v8  ;;  %v6747_v3 = vrot.slane %v585_v40, %v6616_v33  ;;  %v876_v4 = vmul.f32 %v6682_v25, %v561_v45  ;;  %v877_v5 = vmul.f32 %v6682_v25, %v562_v38 }
  0x87   : > { %9102 = vst [vmem:[#allocation25_spill] sm:$0xff] %v6744_v2  ;;  %v6753_v6 = vmul.f32 %v6699_v62, %v6730_v46  ;;  %v6756_v7 = vrot.slane %v585_v40, %v6628_v37  ;;  %v820_v8 = vadd.f32 %v812_v60, %v800_v43  ;;  %v848_v11 = vrot.slane %v832_v44, 1 }
  0x88   : > { %v801_v48 = vadd.f32 %v785_v26, %v757_v23  ;;  %v6758_v12 = vadd.f32 %v891_v47, %v863_v42  ;;  %v6761_v13 = vrot.slane %v587_v53, %v6616_v33  ;;  %v849_v45 = vrot.slane %v833_v52, 1  ;;  %v6784_v26 = vld [vmem:[#allocation2 + $0x58] sm:$0x3f]  ;;  %v6815_v52 = vld [vmem:[#allocation2 + $0x88] sm:$0x3f] }
  0x89   : > { %9103 = vst [vmem:[#allocation26_spill] sm:$0xff] %v6753_v6  ;;  %9104 = vst [vmem:[#allocation27_spill] sm:$0xff] %v6756_v7  ;;  %v6766_v17 = vadd.f32 %v998_v58, %v970_v57  ;;  %v6769_v18 = vrot.slane %v586_v59, %v6622_v35  ;;  %v6772_v19 = vrot.slane %v586_v59, %v6616_v33  ;;  %v892_v28 = vrot.slane %v876_v4, 2 }
  0x8a   : > { %v821_v14 = vadd.f32 %v813_v51, %v801_v48  ;;  %v6775_v20 = vrot.slane %v586_v59, %v6628_v37  ;;  %v6782_v23 = vmul.f32 %v6696_v61, %v6730_v46  ;;  %v893_v29 = vrot.slane %v877_v5, 2  ;;  %9108 = vst [vmem:[#allocation31_spill] sm:$0xff] %v6815_v52 }
  0x8b   : > { %v662_v31 = vmul.f32 %v6635_v41, %v6701_v63  ;;  %v6790_v38 = vrot.slane %v587_v53, %v6622_v35  ;;  %v6793_v40 = vrot.slane %v587_v53, %v6628_v37  ;;  %v864_v42 = vadd.f32 %v848_v11, %v820_v8 }
  0x8c   : > { %9105 = vst [vmem:[#allocation28_spill] sm:$0xff] %v6782_v23  ;;  %v6797_v43 = vmul.f32 %v6761_v13, %v6730_v46  ;;  %v6800_v60 = vrot.slane %v588_v15, %v6622_v35  ;;  %v6803_v44 = vrot.slane %v588_v15, %v6616_v33  ;;  %v865_v63 = vadd.f32 %v849_v45, %v821_v14 }
  0x8d   : > { %v6807_v47 = vmul.f32 %v6793_v40, %v6730_v46  ;;  %v6810_v48 = vrot.slane %v589_v21, %v6616_v33  ;;  %v6813_v51 = vrot.slane %v589_v21, %v6628_v37  ;;  %v6819_v53 = vmul.f32 %v6669_v10, %v6784_v26  ;;  %v6883_v33 = vld [vmem:[#allocation3 + $0x48] sm:$0xff] }
  0x8e   : > { %9106 = vst [vmem:[#allocation29_spill] sm:$0xff] %v6800_v60  ;;  %v6823_v57 = vmul.f32 %v6772_v19, %v6784_v26  ;;  %v6827_v58 = vmul.f32 %v6775_v20, %v6784_v26  ;;  %v650_v59 = vadd.f32 %v634_v56, %v598_v54  ;;  %v678_v4 = vrot.slane %v662_v31, 2  ;;  %9119 = vst [vmem:[#allocation40_spill] sm:$0xff] %v6883_v33 }
  0x8f   : > { %9107 = vst [vmem:[#allocation30_spill] sm:$0xff] %v6810_v48  ;;  %9109 = vst [vmem:[#allocation32_spill] sm:$0xff] %v6819_v53  ;;  %v6831_v5 = vmul.f32 %v6790_v38, %v6730_v46  ;;  %v6834_v8 = vrot.slane %v588_v15, %v6628_v37  ;;  %v6837_v11 = vrot.slane %v589_v21, %v6622_v35  ;;  %v6881_v35 = vld [vmem:[#allocation3 + $0x40] sm:$0xff]  ;;  %vm3843_vm11 = vcmask 65536  }
  0x90   : > { %v6839_v14 = vadd.f32 %v892_v28, %v864_v42  ;;  %v6844_v0 = vadd.f32 %v893_v29, %v865_v63  ;;  %v6848_v54 = vmul.f32 %v6810_v48, %v6815_v52  ;;  %v6852_v56 = vmul.f32 %v6813_v51, %v6815_v52  ;;  %v575_v42 = vld [vmem:[#allocation2 + $0x90] sm:$0x3f]  ;;  %9118 = vst [vmem:[#allocation39_spill] sm:$0xff] %v6881_v35 }
  0x91   : > { %9110 = vst [vmem:[#allocation33_spill] sm:$0xff] %v6834_v8  ;;  %v6859_v31 = vmul.f32 %v6666_v9, %v6784_v26  ;;  %v9114_v63 = vmov 0  ;;  %v6870_v1 = vmul.f32 %v6769_v18, %v6784_v26  ;;  %v6874_v34 = vadd.f32 %v678_v4, %v650_v59 }
  0x92   : > { %9111 = vst [vmem:[#allocation34_spill] sm:$0xff] %v6848_v54  ;;  %9112 = vst [vmem:[#allocation35_spill] sm:$0xff] %v6852_v56  ;;  %v9115_v63 = vsel %vm6864_vm6, 4294967295, %v9114_v63  ;;  %v6879_v37 = vmul.f32 %v6772_v19, %v6815_v52  ;;  %v6887_v27 = vmul.f32 %v6715_v16, %v6730_v46  ;;  %v6891_v59 = vmul.f32 %v6837_v11, %v6815_v52 }
  0x93   : > { %9113 = vst [vmem:[#allocation36_spill] sm:$0xff] %v6859_v31  ;;  %9116 = vst [vmem:[#allocation37_spill] sm:$0xff] %v9115_v63  ;;  %v6896_v28 = vmul.f32 %v6761_v13, %v575_v42  ;;  %v6904_v31 = vmul.f32 %v6761_v13, %v576_v30  ;;  %v6910_v4 = vmul.f32 %v6793_v40, %v576_v30  ;;  %vm6334_vm12 = vmmov 1  }
  0x94   : > { %9117 = vst [vmem:[#allocation38_spill] sm:$0xff] %v6879_v37  ;;  %9120 = vst [vmem:[#allocation41_spill] sm:$0xff] %v6887_v27  ;;  %v6917_v52 = vmul.f32 %v6790_v38, %v575_v42  ;;  %v6920_v6 = vmul.f32 %v6790_v38, %v576_v30  ;;  %v6924_v56 = vmul.f32 %v6803_v44, %v576_v30  ;;  %vm4916_vm14 = vcmask 261120  }
  0x95   : > { %9121 = vst [vmem:[#allocation42_spill] sm:$0xff] %v6891_v59  ;;  %9122 = vst [vmem:[#allocation43_spill] sm:$0xff] %v6896_v28  ;;  %v6935_v28 = vmul.f32 %v6800_v60, %v576_v30  ;;  %vm4922_vm15 = vcmask 392192  }
  0x96   : > { %9123 = vst [vmem:[#allocation44_spill] sm:$0xff] %v6904_v31  ;;  %9125 = vst [vmem:[#allocation46_spill] sm:$0xff] %v6910_v4 }
  0x97   : > { %9126 = vst [vmem:[#allocation47_spill] sm:$0xff] %v6917_v52  ;;  %9127 = vst [vmem:[#allocation48_spill] sm:$0xff] %v6920_v6 }
  0x98   : > { %9128 = vst [vmem:[#allocation49_spill] sm:$0xff] %v6924_v56  ;;  %9130 = vst [vmem:[#allocation51_spill] sm:$0xff] %v6935_v28 }
  0x99   : > { %vm8604_vm13 = vmpackc.low %vm1574_vm7, %vm6334_vm12 }
 0x141   : > { %v6841_v45 = vpop.f32.mrb[0].mxu0 }
 0x142   : > { %v507_v15 = vcombine.high %v6841_v45, %v6841_v45  ;;  %v5470_v21 = vpop.f32.mrb[1].mxu0  ;;  %v5163_v32 = vrot.slane %v6841_v45, 9 }
 0x144   : > { %v516_v29 = vrot.slane %v507_v15, 5  ;;  %v6907_v15 = vmul.f32 %v6793_v40, %v575_v42  ;;  %v6950_v42 = vmul.f32 %v6834_v8, %v576_v30 }
 0x145   : > { %v483_v21 = vpop.f32.mrb[2].mxu0 }
 0x146   : > { %v517_v24 = vsel %vm6864_vm6, %v5163_v32, %v516_v29  ;;  %v518_v37 = vrot.slane %v516_v29, 4  ;;  %v508_v22 = vcombine.high %v483_v21, %v483_v21  ;;  %v519_v53 = vrot.slane %v483_v21, 5  ;;  %v5473_v46 = vpop.f32.mrb[3].mxu0  ;;  %9124 = vst [vmem:[#allocation45_spill] sm:$0xff] %v6907_v15  ;;  %9133 = vst [vmem:[#allocation54_spill] sm:$0xff] %v6950_v42 }
 0x147   : > { %549 = vst.msk [vmem:[#allocation2 + $0x39] sm:$0xf] %vm548_vm5, %v517_v24 }
 0x148   : > { %v520_v32 = vsel %vm6864_vm6, %v518_v37, %v519_v53  ;;  %v521_v29 = vrot.slane %v519_v53, 4  ;;  %v522_v21 = vrot.slane %v508_v22, 5 }
 0x149   : > { %550 = vst.msk [vmem:[#allocation2 + $0x41] sm:$0xf] %vm548_vm5, %v520_v32  ;;  %v488_v24 = vpop.f32.mrb[4].mxu0  ;;  %v6929_v32 = vld [vmem:[#allocation2 + $0xa0] sm:$0x3f] }
 0x14a   : > { %v523_v37 = vsel %vm6864_vm6, %v521_v29, %v522_v21  ;;  %v524_v22 = vrot.slane %v522_v21, 4  ;;  %v509_v53 = vcombine.high %v488_v24, %v488_v24  ;;  %v525_v46 = vrot.slane %v488_v24, 5  ;;  %v5476_v27 = vpop.f32.mrb[5].mxu0  ;;  %9129 = vst [vmem:[#allocation50_spill] sm:$0xff] %v6929_v32 }
 0x14b   : > { %551 = vst.msk [vmem:[#allocation2 + $0x49] sm:$0xf] %vm548_vm5, %v523_v37  ;;  %v6941_v27 = vmul.f32 %v6800_v60, %v6929_v32  ;;  %v6946_v37 = vmul.f32 %v6803_v44, %v6929_v32 }
 0x14c   : > { %v526_v29 = vsel %vm6864_vm6, %v524_v22, %v525_v46  ;;  %v527_v21 = vrot.slane %v525_v46, 4  ;;  %v528_v52 = vrot.slane %v509_v53, 5  ;;  %v6954_v46 = vmul.f32 %v6682_v25, %v6784_v26 }
 0x14d   : > { %9131 = vst [vmem:[#allocation52_spill] sm:$0xff] %v6941_v27  ;;  %552 = vst.msk [vmem:[#allocation2 + $0x51] sm:$0xf] %vm548_vm5, %v526_v29  ;;  %v493_v24 = vpop.f32.mrb[6].mxu0 }
 0x14e   : > { %9132 = vst [vmem:[#allocation53_spill] sm:$0xff] %v6946_v37  ;;  %9134 = vst [vmem:[#allocation55_spill] sm:$0xff] %v6954_v46  ;;  %v6956_v22 = vld [vmem:[#allocation2 + $0x38] sm:$0x3f]  ;;  %v529_v53 = vsel %vm6864_vm6, %v527_v21, %v528_v52  ;;  %v530_v29 = vrot.slane %v528_v52, 4  ;;  %v510_v6 = vcombine.high %v493_v24, %v493_v24  ;;  %v531_v27 = vrot.slane %v493_v24, 5 }
 0x14f   : > { %v5479_v4 = vpop.f32.mrb[7].mxu0  ;;  %553 = vst.msk [vmem:[#allocation2 + $0x69] sm:$0xf] %vm548_vm5, %v529_v53  ;;  %v919_v23 = vmul.f32 %v6696_v61, %v6956_v22  ;;  %v939_v30 = vmul.f32 %v6699_v62, %v6956_v22  ;;  %v983_v26 = vmul.f32 %v6715_v16, %v6956_v22  ;;  %v1026_v56 = vmul.f32 %v6744_v2, %v6956_v22 }
 0x150   : > { %v6969_v28 = vld [vmem:[#allocation2 + $0x40] sm:$0x3f]  ;;  %v532_v52 = vsel %vm6864_vm6, %v530_v29, %v531_v27  ;;  %v533_v4 = vrot.slane %v531_v27, 4  ;;  %v534_v21 = vrot.slane %v510_v6, 5  ;;  %v1046_v24 = vmul.f32 %v6747_v3, %v6956_v22 }
 0x151   : > { %9135 = vst [vmem:[#allocation56_spill] sm:$0xff] %v6969_v28  ;;  %554 = vst.msk [vmem:[#allocation2 + $0x71] sm:$0xf] %vm548_vm5, %v532_v52  ;;  %v498_v53 = vpop.f32.mrb[8].mxu0  ;;  %v927_v31 = vadd.f32 %v919_v23, %v6758_v12  ;;  %v955_v15 = vrot.slane %v939_v30, 1  ;;  %v999_v54 = vrot.slane %v983_v26, 2  ;;  %v1034_v6 = vadd.f32 %v1026_v56, %v6766_v17 }
 0x152   : > { %v535_v25 = vsel %vm6864_vm6, %v533_v4, %v534_v21  ;;  %v536_v10 = vrot.slane %v534_v21, 4  ;;  %v537_v9 = vrot.slane %v498_v53, 5  ;;  %v5482_v29 = vpop.f32.mrb[9].mxu0  ;;  %v1047_v52 = vmul.f32 %v6747_v3, %v6969_v28  ;;  %v6986_v23 = vld [vmem:[#allocation3 + $0x50] sm:$0xff]  ;;  %v6988_v30 = vld [vmem:[#allocation3 + $0x58] sm:$0xff] }
 0x153   : > { %555 = vst.msk [vmem:[#allocation2 + $0x79] sm:$0xf] %vm548_vm5, %v535_v25  ;;  %v971_v27 = vadd.f32 %v955_v15, %v927_v31  ;;  %v1062_v55 = vrot.slane %v1046_v24, 1  ;;  %v1090_v12 = vmul.f32 %v6756_v7, %v6956_v22  ;;  %9136 = vst [vmem:[#allocation57_spill] sm:$0xff] %v6986_v23  ;;  %v1091_v17 = vmul.f32 %v6756_v7, %v6969_v28  ;;  %v6999_v31 = vld [vmem:[#allocation2 + $0x48] sm:$0x3f] }
 0x154   : > { %9137 = vst [vmem:[#allocation58_spill] sm:$0xff] %v6988_v30  ;;  %v538_v26 = vsel %vm6864_vm6, %v536_v10, %v537_v9  ;;  %v6996_v25 = vmul.f32 %v6834_v8, %v6929_v32  ;;  %v1027_v4 = vmul.f32 %v6744_v2, %v6969_v28  ;;  %v7004_v9 = vld [vmem:[#allocation3 + $0x60] sm:$0xff]  ;;  %v7006_v10 = vld [vmem:[#allocation3 + $0x68] sm:$0xff]  ;;  %v1134_v29 = vmul.f32 %v6769_v18, %v6969_v28 }
 0x155   : > { %556 = vst.msk [vmem:[#allocation2 + $0x81] sm:$0xf] %vm548_vm5, %v538_v26  ;;  %v1015_v15 = vadd.f32 %v999_v54, %v971_v27  ;;  %v1078_v21 = vadd.f32 %v1062_v55, %v1034_v6  ;;  %v1106_v24 = vrot.slane %v1090_v12, 2  ;;  %9139 = vst [vmem:[#allocation60_spill] sm:$0xff] %v7004_v9  ;;  %v1154_v59 = vmul.f32 %v6772_v19, %v6969_v28 }
 0x156   : > { %9138 = vst [vmem:[#allocation59_spill] sm:$0xff] %v6996_v25  ;;  %9140 = vst [vmem:[#allocation61_spill] sm:$0xff] %v7006_v10  ;;  %v7008_v53 = vld [vmem:[#allocation2 + $0x68] sm:$0x3f]  ;;  %v1063_v55 = vrot.slane %v1047_v52, 1  ;;  %v1198_v12 = vmul.f32 %v6775_v20, %v6969_v28  ;;  %v1107_v63 = vrot.slane %v1091_v17, 2  ;;  %v1155_v37 = vmul.f32 %v6772_v19, %v6999_v31 }
 0x157   : > { %9141 = vst [vmem:[#allocation62_spill] sm:$0xff] %v7008_v53  ;;  %v1035_v27 = vadd.f32 %v1027_v4, %v1015_v15  ;;  %v1122_v6 = vadd.f32 %v1106_v24, %v1078_v21  ;;  %v1199_v46 = vmul.f32 %v6775_v20, %v6999_v31  ;;  %v1170_v15 = vrot.slane %v1154_v59, 1 }
 0x158   : > { %v7019_v56 = vld [vmem:[#allocation2 + $0x70] sm:$0x3f]  ;;  %v1263_v52 = vmul.f32 %v6761_v13, %v7008_v53  ;;  %v1135_v4 = vmul.f32 %v6769_v18, %v6999_v31  ;;  %v1243_v17 = vmul.f32 %v6790_v38, %v7008_v53  ;;  %v1307_v21 = vmul.f32 %v6793_v40, %v7008_v53 }
 0x159   : > { %v1079_v42 = vadd.f32 %v1063_v55, %v1035_v27  ;;  %v1142_v54 = vadd.f32 %v1134_v29, %v1122_v6  ;;  %v1370_v24 = vmul.f32 %v6803_v44, %v7008_v53  ;;  %v1214_v27 = vrot.slane %v1198_v12, 2 }
 0x15a   : > { %v7039_v59 = vmul.f32 %v6803_v44, %v7019_v56  ;;  %v7041_v29 = vld [vmem:[#allocation2 + $0x78] sm:$0x3f]  ;;  %v1171_v55 = vrot.slane %v1155_v37, 1  ;;  %v1215_v6 = vrot.slane %v1199_v46, 2  ;;  %v1414_v25 = vmul.f32 %v6834_v8, %v7008_v53 }
 0x15b   : > { %v1123_v32 = vadd.f32 %v1107_v63, %v1079_v42  ;;  %v1186_v26 = vadd.f32 %v1170_v15, %v1142_v54  ;;  %v7047_v9 = vmul.f32 %v6834_v8, %v7019_v56  ;;  %v1279_v63 = vrot.slane %v1263_v52, 1 }
 0x15c   : > { %v1350_v42 = vmul.f32 %v6800_v60, %v7008_v53  ;;  %v1323_v54 = vrot.slane %v1307_v21, 2  ;;  %v1351_v12 = vmul.f32 %v6800_v60, %v7019_v56  ;;  %v1386_v15 = vrot.slane %v1370_v24, 1 }
 0x15d   : > { %v1143_v10 = vadd.f32 %v1135_v4, %v1123_v32  ;;  %v1230_v23 = vadd.f32 %v1214_v27, %v1186_v26  ;;  %v1458_v37 = vmul.f32 %v6837_v11, %v7019_v56  ;;  %v1387_v35 = vrot.slane %v7039_v59, 1 }
 0x15e   : > { %v7059_v32 = vmul.f32 %v6837_v11, %v7041_v29  ;;  %v1430_v26 = vrot.slane %v1414_v25, 2  ;;  %v1431_v52 = vrot.slane %v7047_v9, 2  ;;  %v920_v4 = vmul.f32 %v6696_v61, %v6969_v28 }
 0x15f   : > { %v1187_v46 = vadd.f32 %v1171_v55, %v1143_v10  ;;  %v1250_v30 = vadd.f32 %v6831_v5, %v1230_v23  ;;  %v921_v21 = vmul.f32 %v6696_v61, %v6999_v31  ;;  %v9142_v10 = vrot.slane %v6797_v43, 1 }
 0x160   : > { %v1478_v5 = vmul.f32 %v6810_v48, %v7019_v56  ;;  %v7072_v23 = vmul.f32 %v6810_v48, %v7041_v29  ;;  %v928_v25 = vadd.f32 %v920_v4, %v6839_v14  ;;  %v940_v59 = vmul.f32 %v6699_v62, %v6969_v28 }
 0x161   : > { %v1231_v24 = vadd.f32 %v1215_v6, %v1187_v46  ;;  %v1294_v27 = vadd.f32 %v9142_v10, %v1250_v30  ;;  %v929_v9 = vadd.f32 %v921_v21, %v6844_v0  ;;  %v941_v55 = vmul.f32 %v6699_v62, %v6999_v31  ;;  %v7080_v6 = vld [vmem:[#allocation2 + $0x50] sm:$0x3f] }
 0x162   : > { %v9143_v30 = vrot.slane %v6807_v47, 2  ;;  %v984_v10 = vmul.f32 %v6715_v16, %v6969_v28  ;;  %v985_v14 = vmul.f32 %v6715_v16, %v6999_v31  ;;  %v1522_v0 = vmul.f32 %v6813_v51, %v7019_v56 }
 0x163   : > { %v1251_v43 = vadd.f32 %v1243_v17, %v1231_v24  ;;  %v1523_v4 = vmul.f32 %v6813_v51, %v7041_v29  ;;  %v956_v21 = vrot.slane %v940_v59, 1  ;;  %v957_v61 = vrot.slane %v941_v55, 1 }
 0x164   : > { %v1338_v46 = vadd.f32 %v9143_v30, %v1294_v27  ;;  %v1000_v17 = vrot.slane %v984_v10, 2  ;;  %v1001_v24 = vrot.slane %v985_v14, 2  ;;  %v1048_v30 = vmul.f32 %v6747_v3, %v6999_v31 }
 0x165   : > { %v1295_v62 = vadd.f32 %v1279_v63, %v1251_v43  ;;  %v972_v47 = vadd.f32 %v956_v21, %v928_v25  ;;  %v973_v27 = vadd.f32 %v957_v61, %v929_v9  ;;  %v1049_v16 = vmul.f32 %v6747_v3, %v7080_v6 }
 0x166   : > { %v1358_v53 = vadd.f32 %v1350_v42, %v1338_v46  ;;  %v1028_v33 = vmul.f32 %v6744_v2, %v6999_v31  ;;  %v1092_v59 = vmul.f32 %v6756_v7, %v6999_v31  ;;  %v1029_v25 = vmul.f32 %v6744_v2, %v7080_v6 }
 0x167   : > { %v1339_v48 = vadd.f32 %v1323_v54, %v1295_v62  ;;  %v1016_v63 = vadd.f32 %v1000_v17, %v972_v47  ;;  %v1017_v42 = vadd.f32 %v1001_v24, %v973_v27  ;;  %v1093_v61 = vmul.f32 %v6756_v7, %v7080_v6 }
 0x168   : > { %v1402_v28 = vadd.f32 %v1386_v15, %v1358_v53  ;;  %v1494_v43 = vrot.slane %v1478_v5, 1  ;;  %v1495_v62 = vrot.slane %v7072_v23, 1  ;;  %v1064_v15 = vrot.slane %v1048_v30, 1 }
 0x169   : > { %v1359_v9 = vadd.f32 %v1351_v12, %v1339_v48  ;;  %v1036_v53 = vadd.f32 %v1028_v33, %v1016_v63  ;;  %v1037_v54 = vadd.f32 %v1029_v25, %v1017_v42  ;;  %v1065_v46 = vrot.slane %v1049_v16, 1 }
 0x16a   : > { %v1446_v55 = vadd.f32 %v1430_v26, %v1402_v28  ;;  %v1538_v21 = vrot.slane %v1522_v0, 2  ;;  %v1108_v17 = vrot.slane %v1092_v59, 2  ;;  %v1109_v27 = vrot.slane %v1093_v61, 2  ;;  %v7120_v0 = vld [vmem:[#allocation2 + $0x80] sm:$0x3f] }
 0x16b   : > { %v1403_v10 = vadd.f32 %v1387_v35, %v1359_v9  ;;  %v1080_v24 = vadd.f32 %v1064_v15, %v1036_v53  ;;  %v1081_v47 = vadd.f32 %v1065_v46, %v1037_v54  ;;  %v1156_v2 = vmul.f32 %v6772_v19, %v7080_v6 }
 0x16c   : > { %v1466_v14 = vadd.f32 %v1458_v37, %v1446_v55  ;;  %v1539_v28 = vrot.slane %v1523_v4, 2  ;;  %v1200_v12 = vmul.f32 %v6775_v20, %v7080_v6  ;;  %v1136_v35 = vmul.f32 %v6769_v18, %v7080_v6 }
 0x16d   : > { %v1447_v7 = vadd.f32 %v1431_v52, %v1403_v10  ;;  %v1124_v33 = vadd.f32 %v1108_v17, %v1080_v24  ;;  %v1125_v26 = vadd.f32 %v1109_v27, %v1081_v47  ;;  %v1264_v16 = vmul.f32 %v6761_v13, %v7019_v56 }
 0x16e   : > { %v1510_v48 = vadd.f32 %v1494_v43, %v1466_v14  ;;  %v1244_v5 = vmul.f32 %v6790_v38, %v7019_v56  ;;  %v1265_v52 = vmul.f32 %v6761_v13, %v7041_v29  ;;  %v1308_v23 = vmul.f32 %v6793_v40, %v7019_v56 }
 0x16f   : > { %v1467_v37 = vadd.f32 %v7059_v32, %v1447_v7  ;;  %v1144_v4 = vadd.f32 %v1136_v35, %v1124_v33  ;;  %v1145_v30 = vadd.f32 %v6870_v1, %v1125_v26  ;;  %v1172_v59 = vrot.slane %v1156_v2, 1 }
 0x170   : > { %v1309_v63 = vmul.f32 %v6793_v40, %v7041_v29  ;;  %v1554_v7 = vadd.f32 %v1538_v21, %v1510_v48  ;;  %v1216_v32 = vrot.slane %v1200_v12, 2  ;;  %v1245_v25 = vmul.f32 %v6790_v38, %v7041_v29 }
 0x171   : > { %v1511_v42 = vadd.f32 %v1495_v62, %v1467_v37  ;;  %v1188_v61 = vadd.f32 %v1172_v59, %v1144_v4  ;;  %v9144_v9 = vrot.slane %v6823_v57, 1  ;;  %v1280_v43 = vrot.slane %v1264_v16, 1 }
 0x172   : > { %v1372_v53 = vmul.f32 %v6803_v44, %v7041_v29  ;;  %v1281_v1 = vrot.slane %v1265_v52, 1  ;;  %v1324_v2 = vrot.slane %v1308_v23, 2  ;;  %v1373_v15 = vmul.f32 %v6803_v44, %v7120_v0 }
 0x173   : > { %v1189_v55 = vadd.f32 %v9144_v9, %v1145_v30  ;;  %v1555_v54 = vadd.f32 %v1539_v28, %v1511_v42  ;;  %v1232_v62 = vadd.f32 %v1216_v32, %v1188_v61  ;;  %v9145_v46 = vrot.slane %v6827_v58, 2  ;;  %v9149_v61 = vld [vmem:[#allocation39_spill] sm:$0xff] }
 0x174   : > { %v1325_v14 = vrot.slane %v1309_v63, 2  ;;  %v1416_v21 = vmul.f32 %v6834_v8, %v7041_v29  ;;  %v1352_v17 = vmul.f32 %v6800_v60, %v7041_v29  ;;  %v1353_v24 = vmul.f32 %v6800_v60, %v7120_v0 }
 0x175   : > { %v1233_v10 = vadd.f32 %v9145_v46, %v1189_v55  ;;  %v1570_v57 = vcombine.low %v1554_v7, %v1555_v54  ;;  %v1417_v47 = vmul.f32 %v6834_v8, %v7120_v0  ;;  %v1252_v27 = vadd.f32 %v1244_v5, %v1232_v62  ;;  %v9153_v62 = vld [vmem:[#allocation30_spill] sm:$0xff] }
 0x176   : > { %v1388_v28 = vrot.slane %v1372_v53, 1  ;;  %v1460_v58 = vmul.f32 %v6837_v11, %v7120_v0  ;;  %v1389_v33 = vrot.slane %v1373_v15, 1  ;;  %v619_v26 = vmul.f32 %v6625_v36, %v6956_v22  ;;  %v9151_v53 = vld [vmem:[#allocation56_spill] sm:$0xff] }
 0x177   : > { %v1253_v48 = vadd.f32 %v1245_v25, %v1233_v10  ;;  %v7145_v12 = vrot.slane %v1570_v57, 7  ;;  %v663_v35 = vmul.f32 %v6635_v41, %v6956_v22  ;;  %v1296_v16 = vadd.f32 %v1280_v43, %v1252_v27 }
 0x178   : > { %v1432_v52 = vrot.slane %v1416_v21, 2  ;;  %v706_v5 = vmul.f32 %v6643_v49, %v6956_v22  ;;  %v1433_v4 = vrot.slane %v1417_v47, 2  ;;  %v599_v30 = vmul.f32 %v6631_v39, %v6956_v22 }
 0x179   : > { %v1297_v37 = vadd.f32 %v1281_v1, %v1253_v48  ;;  %v7156_v23 = vsel %vm1574_vm7, %v6841_v45, %v7145_v12  ;;  %v635_v59 = vrot.slane %v619_v26, 1  ;;  %v1340_v63 = vadd.f32 %v1324_v2, %v1296_v16  ;;  %v9148_v45 = vld [vmem:[#allocation40_spill] sm:$0xff]  ;;  %v9152_v1 = vld [vmem:[#allocation18_spill] sm:$0xff]  ;;  %v9155_v16 = vld [vmem:[#allocation19_spill] sm:$0xff] }
 0x17a   : > { %9146 = vst [vmem:[#allocation63_spill] sm:$0xff] %v7156_v23  ;;  %5500 = vmatmul.mubr.msk.f32.vlgmr.msra.gmra.mrb[0].mxu1 %vm396_vm2, %v7156_v23  ;;  %v714_v7 = vadd.f32 %v706_v5, %v6874_v34  ;;  %v726_v32 = vmul.f32 %v6646_v50, %v6956_v22  ;;  %v9147_v25 = vmov 0.0   ;;  %v9150_v9 = vpack.c.bf16 %v9148_v45, %v9149_v61  ;;  %v9156_v5 = vld [vmem:[#allocation20_spill] sm:$0xff] }
 0x17b   : > { %v1341_v42 = vadd.f32 %v1325_v14, %v1297_v37  ;;  %5502 = vmatprep.mubr.msk.f32.mxu1 %vm6328_vm0, %v9147_v25  ;;  %v651_v55 = vadd.f32 %v635_v59, %v599_v30  ;;  %v679_v43 = vrot.slane %v663_v35, 2  ;;  %v727_v54 = vmul.f32 %v6646_v50, %v9151_v53  ;;  %v9157_v59 = vld [vmem:[#allocation58_spill] sm:$0xff] }
 0x17c   : > { %5904 = vmatpush3.bf16.msra.mxu1 %v9150_v9  ;;  %v770_v2 = vmul.f32 %v9152_v1, %v6956_v22  ;;  %v1360_v15 = vadd.f32 %v1352_v17, %v1340_v63  ;;  %v1480_v46 = vmul.f32 %v9153_v62, %v7120_v0  ;;  %v742_v10 = vrot.slane %v726_v32, 1  ;;  %v9158_v63 = vld [vmem:[#allocation57_spill] sm:$0xff] }
 0x17d   : > { %v1361_v34 = vadd.f32 %v1353_v24, %v1341_v42  ;;  %v9154_v14 = vmov 0.0|0.0   ;;  %v1524_v21 = vmul.f32 %v6813_v51, %v7120_v0  ;;  %v695_v57 = vadd.f32 %v679_v43, %v651_v55 }
 0x17e   : > { %5905 = vmatprep.subr.bf16.mxu1 %v9154_v14  ;;  %v707_v47 = vmul.f32 %v6643_v49, %v9151_v53  ;;  %v771_v27 = vmul.f32 %v9152_v1, %v9151_v53  ;;  %v1404_v48 = vadd.f32 %v1388_v28, %v1360_v15  ;;  %v758_v17 = vadd.f32 %v742_v10, %v714_v7  ;;  %v9160_v28 = vld [vmem:[#allocation21_spill] sm:$0xff] }
 0x17f   : > { %v1405_v22 = vadd.f32 %v1389_v33, %v1361_v34  ;;  %v786_v24 = vrot.slane %v770_v2, 2  ;;  %v743_v35 = vrot.slane %v727_v54, 1  ;;  %v814_v37 = vmul.f32 %v9155_v16, %v9151_v53  ;;  %v9161_v2 = vld [vmem:[#allocation42_spill] sm:$0xff] }
 0x180   : > { %v715_v26 = vadd.f32 %v707_v47, %v695_v57  ;;  %v834_v30 = vmul.f32 %v9156_v5, %v9151_v53  ;;  %v9159_v42 = vpack.c.bf16 %v9157_v59, %v9158_v63  ;;  %v1448_v32 = vadd.f32 %v1432_v52, %v1404_v48  ;;  %v9162_v48 = vld [vmem:[#allocation61_spill] sm:$0xff]  ;;  %v9168_v59 = vld [vmem:[#allocation23_spill] sm:$0xff] }
 0x181   : > { %v1449_v45 = vadd.f32 %v1433_v4, %v1405_v22  ;;  %v802_v61 = vadd.f32 %v786_v24, %v758_v17  ;;  %v878_v33 = vmul.f32 %v9160_v28, %v9151_v53  ;;  %v1496_v7 = vrot.slane %v1480_v46, 1  ;;  %v9163_v46 = vld [vmem:[#allocation60_spill] sm:$0xff]  ;;  %v9165_v17 = vld [vmem:[#allocation34_spill] sm:$0xff] }
 0x182   : > { %5907 = vmatpush3.bf16.msra.mxu1 %v9159_v42  ;;  %v759_v9 = vadd.f32 %v743_v35, %v715_v26  ;;  %v787_v55 = vrot.slane %v771_v27, 2  ;;  %v835_v43 = vmul.f32 %v9156_v5, %v6999_v31  ;;  %v1468_v54 = vadd.f32 %v1460_v58, %v1448_v32  ;;  %v9169_v42 = vld [vmem:[#allocation59_spill] sm:$0xff] }
 0x183   : > { %5908 = vmatprep.subr.bf16.mxu1 %v9154_v14  ;;  %v1469_v15 = vadd.f32 %v9161_v2, %v1449_v45  ;;  %v822_v34 = vadd.f32 %v814_v37, %v802_v61  ;;  %v850_v10 = vrot.slane %v834_v30, 1  ;;  %v1540_v57 = vrot.slane %v1524_v21, 2  ;;  %v9167_v30 = vld [vmem:[#allocation62_spill] sm:$0xff]  ;;  %v9170_v61 = vld [vmem:[#allocation35_spill] sm:$0xff] }
 0x184   : > { %v803_v52 = vadd.f32 %v787_v55, %v759_v9  ;;  %v815_v4 = vmul.f32 %v9155_v16, %v6999_v31  ;;  %v879_v47 = vmul.f32 %v9160_v28, %v6999_v31  ;;  %v9164_v22 = vpack.c.bf16 %v9162_v48, %v9163_v46  ;;  %v9175_v46 = vld [vmem:[#allocation27_spill] sm:$0xff] }
 0x185   : > { %v1512_v27 = vadd.f32 %v1496_v7, %v1468_v54  ;;  %v9166_v24 = vrot.slane %v9165_v17, 1  ;;  %v866_v26 = vadd.f32 %v850_v10, %v822_v34  ;;  %v894_v35 = vrot.slane %v878_v33, 2  ;;  %v9172_v7 = vld [vmem:[#allocation50_spill] sm:$0xff]  ;;  %v9173_v34 = vld [vmem:[#allocation24_spill] sm:$0xff] }
 0x186   : > { %5910 = vmatpush3.bf16.msra.mxu1 %v9164_v22  ;;  %v823_v21 = vadd.f32 %v815_v4, %v803_v52  ;;  %v851_v37 = vrot.slane %v835_v43, 1  ;;  %v943_v63 = vmul.f32 %v9168_v59, %v9167_v30  ;;  %v9171_v9 = vrot.slane %v9170_v61, 2  ;;  %v9174_v4 = vld [vmem:[#allocation28_spill] sm:$0xff]  ;;  %v9176_v17 = vld [vmem:[#allocation22_spill] sm:$0xff] }
 0x187   : > { %v1513_v58 = vadd.f32 %v9166_v24, %v1469_v15  ;;  %5911 = vmatprep.subr.bf16.mxu1 %v9154_v14  ;;  %v1556_v45 = vadd.f32 %v1540_v57, %v1512_v27  ;;  %v910_v2 = vadd.f32 %v894_v35, %v866_v26  ;;  %v7213_v54 = vmul.f32 %v9153_v62, %v9172_v7  ;;  %v9177_v35 = vld [vmem:[#allocation26_spill] sm:$0xff] }
 0x188   : > { %v867_v15 = vadd.f32 %v851_v37, %v823_v21  ;;  %v895_v33 = vrot.slane %v879_v47, 2  ;;  %v987_v10 = vmul.f32 %v9173_v34, %v9167_v30  ;;  %v1050_v43 = vmul.f32 %v6747_v3, %v9167_v30 }
 0x189   : > { %v1557_v55 = vadd.f32 %v9171_v9, %v1513_v58  ;;  %v930_v48 = vadd.f32 %v9174_v4, %v910_v2  ;;  %v1051_v57 = vmul.f32 %v6747_v3, %v7019_v56  ;;  %v1094_v22 = vmul.f32 %v9175_v46, %v9167_v30 }
 0x18a   : > { %v911_v27 = vadd.f32 %v895_v33, %v867_v15  ;;  %v923_v24 = vmul.f32 %v9176_v17, %v9167_v30  ;;  %v959_v47 = vrot.slane %v943_v63, 1  ;;  %v1095_v58 = vmul.f32 %v9175_v46, %v7019_v56 }
 0x18b   : > { %v1571_v52 = vcombine.low %v1556_v45, %v1557_v55  ;;  %v9178_v21 = vrot.slane %v9177_v35, 1  ;;  %v9179_v45 = vld [vmem:[#allocation25_spill] sm:$0xff]  ;;  %v1003_v2 = vrot.slane %v987_v10, 2  ;;  %v1066_v15 = vrot.slane %v1050_v43, 1 }
 0x18c   : > { %v1030_v61 = vmul.f32 %v9179_v45, %v9167_v30  ;;  %v1031_v9 = vmul.f32 %v9179_v45, %v7019_v56  ;;  %v931_v55 = vadd.f32 %v923_v24, %v911_v27  ;;  %v1138_v63 = vmul.f32 %v6769_v18, %v7019_v56 }
 0x18d   : > { %v7228_v26 = vrot.slane %v1571_v52, 7  ;;  %v974_v37 = vadd.f32 %v9178_v21, %v930_v48  ;;  %v9181_v52 = vld [vmem:[#allocation41_spill] sm:$0xff]  ;;  %v1067_v35 = vrot.slane %v1051_v57, 1  ;;  %v1110_v21 = vrot.slane %v1094_v22, 2 }
 0x18e   : > { %v9182_v4 = vrot.slane %v9181_v52, 2  ;;  %v975_v30 = vadd.f32 %v959_v47, %v931_v55  ;;  %v1111_v27 = vrot.slane %v1095_v58, 2  ;;  %v1139_v10 = vmul.f32 %v6769_v18, %v7041_v29 }
 0x18f   : > { %v7241_v33 = vsel %vm1574_vm7, %v7145_v12, %v7228_v26  ;;  %v1158_v43 = vmul.f32 %v6772_v19, %v7019_v56  ;;  %v1159_v24 = vmul.f32 %v6772_v19, %v7041_v29  ;;  %v1202_v57 = vmul.f32 %v6775_v20, %v7019_v56 }
 0x190   : > { %9180 = vst [vmem:[#allocation40_spill] sm:$0xff] %v7241_v33  ;;  %v1018_v48 = vadd.f32 %v9182_v4, %v974_v37  ;;  %5503 = vmatmul.mubr.msk.f32.gmra.mrb[2].mxu1 %vm396_vm2, %v7241_v33  ;;  %v620_v22 = vmul.f32 %v6625_v36, %v9151_v53  ;;  %v1019_v47 = vadd.f32 %v1003_v2, %v975_v30 }
 0x191   : > { %5505 = vmatprep.mubr.msk.f32.mxu1 %vm6328_vm0, %v9147_v25  ;;  %v621_v58 = vmul.f32 %v6625_v36, %v6999_v31  ;;  %v664_v37 = vmul.f32 %v6635_v41, %v9151_v53  ;;  %v665_v55 = vmul.f32 %v6635_v41, %v6999_v31  ;;  %v1203_v52 = vmul.f32 %v6775_v20, %v7041_v29 }
 0x192   : > { %v1038_v12 = vadd.f32 %v1030_v61, %v1018_v48  ;;  %v600_v4 = vmul.f32 %v6631_v39, %v9151_v53  ;;  %v636_v48 = vrot.slane %v620_v22, 1  ;;  %v1039_v32 = vadd.f32 %v1031_v9, %v1019_v47 }
 0x193   : > { %v1174_v33 = vrot.slane %v1158_v43, 1  ;;  %v601_v2 = vmul.f32 %v6631_v39, %v6999_v31  ;;  %v637_v36 = vrot.slane %v621_v58, 1  ;;  %v680_v23 = vrot.slane %v664_v37, 2 }
 0x194   : > { %v1082_v61 = vadd.f32 %v1066_v15, %v1038_v12  ;;  %v652_v14 = vadd.f32 %v636_v48, %v600_v4  ;;  %v728_v41 = vmul.f32 %v6646_v50, %v6999_v31  ;;  %v1083_v15 = vadd.f32 %v1067_v35, %v1039_v32 }
 0x195   : > { %v653_v12 = vadd.f32 %v637_v36, %v601_v2  ;;  %v681_v8 = vrot.slane %v665_v55, 2  ;;  %v729_v60 = vmul.f32 %v6646_v50, %v7080_v6  ;;  %v708_v9 = vmul.f32 %v6643_v49, %v6999_v31  ;;  %v7285_v36 = vld [vmem:[#allocation2 + $0xa8] sm:$0x3f] }
 0x196   : > { %v1126_v30 = vadd.f32 %v1110_v21, %v1082_v61  ;;  %v696_v22 = vadd.f32 %v680_v23, %v652_v14  ;;  %v772_v39 = vmul.f32 %v9152_v1, %v6999_v31  ;;  %v1127_v21 = vadd.f32 %v1111_v27, %v1083_v15 }
 0x197   : > { %v697_v43 = vadd.f32 %v681_v8, %v653_v12  ;;  %v709_v47 = vmul.f32 %v6643_v49, %v7080_v6  ;;  %v773_v32 = vmul.f32 %v9152_v1, %v7080_v6  ;;  %v1218_v58 = vrot.slane %v1202_v57, 2  ;;  %v9183_v1 = vld [vmem:[#allocation47_spill] sm:$0xff] }
 0x198   : > { %v1146_v53 = vadd.f32 %v1138_v63, %v1126_v30  ;;  %v716_v37 = vadd.f32 %v708_v9, %v696_v22  ;;  %v744_v50 = vrot.slane %v728_v41, 1  ;;  %v1147_v63 = vadd.f32 %v1139_v10, %v1127_v21  ;;  %v9184_v41 = vld [vmem:[#allocation43_spill] sm:$0xff]  ;;  %v9186_v9 = vld [vmem:[#allocation48_spill] sm:$0xff] }
 0x199   : > { %v1175_v23 = vrot.slane %v1159_v24, 1  ;;  %v717_v14 = vadd.f32 %v709_v47, %v697_v43  ;;  %v745_v55 = vrot.slane %v729_v60, 1  ;;  %v788_v48 = vrot.slane %v772_v39, 2  ;;  %v9188_v47 = vld [vmem:[#allocation45_spill] sm:$0xff] }
 0x19a   : > { %v1190_v35 = vadd.f32 %v1174_v33, %v1146_v53  ;;  %v760_v4 = vadd.f32 %v744_v50, %v716_v37  ;;  %v836_v8 = vmul.f32 %v9156_v5, %v7080_v6  ;;  %v1219_v27 = vrot.slane %v1203_v52, 2 }
 0x19b   : > { %v1191_v31 = vadd.f32 %v1175_v23, %v1147_v63  ;;  %v761_v49 = vadd.f32 %v745_v55, %v717_v14  ;;  %v789_v2 = vrot.slane %v773_v32, 2  ;;  %v816_v10 = vmul.f32 %v9155_v16, %v7080_v6  ;;  %v9190_v63 = vld [vmem:[#allocation44_spill] sm:$0xff] }
 0x19c   : > { %v1234_v61 = vadd.f32 %v1218_v58, %v1190_v35  ;;  %v804_v57 = vadd.f32 %v788_v48, %v760_v4  ;;  %v880_v60 = vmul.f32 %v9160_v28, %v7080_v6  ;;  %v1462_v30 = vmul.f32 %v6837_v11, %v9172_v7  ;;  %v9187_v28 = vld [vmem:[#allocation36_spill] sm:$0xff] }
 0x19d   : > { %v1235_v24 = vadd.f32 %v1219_v27, %v1191_v31  ;;  %v1463_v5 = vmul.f32 %v6837_v11, %v7285_v36  ;;  %v805_v52 = vadd.f32 %v789_v2, %v761_v49  ;;  %v9185_v15 = vrot.slane %v9184_v41, 1  ;;  %v9192_v55 = vld [vmem:[#allocation32_spill] sm:$0xff]  ;;  %v9195_v2 = vld [vmem:[#allocation46_spill] sm:$0xff] }
 0x19e   : > { %v1254_v33 = vadd.f32 %v9183_v1, %v1234_v61  ;;  %v7300_v53 = vmul.f32 %v9153_v62, %v7285_v36  ;;  %v824_v22 = vadd.f32 %v816_v10, %v804_v57  ;;  %v852_v16 = vrot.slane %v836_v8, 1  ;;  %v9194_v8 = vld [vmem:[#allocation51_spill] sm:$0xff]  ;;  %v1841_v41 = vld [vmem:[#allocation3 + $0x70] sm:$0xff] }
 0x19f   : > { %v1255_v39 = vadd.f32 %v9186_v9, %v1235_v24  ;;  %v1498_v6 = vrot.slane %v7213_v54, 1  ;;  %v825_v21 = vadd.f32 %v9187_v28, %v805_v52  ;;  %v945_v43 = vmul.f32 %v9168_v59, %v7041_v29  ;;  %v9197_v57 = vld [vmem:[#allocation55_spill] sm:$0xff] }
 0x1a0   : > { %v1298_v12 = vadd.f32 %v9185_v15, %v1254_v33  ;;  %v9189_v32 = vrot.slane %v9188_v47, 2  ;;  %v868_v58 = vadd.f32 %v852_v16, %v824_v22  ;;  %v896_v37 = vrot.slane %v880_v60, 2  ;;  %v1842_v15 = vld [vmem:[#allocation3 + $0x78] sm:$0xff] }
 0x1a1   : > { %v944_v50 = vmul.f32 %v9168_v59, %v7019_v56  ;;  %v9191_v23 = vrot.slane %v9190_v63, 1  ;;  %v9193_v61 = vrot.slane %v9192_v55, 1  ;;  %v925_v54 = vmul.f32 %v9176_v17, %v7041_v29 }
 0x1a2   : > { %v1342_v35 = vadd.f32 %v9189_v32, %v1298_v12  ;;  %v988_v48 = vmul.f32 %v9173_v34, %v7019_v56  ;;  %v1526_v27 = vmul.f32 %v6813_v51, %v9172_v7  ;;  %v912_v49 = vadd.f32 %v896_v37, %v868_v58  ;;  %v9199_v12 = vld [vmem:[#allocation49_spill] sm:$0xff] }
 0x1a3   : > { %v1299_v14 = vadd.f32 %v9191_v23, %v1255_v39  ;;  %v869_v4 = vadd.f32 %v9193_v61, %v825_v21  ;;  %v924_v59 = vmul.f32 %v9176_v17, %v7019_v56  ;;  %v9196_v1 = vrot.slane %v9195_v2, 2  ;;  %v9201_v56 = vld [vmem:[#allocation52_spill] sm:$0xff]  ;;  %v9204_v23 = vld [vmem:[#allocation53_spill] sm:$0xff] }
 0x1a4   : > { %v1362_v31 = vadd.f32 %v9194_v8, %v1342_v35  ;;  %v9198_v10 = vrot.slane %v9197_v57, 2  ;;  %v961_v24 = vrot.slane %v945_v43, 1  ;;  %v989_v52 = vmul.f32 %v9173_v34, %v7041_v29  ;;  %v9202_v43 = vld [vmem:[#allocation54_spill] sm:$0xff] }
 0x1a5   : > { %v1343_v33 = vadd.f32 %v9196_v1, %v1299_v14  ;;  %v9200_v22 = vrot.slane %v9199_v12, 1  ;;  %v1499_v9 = vrot.slane %v7300_v53, 1  ;;  %v932_v39 = vadd.f32 %v924_v59, %v912_v49 }
 0x1a6   : > { %v913_v60 = vadd.f32 %v9198_v10, %v869_v4  ;;  %v960_v28 = vrot.slane %v944_v50, 1  ;;  %v1527_v21 = vmul.f32 %v6813_v51, %v7285_v36  ;;  %v1004_v32 = vrot.slane %v988_v48, 2 }
 0x1a7   : > { %v1406_v16 = vadd.f32 %v9200_v22, %v1362_v31  ;;  %v1363_v17 = vadd.f32 %v9201_v56, %v1343_v33  ;;  %v9203_v35 = vrot.slane %v9202_v43, 2  ;;  %v1052_v37 = vmul.f32 %v6747_v3, %v7041_v29 }
 0x1a8   : > { %v933_v47 = vadd.f32 %v925_v54, %v913_v60  ;;  %v976_v34 = vadd.f32 %v960_v28, %v932_v39  ;;  %v5912_v63 = vpack.c.bf16 %v1842_v15, %v1841_v41  ;;  %v9205_v14 = vrot.slane %v9204_v23, 1  ;;  %v9208_v41 = vld [vmem:[#allocation31_spill] sm:$0xff]  ;;  %v9209_v28 = vld [vmem:[#allocation38_spill] sm:$0xff] }
 0x1a9   : > { %v1450_v58 = vadd.f32 %v9203_v35, %v1406_v16  ;;  %v1005_v50 = vrot.slane %v989_v52, 2  ;;  %v1053_v61 = vmul.f32 %v6747_v3, %v7120_v0  ;;  %v1032_v54 = vmul.f32 %v9179_v45, %v7041_v29  ;;  %v9207_v3 = vld [vmem:[#allocation10_spill] sm:$0xff] }
 0x1aa   : > { %v1407_v53 = vadd.f32 %v9205_v14, %v1363_v17  ;;  %v977_v55 = vadd.f32 %v961_v24, %v933_v47  ;;  %v1020_v8 = vadd.f32 %v1004_v32, %v976_v34  ;;  %v1096_v48 = vmul.f32 %v9175_v46, %v7041_v29  ;;  %5913 = vmatpush3.bf16.msra.mxu1 %v5912_v63 }
 0x1ab   : > { %v1470_v4 = vadd.f32 %v1462_v30, %v1450_v58  ;;  %v9206_v31 = vrot.slane %v9169_v42, 2  ;;  %v1033_v2 = vmul.f32 %v9179_v45, %v7120_v0  ;;  %v1097_v1 = vmul.f32 %v9175_v46, %v7120_v0  ;;  %5931 = vmatprep.subr.bf16.mxu1 %v9207_v3 }
 0x1ac   : > { %v1021_v59 = vadd.f32 %v1005_v50, %v977_v55  ;;  %v1542_v30 = vrot.slane %v1526_v27, 2  ;;  %v1543_v33 = vrot.slane %v1527_v21, 2  ;;  %v1040_v57 = vadd.f32 %v1032_v54, %v1020_v8  ;;  %v579_v55 = vld [vmem:[#allocation2 + $0xb0] sm:$0x3f] }
 0x1ad   : > { %v1451_v49 = vadd.f32 %v9206_v31, %v1407_v53  ;;  %v1068_v10 = vrot.slane %v1052_v37, 1  ;;  %v1514_v24 = vadd.f32 %v1498_v6, %v1470_v4  ;;  %v1069_v52 = vrot.slane %v1053_v61, 1 }
 0x1ae   : > { %v1041_v29 = vadd.f32 %v1033_v2, %v1021_v59  ;;  %v1141_v42 = vmul.f32 %v6769_v18, %v9208_v41  ;;  %v1112_v12 = vrot.slane %v1096_v48, 2  ;;  %v1160_v45 = vmul.f32 %v6772_v19, %v7120_v0  ;;  %v9211_v2 = vld [vmem:[#allocation33_spill] sm:$0xff] }
 0x1af   : > { %v1471_v60 = vadd.f32 %v1463_v5, %v1451_v49  ;;  %v1084_v15 = vadd.f32 %v1068_v10, %v1040_v57  ;;  %v1113_v16 = vrot.slane %v1097_v1, 2  ;;  %v1205_v27 = vmul.f32 %v6775_v20, %v9208_v41  ;;  %v580_v10 = vld [vmem:[#allocation2 + $0xb8] sm:$0x3f] }
 0x1b0   : > { %v1085_v46 = vadd.f32 %v1069_v52, %v1041_v29  ;;  %v1140_v5 = vmul.f32 %v6769_v18, %v7120_v0  ;;  %v1204_v6 = vmul.f32 %v6775_v20, %v7120_v0  ;;  %v1177_v56 = vrot.slane %v9209_v28, 1 }
 0x1b1   : > { %v1515_v22 = vadd.f32 %v1499_v9, %v1471_v60  ;;  %v1128_v39 = vadd.f32 %v1112_v12, %v1084_v15  ;;  %v1558_v17 = vadd.f32 %v1542_v30, %v1514_v24  ;;  %v1176_v19 = vrot.slane %v1160_v45, 1 }
 0x1b2   : > { %v1129_v47 = vadd.f32 %v1113_v16, %v1085_v46  ;;  %v1268_v9 = vmul.f32 %v6761_v13, %v9172_v7  ;;  %v1221_v58 = vrot.slane %v1205_v27, 2  ;;  %v1269_v34 = vmul.f32 %v6761_v13, %v7285_v36 }
 0x1b3   : > { %v1559_v21 = vadd.f32 %v1543_v33, %v1515_v22  ;;  %v1148_v32 = vadd.f32 %v1140_v5, %v1128_v39  ;;  %v1220_v37 = vrot.slane %v1204_v6, 2  ;;  %v1248_v20 = vmul.f32 %v6790_v38, %v9172_v7 }
 0x1b4   : > { %v1149_v35 = vadd.f32 %v1141_v42, %v1129_v47  ;;  %v1312_v0 = vmul.f32 %v6793_v40, %v9172_v7  ;;  %v1249_v14 = vmul.f32 %v6790_v38, %v7285_v36  ;;  %v1313_v53 = vmul.f32 %v6793_v40, %v7285_v36 }
 0x1b5   : > { %v1572_v43 = vcombine.low %v1558_v17, %v1559_v21  ;;  %v1192_v18 = vadd.f32 %v1176_v19, %v1148_v32  ;;  %v1284_v61 = vrot.slane %v1268_v9, 1  ;;  %v1285_v8 = vrot.slane %v1269_v34, 1  ;;  %v9213_v34 = vld [vmem:[#allocation11_spill] sm:$0xff] }
 0x1b6   : > { %v1193_v23 = vadd.f32 %v1177_v56, %v1149_v35  ;;  %v1328_v54 = vrot.slane %v1312_v0, 2  ;;  %v1376_v38 = vmul.f32 %v6803_v44, %v7285_v36  ;;  %v1329_v48 = vrot.slane %v1313_v53, 2  ;;  %v9217_v0 = vld [vmem:[#allocation13_spill] sm:$0xff]  ;;  %v9220_v53 = vld [vmem:[#allocation63_spill] sm:$0xff] }
 0x1b7   : > { %v1578_v63 = vrot.slane %v1572_v43, 7  ;;  %v1236_v50 = vadd.f32 %v1220_v37, %v1192_v18  ;;  %v1377_v31 = vmul.f32 %v6803_v44, %v579_v55  ;;  %v1420_v1 = vmul.f32 %v9211_v2, %v7285_v36  ;;  %v7425_v18 = vld [vmem:[%s6566_s20 + $0x8] sm:$0xff]  ;;  %v9215_v37 = vld [vmem:[#allocation12_spill] sm:$0xff] }
 0x1b8   : > { %v1237_v4 = vadd.f32 %v1221_v58, %v1193_v23  ;;  %v1421_v57 = vmul.f32 %v9211_v2, %v579_v55  ;;  %v1392_v24 = vrot.slane %v1376_v38, 1  ;;  %v1484_v44 = vmul.f32 %v9153_v62, %v579_v55  ;;  %v7416_v58 = vld [vmem:[%s6566_s20] sm:$0xff]  ;;  %9214 = vst [vmem:[#allocation56_spill] sm:$0xff] %v7425_v18 }
 0x1b9   : > { %v7380_v13 = vsel %vm1574_vm7, %v7228_v26, %v1578_v63  ;;  %v1256_v7 = vadd.f32 %v1248_v20, %v1236_v50  ;;  %v9210_v26 = vld [vmem:[#allocation29_spill] sm:$0xff]  ;;  %v1393_v52 = vrot.slane %v1377_v31, 1  ;;  %v1436_v42 = vrot.slane %v1420_v1, 2  ;;  %9212 = vst [vmem:[#allocation39_spill] sm:$0xff] %v7416_v58  ;;  %v7434_v20 = vld [vmem:[%s6566_s20 + $0x10] sm:$0xff]  ;;  %v9225_v31 = vld [vmem:[#allocation15_spill] sm:$0xff] }
 0x1ba   : > { %5506 = vmatmul.mubr.msk.f32.gmra.mrb[4].mxu1 %vm396_vm2, %v7380_v13  ;;  %v1257_v40 = vadd.f32 %v1249_v14, %v1237_v4  ;;  %v1356_v59 = vmul.f32 %v9210_v26, %v7285_v36  ;;  %v1357_v33 = vmul.f32 %v9210_v26, %v579_v55  ;;  %v1437_v12 = vrot.slane %v1421_v57, 2  ;;  %9216 = vst [vmem:[#allocation18_spill] sm:$0xff] %v7434_v20  ;;  %v7452_v23 = vld [vmem:[%s6566_s20 + $0x20] sm:$0x1]  ;;  %v1983_v26 = vld [vmem:[#allocation2] sm:$0x3f] }
 0x1bb   : > { %5508 = vmatprep.mubr.msk.f32.mxu1 %vm6328_vm0, %v9147_v25  ;;  %v1300_v49 = vadd.f32 %v1284_v61, %v1256_v7  ;;  %v1485_v45 = vmul.f32 %v9153_v62, %v580_v10  ;;  %v1464_v36 = vmul.f32 %v6837_v11, %v579_v55  ;;  %v1465_v16 = vmul.f32 %v6837_v11, %v580_v10  ;;  %v9223_v7 = vld [vmem:[#allocation40_spill] sm:$0xff]  ;;  %v9227_v1 = vld [vmem:[#allocation17_spill] sm:$0xff] }
 0x1bc   : > { %v1301_v30 = vadd.f32 %v1285_v8, %v1257_v40  ;;  %v1528_v27 = vmul.f32 %v6813_v51, %v579_v55  ;;  %v1529_v39 = vmul.f32 %v6813_v51, %v580_v10  ;;  %v1500_v6 = vrot.slane %v1484_v44, 1  ;;  %9219 = vst [vmem:[#allocation19_spill] sm:$0xff] %v7452_v23 }
 0x1bd   : > { %v1344_v60 = vadd.f32 %v1328_v54, %v1300_v49  ;;  %v1501_v56 = vrot.slane %v1485_v45, 1  ;;  %v9222_v8 = vmov 0.0|0.0  }
 0x1be   : > { %v1345_v29 = vadd.f32 %v1329_v48, %v1301_v30  ;;  %v1544_v47 = vrot.slane %v1528_v27, 2  ;;  %v1545_v32 = vrot.slane %v1529_v39, 2  ;;  %v5182_v48 = vld [vmem:[%s8943_s2 + $0x24] sm:$0x7] }
 0x1bf   : > { %v1364_v41 = vadd.f32 %v1356_v59, %v1344_v60  ;;  %v7484_v49 = vrot.slane %v5182_v48, %v9225_v31  ;;  %v9226_v59 = vld [vmem:[#allocation16_spill] sm:$0xff]  ;;  %v7490_v30 = vrot.slane %v5182_v48, %v9227_v1 }
 0x1c0   : > { %v1365_v15 = vadd.f32 %v1357_v33, %v1345_v29  ;;  %v7487_v2 = vrot.slane %v5182_v48, %v9226_v59 }
 0x1c1   : > { %v1408_v22 = vadd.f32 %v1392_v24, %v1364_v41  ;;  %v2029_v33 = vmul.f32 %v7484_v49, %v1983_v26  ;;  %v2053_v60 = vmul.f32 %v7490_v30, %v1983_v26  ;;  %v5183_v24 = vld [vmem:[%s8943_s2 + $0x28] sm:$0x7]  ;;  %v1985_v41 = vld [vmem:[#allocation2 + $0x10] sm:$0x3f] }
 0x1c2   : > { %v1409_v46 = vadd.f32 %v1393_v52, %v1365_v15  ;;  %v2017_v57 = vmul.f32 %v7487_v2, %v1983_v26  ;;  %v7499_v29 = vrot.slane %v5183_v24, %v9226_v59  ;;  %v7502_v52 = vrot.slane %v5183_v24, %v9225_v31  ;;  %v1984_v15 = vld [vmem:[#allocation2 + $0x8] sm:$0x3f] }
 0x1c3   : > { %v1452_v5 = vadd.f32 %v1436_v42, %v1408_v22  ;;  %v2037_v10 = vrot.slane %v2029_v33, 1  ;;  %v2061_v44 = vrot.slane %v2053_v60, 2  ;;  %v7506_v45 = vrot.slane %v5183_v24, %v9227_v1  ;;  %v5185_v24 = vld [vmem:[%s8943_s2 + $0x30] sm:$0x7] }
 0x1c4   : > { %v1453_v28 = vadd.f32 %v1437_v12, %v1409_v46  ;;  %v2030_v12 = vmul.f32 %v7484_v49, %v1985_v41  ;;  %v2089_v46 = vmul.f32 %v7502_v52, %v1984_v15  ;;  %v2054_v39 = vmul.f32 %v7490_v30, %v1985_v41 }
 0x1c5   : > { %v1472_v17 = vadd.f32 %v1464_v36, %v1452_v5  ;;  %v2045_v42 = vadd.f32 %v2037_v10, %v2017_v57  ;;  %v2077_v36 = vmul.f32 %v7499_v29, %v1984_v15 }
 0x1c6   : > { %v1473_v21 = vadd.f32 %v1465_v16, %v1453_v28  ;;  %v2018_v16 = vmul.f32 %v7487_v2, %v1985_v41  ;;  %v2038_v27 = vrot.slane %v2030_v12, 1  ;;  %v2097_v28 = vrot.slane %v2089_v46, 1  ;;  %v1987_v12 = vld [vmem:[#allocation2 + $0x20] sm:$0x3f] }
 0x1c7   : > { %v1516_v62 = vadd.f32 %v1500_v6, %v1472_v17  ;;  %v2069_v22 = vadd.f32 %v2061_v44, %v2045_v42  ;;  %v1988_v42 = vld [vmem:[#allocation2 + $0x30] sm:$0x3f]  ;;  %v7543_v46 = vrot.slane %v5185_v24, %v9226_v59 }
 0x1c8   : > { %v1517_v19 = vadd.f32 %v1501_v56, %v1473_v21  ;;  %v2113_v56 = vmul.f32 %v7506_v45, %v1984_v15 }
 0x1c9   : > { %v1560_v9 = vadd.f32 %v1544_v47, %v1516_v62  ;;  %v2081_v6 = vadd.f32 %v2077_v36, %v2069_v22  ;;  %v5184_v47 = vld [vmem:[%s8943_s2 + $0x2c] sm:$0x7]  ;;  %v2046_v62 = vadd.f32 %v2038_v27, %v2018_v16  ;;  %v7546_v16 = vrot.slane %v5185_v24, %v9225_v31 }
 0x1ca   : > { %v1561_v43 = vadd.f32 %v1545_v32, %v1517_v19  ;;  %v2062_v19 = vrot.slane %v2054_v39, 2  ;;  %v2031_v27 = vmul.f32 %v7484_v49, %v1988_v42 }
 0x1cc   : > { %v1573_v35 = vcombine.low %v1560_v9, %v1561_v43  ;;  %v7522_v9 = vrot.slane %v5184_v47, %v9226_v59  ;;  %v7525_v43 = vrot.slane %v5184_v47, %v9225_v31 }
 0x1ce   : > { %v7401_v11 = vrot.slane %v1573_v35, 7  ;;  %v1986_v35 = vld [vmem:[#allocation2 + $0x18] sm:$0x3f] }
 0x1cf   : > { %v2114_v33 = vmul.f32 %v7506_v45, %v1986_v35 }
 0x1d0   : > { %v7405_v51 = vsel %vm1574_vm7, %v1578_v63, %v7401_v11  ;;  %v7443_v63 = vld [vmem:[%s6566_s20 + $0x18] sm:$0xff] }
 0x1d1   : > { %5509 = vmatmul.mubr.msk.f32.gmra.mrb[6].mxu1 %vm396_vm2, %v7405_v51  ;;  %9218 = vst [vmem:[#allocation30_spill] sm:$0xff] %v7443_v63  ;;  %v2122_v15 = vrot.slane %v2114_v33, 2 }
 0x1d2   : > { %5511 = vmatprep.mubr.msk.f32.mxu1 %vm6328_vm0, %v9147_v25 }
 0x1d5   : > { %5512 = vmatmul.mubr.msk.f32.gmra.mrb[8].mxu1 %vm396_vm2, %v7401_v11 }
 0x1d6   : > { %5561 = vmatprep.mubr.msk.f32.mxu1 %vm6328_vm0, %v9147_v25 }
 0x1d9   : > { %5562 = vmatmul.mubr.msk.f32.vlgmr.msra.gmra.mrb[10].mxu1 %vm396_vm2, %v7416_v58 }
 0x1da   : > { %5564 = vmatprep.mubr.msk.f32.mxu1 %vm6328_vm0, %v9147_v25  ;;  %5933 = vmatpush3.bf16.msra.mxu1 %v9207_v3 }
 0x1db   : > { %5935 = vmatprep.subr.bf16.mxu1 %v9213_v34 }
 0x1dd   : > { %5565 = vmatmul.mubr.msk.f32.gmra.mrb[12].mxu1 %vm396_vm2, %v7425_v18 }
 0x1de   : > { %5567 = vmatprep.mubr.msk.f32.mxu1 %vm6328_vm0, %v9147_v25  ;;  %5937 = vmatpush3.bf16.msra.mxu1 %v9213_v34 }
 0x1df   : > { %5939 = vmatprep.subr.bf16.mxu1 %v9215_v37 }
 0x1e1   : > { %5568 = vmatmul.mubr.msk.f32.gmra.mrb[14].mxu1 %vm396_vm2, %v7434_v20 }
 0x1e2   : > { %5570 = vmatprep.mubr.msk.f32.mxu1 %vm6328_vm0, %v9147_v25  ;;  %5941 = vmatpush3.bf16.msra.mxu1 %v9215_v37 }
 0x1e3   : > { %5943 = vmatprep.subr.bf16.mxu1 %v9217_v0 }
 0x1e5   : > { %5571 = vmatmul.mubr.msk.f32.gmra.mrb[16].mxu1 %vm396_vm2, %v7443_v63 }
 0x1e6   : > { %5573 = vmatprep.mubr.msk.f32.mxu1 %vm6328_vm0, %v9147_v25  ;;  %5945 = vmatpush3.bf16.msra.mxu1 %v9217_v0 }
 0x1e7   : > { %5959 = vmatprep.subr.bf16.mxu1 %v9207_v3 }
 0x1e9   : > { %5574 = vmatmul.mubr.msk.f32.gmra.mrb[18].mxu1 %vm396_vm2, %v7452_v23 }
 0x24d   : > { %v1665_v14 = vpop.f32.mrb[0].mxu1 }
 0x24e   : > { %v7457_v55 = vsub.f32 %v9220_v53, %v1665_v14  ;;  %v5501_v50 = vpop.f32.mrb[1].mxu1  ;;  %v2105_v14 = vadd.f32 %v2097_v28, %v2081_v6  ;;  %v2070_v53 = vadd.f32 %v2062_v19, %v2046_v62  ;;  %v2197_v28 = vmul.f32 %v7543_v46, %v1988_v42 }
 0x24f   : > { %v2078_v50 = vmul.f32 %v7499_v29, %v1986_v35  ;;  %v2055_v62 = vmul.f32 %v7490_v30, %v1988_v42 }
 0x250   : > { %9221 = vst [vmem:[#allocation20_spill] sm:$0xff] %v7457_v55  ;;  %v1694_v61 = vmul.f32 %v7457_v55, %v7457_v55  ;;  %v1999_v55 = vld [vmem:[#allocation2 + $0x98] sm:$0x3f] }
 0x251   : > { %v2082_v48 = vadd.f32 %v2078_v50, %v2070_v53 }
 0x252   : > { %5531 = vmatmul.mubr.msk.f32.vlgmr.msra.gmra.mrb[10].mxu0 %vm396_vm2, %v1694_v61  ;;  %v2090_v61 = vmul.f32 %v7502_v52, %v1986_v35 }
 0x253   : > { %5533 = vmatprep.mubr.msk.f32.mxu0 %vm6328_vm0, %v9147_v25  ;;  %5917 = vmatpush3.bf16.msra.mxu0 %v9207_v3  ;;  %v5190_v3 = vld [vmem:[%s8943_s2 + $0x44] sm:$0x7] }
 0x254   : > { %5919 = vmatprep.subr.bf16.mxu0 %v9213_v34  ;;  %v2098_v26 = vrot.slane %v2090_v61, 1 }
 0x256   : > { %v2106_v44 = vadd.f32 %v2098_v26, %v2082_v48  ;;  %v2063_v26 = vrot.slane %v2055_v62, 2 }
 0x257   : > { %5921 = vmatpush3.bf16.msra.mxu0 %v9213_v34 }
 0x258   : > { %5923 = vmatprep.subr.bf16.mxu0 %v9215_v37  ;;  %v2130_v39 = vadd.f32 %v2122_v15, %v2106_v44 }
 0x25b   : > { %5925 = vmatpush3.bf16.msra.mxu0 %v9215_v37 }
 0x25c   : > { %5927 = vmatprep.subr.bf16.mxu0 %v9217_v0 }
 0x25f   : > { %5929 = vmatpush3.bf16.msra.mxu0 %v9217_v0 }
 0x260   : > { %5946 = vmatprep.subr.bf16.mxu0 %v9222_v8 }
 0x263   : > { %v1670_v4 = vpop.f32.mrb[2].mxu1 }
 0x264   : > { %v7473_v54 = vsub.f32 %v9223_v7, %v1670_v4  ;;  %v5504_v38 = vpop.f32.mrb[3].mxu1  ;;  %v2137_v7 = vmul.f32 %v7522_v9, %v1985_v41 }
 0x265   : > { %v2149_v38 = vmul.f32 %v7525_v43, %v1985_v41 }
 0x266   : > { %9224 = vst [vmem:[#allocation58_spill] sm:$0xff] %v7473_v54  ;;  %v1695_v40 = vmul.f32 %v7473_v54, %v7473_v54 }
 0x267   : > { %v2157_v10 = vrot.slane %v2149_v38, 1  ;;  %v5188_v38 = vld [vmem:[%s8943_s2 + $0x3c] sm:$0x7] }
 0x268   : > { %5534 = vmatmul.mubr.msk.f32.gmra.mrb[12].mxu0 %vm396_vm2, %v1695_v40  ;;  %v7535_v40 = vrot.slane %v5184_v47, %v9227_v1  ;;  %v2019_v47 = vmul.f32 %v7487_v2, %v1988_v42  ;;  %v7572_v15 = vrot.slane %v5188_v38, %v9225_v31 }
 0x269   : > { %5536 = vmatprep.mubr.msk.f32.mxu0 %vm6328_vm0, %v9147_v25 }
 0x26a   : > { %v2173_v60 = vmul.f32 %v7535_v40, %v1985_v41  ;;  %v2138_v41 = vmul.f32 %v7522_v9, %v1987_v12 }
 0x26c   : > { %v2181_v36 = vrot.slane %v2173_v60, 2  ;;  %v2142_v19 = vadd.f32 %v2138_v41, %v2130_v39 }
 0x28d   : > { %v1675_v5 = vpop.f32.mrb[4].mxu1 }
 0x28e   : > { %v7514_v17 = vsub.f32 %v7380_v13, %v1675_v5  ;;  %v5507_v21 = vpop.f32.mrb[5].mxu1  ;;  %v2121_v13 = vrot.slane %v2113_v56, 2  ;;  %v2150_v5 = vmul.f32 %v7525_v43, %v1987_v12  ;;  %v2209_v56 = vmul.f32 %v7546_v16, %v1988_v42 }
 0x28f   : > { %v7554_v21 = vrot.slane %v5185_v24, %v9227_v1 }
 0x290   : > { %9228 = vst [vmem:[#allocation57_spill] sm:$0xff] %v7514_v17  ;;  %v1696_v32 = vmul.f32 %v7514_v17, %v7514_v17  ;;  %v2129_v4 = vadd.f32 %v2121_v13, %v2105_v14  ;;  %v2158_v35 = vrot.slane %v2150_v5, 1  ;;  %v2174_v14 = vmul.f32 %v7535_v40, %v1987_v12  ;;  %v2001_v17 = vld [vmem:[#allocation2 + $0xa8] sm:$0x3f] }
 0x291   : > { %v2217_v50 = vrot.slane %v2209_v56, 1  ;;  %v2233_v61 = vmul.f32 %v7554_v21, %v1988_v42  ;;  %v5186_v42 = vld [vmem:[%s8943_s2 + $0x34] sm:$0x7]  ;;  %v7602_v56 = vrot.slane %v5188_v38, %v9226_v59 }
 0x292   : > { %5537 = vmatmul.mubr.msk.f32.gmra.mrb[14].mxu0 %vm396_vm2, %v1696_v32  ;;  %v2141_v57 = vadd.f32 %v2137_v7, %v2129_v4  ;;  %v2039_v32 = vrot.slane %v2031_v27, 1  ;;  %v2182_v60 = vrot.slane %v2174_v14, 2 }
 0x293   : > { %5539 = vmatprep.mubr.msk.f32.mxu0 %vm6328_vm0, %v9147_v25  ;;  %v2241_v44 = vrot.slane %v2233_v61, 2  ;;  %v5189_v61 = vld [vmem:[%s8943_s2 + $0x40] sm:$0x7] }
 0x294   : > { %v2165_v22 = vadd.f32 %v2157_v10, %v2141_v57  ;;  %v2047_v48 = vadd.f32 %v2039_v32, %v2019_v47  ;;  %v1993_v57 = vld [vmem:[#allocation2 + $0x60] sm:$0x3f]  ;;  %v2166_v10 = vadd.f32 %v2158_v35, %v2142_v19  ;;  %v1998_v32 = vld [vmem:[#allocation2 + $0x90] sm:$0x3f]  ;;  %v7609_v19 = vrot.slane %v5186_v42, %v9225_v31 }
 0x295   : > { %v7586_v39 = vmul.f32 %v7546_v16, %v1993_v57  ;;  %v7589_v41 = vmul.f32 %v7554_v21, %v1993_v57  ;;  %v7612_v35 = vrot.slane %v5186_v42, %v9227_v1  ;;  %v7615_v14 = vmul.f32 %v7572_v15, %v1993_v57 }
 0x296   : > { %v2189_v6 = vadd.f32 %v2181_v36, %v2165_v22  ;;  %v5187_v36 = vld [vmem:[%s8943_s2 + $0x38] sm:$0x7]  ;;  %v7583_v27 = vadd.f32 %v2063_v26, %v2047_v48 }
 0x297   : > { %v7632_v48 = vrot.slane %v5187_v36, %v9225_v31 }
 0x298   : > { %v2201_v53 = vadd.f32 %v2197_v28, %v2189_v6  ;;  %v7596_v6 = vadd.f32 %v2182_v60, %v2166_v10  ;;  %v7599_v28 = vrot.slane %v5186_v42, %v9226_v59  ;;  %v7637_v10 = vrot.slane %v5187_v36, %v9227_v1 }
 0x2a4   : > { %v1680_v13 = vpop.f32.mrb[6].mxu1 }
 0x2a5   : > { %v7561_v4 = vsub.f32 %v7405_v51, %v1680_v13  ;;  %v5510_v7 = vpop.f32.mrb[7].mxu1  ;;  %v2225_v51 = vadd.f32 %v2217_v50, %v2201_v53  ;;  %v7620_v50 = vld [vmem:[#allocation2 + $0xa0] sm:$0x3f] }
 0x2a6   : > { %v7626_v7 = vmul.f32 %v7543_v46, %v1993_v57 }
 0x2a7   : > { %9229 = vst [vmem:[#allocation21_spill] sm:$0xff] %v7561_v4  ;;  %v1697_v33 = vmul.f32 %v7561_v4, %v7561_v4  ;;  %v7606_v62 = vadd.f32 %v2241_v44, %v2225_v51  ;;  %v7644_v51 = vmul.f32 %v7602_v56, %v1993_v57  ;;  %v7647_v44 = vmul.f32 %v7602_v56, %v1998_v32 }
 0x2a8   : > { %v1685_v24 = vpop.f32.mrb[8].mxu1  ;;  %v7691_v4 = vrot.slane %v5190_v3, %v9225_v31 }
 0x2a9   : > { %v7575_v12 = vsub.f32 %v7401_v11, %v1685_v24  ;;  %v5513_v22 = vpop.f32.mrb[9].mxu1  ;;  %5540 = vmatmul.mubr.msk.f32.gmra.mrb[16].mxu0 %vm396_vm2, %v1697_v33  ;;  %v7592_v11 = vrot.slane %v5188_v38, %v9227_v1  ;;  %v7629_v38 = vrot.slane %v5187_v36, %v9226_v59  ;;  %v7658_v33 = vrot.slane %v5189_v61, %v9225_v31 }
 0x2aa   : > { %5542 = vmatprep.mubr.msk.f32.mxu0 %vm6328_vm0, %v9147_v25  ;;  %v7667_v36 = vmul.f32 %v7572_v15, %v1998_v32 }
 0x2ab   : > { %9230 = vst [vmem:[#allocation42_spill] sm:$0xff] %v7575_v12  ;;  %v1698_v5 = vmul.f32 %v7575_v12, %v7575_v12  ;;  %v7640_v60 = vmul.f32 %v7592_v11, %v1993_v57  ;;  %v7671_v12 = vmul.f32 %v7572_v15, %v7620_v50  ;;  %v7685_v23 = vmul.f32 %v7592_v11, %v7620_v50 }
 0x2ac   : > { %v7604_v47 = vpop.f32.mrb[10].mxu1  ;;  %v7702_v18 = vmul.f32 %v7658_v33, %v1999_v55  ;;  %v7705_v31 = vmul.f32 %v7658_v33, %v2001_v17 }
 0x2ad   : > { %9231 = vst [vmem:[#allocation61_spill] sm:$0xff] %v7604_v47  ;;  %v1938_v13 = vcombine.high %v7604_v47, %v7604_v47  ;;  %5543 = vmatmul.mubr.msk.f32.gmra.mrb[18].mxu0 %vm396_vm2, %v1698_v5  ;;  %v5563_v53 = vpop.f32.mrb[11].mxu1  ;;  %v5181_v24 = vrot.slane %v7604_v47, 9  ;;  %v7651_v5 = vmul.f32 %v7602_v56, %v7620_v50  ;;  %9233 = vst [vmem:[#allocation60_spill] sm:$0xff] %v7671_v12 }
 0x2ae   : > { %v7655_v53 = vrot.slane %v5189_v61, %v9226_v59  ;;  %9234 = vst [vmem:[#allocation34_spill] sm:$0xff] %v7685_v23  ;;  %9236 = vst [vmem:[#allocation23_spill] sm:$0xff] %v7702_v18 }
 0x2af   : > { %v1944_v42 = vrot.slane %v1938_v13, 5  ;;  %9237 = vst [vmem:[#allocation59_spill] sm:$0xff] %v7705_v31 }
 0x2b0   : > { %v1914_v22 = vpop.f32.mrb[12].mxu1  ;;  %v7716_v20 = vmul.f32 %v7655_v53, %v2001_v17 }
 0x2b1   : > { %v1945_v57 = vsel %vm6864_vm6, %v5181_v24, %v1944_v42  ;;  %v1946_v26 = vrot.slane %v1944_v42, 4  ;;  %v1939_v0 = vcombine.high %v1914_v22, %v1914_v22  ;;  %v1947_v37 = vrot.slane %v1914_v22, 5  ;;  %v5566_v34 = vpop.f32.mrb[13].mxu1 }
 0x2b2   : > { %1975 = vst.msk [vmem:[#allocation2 + $0x39] sm:$0xf] %vm548_vm5, %v1945_v57  ;;  %v7675_v24 = vrot.slane %v5189_v61, %v9227_v1  ;;  %v7680_v57 = vmul.f32 %v7592_v11, %v1998_v32  ;;  %v7688_v61 = vrot.slane %v5190_v3, %v9226_v59  ;;  %v7713_v59 = vmul.f32 %v7655_v53, %v1999_v55 }
 0x2b3   : > { %v1948_v34 = vsel %vm6864_vm6, %v1946_v26, %v1947_v37  ;;  %v1949_v42 = vrot.slane %v1947_v37, 4  ;;  %v1950_v22 = vrot.slane %v1939_v0, 5  ;;  %v7694_v37 = vrot.slane %v5190_v3, %v9227_v1  ;;  %9238 = vst [vmem:[#allocation35_spill] sm:$0xff] %v7716_v20 }
 0x2b4   : > { %1976 = vst.msk [vmem:[#allocation2 + $0x41] sm:$0xf] %vm548_vm5, %v1948_v34  ;;  %v1919_v54 = vpop.f32.mrb[14].mxu1  ;;  %v7719_v1 = vmul.f32 %v7675_v24, %v1999_v55  ;;  %v7731_v55 = vmul.f32 %v7675_v24, %v2001_v17 }
 0x2b5   : > { %9235 = vst [vmem:[#allocation62_spill] sm:$0xff] %v7694_v37  ;;  %v1951_v0 = vsel %vm6864_vm6, %v1949_v42, %v1950_v22  ;;  %v1952_v32 = vrot.slane %v1950_v22, 4  ;;  %v1940_v26 = vcombine.high %v1919_v54, %v1919_v54  ;;  %v1953_v34 = vrot.slane %v1919_v54, 5  ;;  %v5569_v63 = vpop.f32.mrb[15].mxu1 }
 0x2b6   : > { %1977 = vst.msk [vmem:[#allocation2 + $0x49] sm:$0xf] %vm548_vm5, %v1951_v0  ;;  %9239 = vst [vmem:[#allocation50_spill] sm:$0xff] %v7719_v1 }
 0x2b7   : > { %v1954_v3 = vsel %vm6864_vm6, %v1952_v32, %v1953_v34  ;;  %v1955_v42 = vrot.slane %v1953_v34, 4  ;;  %v1956_v22 = vrot.slane %v1940_v26, 5 }
 0x2b8   : > { %1978 = vst.msk [vmem:[#allocation2 + $0x51] sm:$0xf] %vm548_vm5, %v1954_v3  ;;  %v1924_v63 = vpop.f32.mrb[16].mxu1 }
 0x2b9   : > { %v7721_v58 = vld [vmem:[#allocation2 + $0x38] sm:$0x3f]  ;;  %v1957_v32 = vsel %vm6864_vm6, %v1955_v42, %v1956_v22  ;;  %v1958_v26 = vrot.slane %v1956_v22, 4  ;;  %v1941_v34 = vcombine.high %v1924_v63, %v1924_v63  ;;  %v1959_v3 = vrot.slane %v1924_v63, 5  ;;  %v5572_v54 = vpop.f32.mrb[17].mxu1 }
 0x2ba   : > { %v2091_v0 = vmul.f32 %v7502_v52, %v7721_v58  ;;  %1979 = vst.msk [vmem:[#allocation2 + $0x69] sm:$0xf] %vm548_vm5, %v1957_v32  ;;  %v2079_v47 = vmul.f32 %v7499_v29, %v7721_v58  ;;  %v2115_v32 = vmul.f32 %v7506_v45, %v7721_v58  ;;  %v2269_v8 = vmul.f32 %v7609_v19, %v7721_v58 }
 0x2bb   : > { %v7735_v42 = vld [vmem:[#allocation2 + $0x40] sm:$0x3f]  ;;  %v1960_v22 = vsel %vm6864_vm6, %v1958_v26, %v1959_v3  ;;  %v1961_v54 = vrot.slane %v1959_v3, 4  ;;  %v1962_v63 = vrot.slane %v1941_v34, 5 }
 0x2bc   : > { %v2099_v20 = vrot.slane %v2091_v0, 1  ;;  %v2032_v25 = vmul.f32 %v7484_v49, %v7735_v42  ;;  %1980 = vst.msk [vmem:[#allocation2 + $0x71] sm:$0xf] %vm548_vm5, %v1960_v22  ;;  %v1929_v17 = vpop.f32.mrb[18].mxu1  ;;  %v2056_v23 = vmul.f32 %v7490_v30, %v7735_v42  ;;  %v2020_v18 = vmul.f32 %v7487_v2, %v7735_v42 }
 0x2bd   : > { %v7745_v31 = vld [vmem:[#allocation2 + $0x48] sm:$0x3f]  ;;  %v1963_v26 = vsel %vm6864_vm6, %v1961_v54, %v1962_v63  ;;  %v1964_v0 = vrot.slane %v1962_v63, 4  ;;  %v1965_v34 = vrot.slane %v1929_v17, 5  ;;  %v5575_v3 = vpop.f32.mrb[19].mxu1  ;;  %v2257_v22 = vmul.f32 %v7599_v28, %v7721_v58 }
 0x2be   : > { %v2040_v49 = vrot.slane %v2032_v25, 1  ;;  %1981 = vst.msk [vmem:[#allocation2 + $0x79] sm:$0xf] %vm548_vm5, %v1963_v26  ;;  %v2092_v30 = vmul.f32 %v7502_v52, %v7745_v31  ;;  %v2116_v54 = vmul.f32 %v7506_v45, %v7745_v31  ;;  %v2083_v25 = vadd.f32 %v2079_v47, %v7583_v27 }
 0x2bf   : > { %v7762_v63 = vld [vmem:[#allocation2 + $0x50] sm:$0x3f]  ;;  %v1966_v2 = vsel %vm6864_vm6, %v1964_v0, %v1965_v34  ;;  %v2123_v17 = vrot.slane %v2115_v32, 2  ;;  %v2064_v3 = vrot.slane %v2056_v23, 2  ;;  %v2080_v1 = vmul.f32 %v7499_v29, %v7745_v31 }
 0x2c0   : > { %v2048_v26 = vadd.f32 %v2040_v49, %v2020_v18  ;;  %1982 = vst.msk [vmem:[#allocation2 + $0x81] sm:$0xf] %vm548_vm5, %v1966_v2  ;;  %v2152_v52 = vmul.f32 %v7525_v43, %v7762_v63  ;;  %v2107_v37 = vadd.f32 %v2099_v20, %v2083_v25  ;;  %v2151_v45 = vmul.f32 %v7525_v43, %v7735_v42 }
 0x2c1   : > { %v2175_v0 = vmul.f32 %v7535_v40, %v7735_v42  ;;  %v2176_v18 = vmul.f32 %v7535_v40, %v7762_v63  ;;  %v2198_v23 = vmul.f32 %v7543_v46, %v7735_v42  ;;  %v2210_v29 = vmul.f32 %v7546_v16, %v7735_v42  ;;  %v7791_v12 = vld [vmem:[#allocation2 + $0x68] sm:$0x3f] }
 0x2c2   : > { %v2072_v34 = vadd.f32 %v2064_v3, %v2048_v26  ;;  %v2100_v27 = vrot.slane %v2092_v30, 1  ;;  %v2124_v47 = vrot.slane %v2116_v54, 2  ;;  %v2131_v20 = vadd.f32 %v2123_v17, %v2107_v37 }
 0x2c3   : > { %v7782_v32 = vld [vmem:[#allocation2 + $0x70] sm:$0x3f]  ;;  %v2139_v43 = vmul.f32 %v7522_v9, %v7735_v42  ;;  %v2140_v2 = vmul.f32 %v7522_v9, %v7762_v63  ;;  %v2160_v25 = vrot.slane %v2152_v52, 1  ;;  %v2202_v40 = vadd.f32 %v2198_v23, %v7596_v6 }
 0x2c4   : > { %v2084_v49 = vadd.f32 %v2080_v1, %v2072_v34  ;;  %v2159_v3 = vrot.slane %v2151_v45, 1  ;;  %v2218_v13 = vrot.slane %v2210_v29, 1  ;;  %v2234_v30 = vmul.f32 %v7554_v21, %v7735_v42 }
 0x2c5   : > { %v2143_v26 = vadd.f32 %v2139_v43, %v2131_v20  ;;  %v2183_v37 = vrot.slane %v2175_v0, 2  ;;  %v2184_v17 = vrot.slane %v2176_v18, 2  ;;  %v2212_v1 = vmul.f32 %v7546_v16, %v7782_v32 }
 0x2c6   : > { %v2108_v54 = vadd.f32 %v2100_v27, %v2084_v49  ;;  %v2200_v9 = vmul.f32 %v7543_v46, %v7782_v32  ;;  %v2226_v52 = vadd.f32 %v2218_v13, %v2202_v40  ;;  %v2242_v6 = vrot.slane %v2234_v30, 2  ;;  %v7806_v46 = vld [vmem:[#allocation2 + $0x78] sm:$0x3f] }
 0x2c7   : > { %v2167_v34 = vadd.f32 %v2159_v3, %v2143_v26  ;;  %v2236_v45 = vmul.f32 %v7554_v21, %v7782_v32  ;;  %v2258_v29 = vmul.f32 %v7599_v28, %v7745_v31  ;;  %v2261_v27 = vadd.f32 %v2257_v22, %v7606_v62 }
 0x2c8   : > { %v2132_v23 = vadd.f32 %v2124_v47, %v2108_v54  ;;  %v2250_v18 = vadd.f32 %v2242_v6, %v2226_v52  ;;  %v2259_v16 = vmul.f32 %v7599_v28, %v7791_v12  ;;  %v2270_v20 = vmul.f32 %v7609_v19, %v7745_v31 }
 0x2c9   : > { %v2191_v0 = vadd.f32 %v2183_v37, %v2167_v34  ;;  %v2220_v47 = vrot.slane %v2212_v1, 1  ;;  %v2277_v43 = vrot.slane %v2269_v8, 1  ;;  %v2293_v21 = vmul.f32 %v7612_v35, %v7721_v58 }
 0x2ca   : > { %v2144_v13 = vadd.f32 %v2140_v2, %v2132_v23  ;;  %v2262_v40 = vadd.f32 %v2258_v29, %v2250_v18  ;;  %v2271_v62 = vmul.f32 %v7609_v19, %v7791_v12  ;;  %v2278_v22 = vrot.slane %v2270_v20, 1 }
 0x2cb   : > { %v2203_v49 = vadd.f32 %v7626_v7, %v2191_v0  ;;  %v2244_v3 = vrot.slane %v2236_v45, 2  ;;  %v2285_v30 = vadd.f32 %v2277_v43, %v2261_v27  ;;  %v2294_v54 = vmul.f32 %v7612_v35, %v7745_v31 }
 0x2cc   : > { %v2168_v26 = vadd.f32 %v2160_v25, %v2144_v13  ;;  %v9240_v2 = vrot.slane %v7586_v39, 1  ;;  %v2260_v8 = vmul.f32 %v7599_v28, %v7806_v46  ;;  %v2272_v58 = vmul.f32 %v7609_v19, %v7806_v46 }
 0x2cd   : > { %v2286_v7 = vadd.f32 %v2278_v22, %v2262_v40  ;;  %v2295_v34 = vmul.f32 %v7612_v35, %v7791_v12  ;;  %v2301_v25 = vrot.slane %v2293_v21, 2  ;;  %v2302_v52 = vrot.slane %v2294_v54, 2  ;;  %v7835_v21 = vld [vmem:[#allocation2 + $0x80] sm:$0x3f] }
 0x2ce   : > { %v2227_v37 = vadd.f32 %v9240_v2, %v2203_v49  ;;  %v2192_v1 = vadd.f32 %v2184_v17, %v2168_v26  ;;  %v9241_v6 = vrot.slane %v7589_v41, 2  ;;  %v2279_v31 = vrot.slane %v2271_v62, 1 }
 0x2cf   : > { %v2296_v39 = vmul.f32 %v7612_v35, %v7806_v46  ;;  %v2317_v28 = vmul.f32 %v7629_v38, %v7735_v42  ;;  %v2309_v29 = vadd.f32 %v2301_v25, %v2285_v30  ;;  %v2310_v19 = vadd.f32 %v2302_v52, %v2286_v7 }
 0x2d0   : > { %v2251_v23 = vadd.f32 %v9241_v6, %v2227_v37  ;;  %v2204_v45 = vadd.f32 %v2200_v9, %v2192_v1  ;;  %v2318_v17 = vmul.f32 %v7629_v38, %v7762_v63  ;;  %v2280_v0 = vrot.slane %v2272_v58, 1 }
 0x2d1   : > { %v2329_v18 = vmul.f32 %v7632_v48, %v7735_v42  ;;  %v2330_v41 = vmul.f32 %v7632_v48, %v7762_v63  ;;  %v2303_v13 = vrot.slane %v2295_v34, 2  ;;  %v2321_v35 = vadd.f32 %v2317_v28, %v2309_v29 }
 0x2d2   : > { %v2263_v27 = vadd.f32 %v2259_v16, %v2251_v23  ;;  %v2228_v20 = vadd.f32 %v2220_v47, %v2204_v45  ;;  %v2322_v43 = vadd.f32 %v2318_v17, %v2310_v19  ;;  %v2331_v49 = vmul.f32 %v7632_v48, %v7782_v32 }
 0x2d3   : > { %v2337_v40 = vrot.slane %v2329_v18, 1  ;;  %v2338_v62 = vrot.slane %v2330_v41, 1  ;;  %v2304_v22 = vrot.slane %v2296_v39, 2  ;;  %v2353_v26 = vmul.f32 %v7637_v10, %v7735_v42 }
 0x2d4   : > { %v2287_v9 = vadd.f32 %v2279_v31, %v2263_v27  ;;  %v2252_v16 = vadd.f32 %v2244_v3, %v2228_v20  ;;  %v2354_v30 = vmul.f32 %v7637_v10, %v7762_v63  ;;  %v2319_v54 = vmul.f32 %v7629_v38, %v7782_v32 }
 0x2d5   : > { %v2345_v2 = vadd.f32 %v2337_v40, %v2321_v35  ;;  %v2346_v37 = vadd.f32 %v2338_v62, %v2322_v43  ;;  %v2332_v7 = vmul.f32 %v7632_v48, %v7835_v21  ;;  %v2355_v3 = vmul.f32 %v7637_v10, %v7782_v32 }
 0x2d6   : > { %v2311_v47 = vadd.f32 %v2303_v13, %v2287_v9  ;;  %v2264_v58 = vadd.f32 %v2260_v8, %v2252_v16  ;;  %v2361_v1 = vrot.slane %v2353_v26, 2  ;;  %v2339_v25 = vrot.slane %v2331_v49, 1 }
 0x2d7   : > { %v2362_v42 = vrot.slane %v2354_v30, 2  ;;  %v2390_v63 = vmul.f32 %v7572_v15, %v7782_v32  ;;  %v2356_v6 = vmul.f32 %v7637_v10, %v7835_v21  ;;  %v2378_v8 = vmul.f32 %v7602_v56, %v7782_v32 }
 0x2d8   : > { %v2323_v34 = vadd.f32 %v2319_v54, %v2311_v47  ;;  %v2288_v52 = vadd.f32 %v2280_v0, %v2264_v58  ;;  %v2369_v23 = vadd.f32 %v2361_v1, %v2345_v2  ;;  %v2363_v48 = vrot.slane %v2355_v3, 2 }
 0x2d9   : > { %v2370_v39 = vadd.f32 %v2362_v42, %v2346_v37  ;;  %v2414_v28 = vmul.f32 %v7592_v11, %v7782_v32  ;;  %v2320_v29 = vmul.f32 %v7629_v38, %v7835_v21  ;;  %v2484_v19 = vrot.slane %v7731_v55, 2 }
 0x2da   : > { %v2347_v31 = vadd.f32 %v2339_v25, %v2323_v34  ;;  %v2312_v45 = vadd.f32 %v2304_v22, %v2288_v52  ;;  %v2381_v15 = vadd.f32 %v7644_v51, %v2369_v23  ;;  %v2340_v17 = vrot.slane %v2332_v7, 1  ;;  %v9246_v34 = vld [vmem:[#allocation60_spill] sm:$0xff] }
 0x2db   : > { %v2382_v27 = vadd.f32 %v2378_v8, %v2370_v39  ;;  %v2398_v0 = vrot.slane %v2390_v63, 1  ;;  %v2364_v56 = vrot.slane %v2356_v6, 2  ;;  %v9242_v41 = vrot.slane %v7615_v14, 1  ;;  %v2002_v23 = vld [vmem:[#allocation2 + $0xb0] sm:$0x3f]  ;;  %v9249_v8 = vld [vmem:[#allocation23_spill] sm:$0xff] }
 0x2dc   : > { %v2371_v10 = vadd.f32 %v2363_v48, %v2347_v31  ;;  %v2324_v18 = vadd.f32 %v2320_v29, %v2312_v45  ;;  %v2449_v11 = vmul.f32 %v7658_v33, %v7791_v12  ;;  %v2422_v38 = vrot.slane %v2414_v28, 2  ;;  %v9251_v45 = vld [vmem:[#allocation34_spill] sm:$0xff] }
 0x2dd   : > { %v2405_v20 = vadd.f32 %v9242_v41, %v2381_v15  ;;  %v2406_v35 = vadd.f32 %v2398_v0, %v2382_v27  ;;  %v2450_v51 = vmul.f32 %v7658_v33, %v7806_v46  ;;  %v9243_v9 = vrot.slane %v7640_v60, 2 }
 0x2de   : > { %v2383_v13 = vadd.f32 %v7647_v44, %v2371_v10  ;;  %v2348_v43 = vadd.f32 %v2340_v17, %v2324_v18  ;;  %v2437_v40 = vmul.f32 %v7655_v53, %v7791_v12  ;;  %v2473_v14 = vmul.f32 %v7675_v24, %v7791_v12 }
 0x2df   : > { %v2429_v49 = vadd.f32 %v9243_v9, %v2405_v20  ;;  %v9244_v62 = vrot.slane %v7667_v36, 1  ;;  %v2430_v22 = vadd.f32 %v2422_v38, %v2406_v35  ;;  %v2438_v44 = vmul.f32 %v7655_v53, %v7806_v46 }
 0x2e0   : > { %v2474_v33 = vmul.f32 %v7675_v24, %v7806_v46  ;;  %v2372_v26 = vadd.f32 %v2364_v56, %v2348_v43  ;;  %v2457_v60 = vrot.slane %v2449_v11, 1  ;;  %v2499_v47 = vmul.f32 %v7688_v61, %v7620_v50  ;;  %v9255_v11 = vld [vmem:[#allocation35_spill] sm:$0xff] }
 0x2e1   : > { %v2407_v16 = vadd.f32 %v9244_v62, %v2383_v13  ;;  %v2441_v30 = vadd.f32 %v2437_v40, %v2429_v49  ;;  %v9245_v54 = vrot.slane %v7680_v57, 2  ;;  %v2442_v12 = vadd.f32 %v2438_v44, %v2430_v22  ;;  %v9256_v40 = vld [vmem:[#allocation59_spill] sm:$0xff] }
 0x2e2   : > { %v2458_v37 = vrot.slane %v2450_v51, 1  ;;  %v2511_v36 = vmul.f32 %v7691_v4, %v7620_v50  ;;  %v2384_v58 = vadd.f32 %v7651_v5, %v2372_v26  ;;  %v2481_v7 = vrot.slane %v2473_v14, 2  ;;  %v9248_v5 = vld [vmem:[#allocation62_spill] sm:$0xff] }
 0x2e3   : > { %v2431_v2 = vadd.f32 %v9245_v54, %v2407_v16  ;;  %v2465_v53 = vadd.f32 %v2457_v60, %v2441_v30  ;;  %v2509_v24 = vmul.f32 %v7691_v4, %v7782_v32  ;;  %v2482_v1 = vrot.slane %v2474_v33, 2 }
 0x2e4   : > { %v2466_v3 = vadd.f32 %v2458_v37, %v2442_v12  ;;  %v2510_v57 = vmul.f32 %v7691_v4, %v7835_v21  ;;  %v9247_v25 = vrot.slane %v9246_v34, 1  ;;  %v2497_v52 = vmul.f32 %v7688_v61, %v7782_v32 }
 0x2e5   : > { %v2443_v46 = vadd.f32 %v7713_v59, %v2431_v2  ;;  %v2489_v63 = vadd.f32 %v2481_v7, %v2465_v53  ;;  %v2535_v6 = vmul.f32 %v9248_v5, %v7620_v50  ;;  %v9250_v31 = vrot.slane %v9249_v8, 1  ;;  %v9253_v50 = vld [vmem:[#allocation50_spill] sm:$0xff]  ;;  %v9260_v8 = vld [vmem:[#allocation61_spill] sm:$0xff] }
 0x2e6   : > { %v2408_v42 = vadd.f32 %v9247_v25, %v2384_v58  ;;  %v2490_v59 = vadd.f32 %v2482_v1, %v2466_v3  ;;  %v2498_v39 = vmul.f32 %v7688_v61, %v7835_v21  ;;  %v2534_v28 = vmul.f32 %v9248_v5, %v7835_v21 }
 0x2e7   : > { %v2467_v48 = vadd.f32 %v9250_v31, %v2443_v46  ;;  %v9252_v29 = vrot.slane %v9251_v45, 2  ;;  %v2501_v17 = vadd.f32 %v2497_v52, %v2489_v63  ;;  %v2517_v10 = vrot.slane %v2509_v24, 1  ;;  %v2777_v52 = vld [vmem:[#allocation3 + $0x80] sm:$0xff] }
 0x2e8   : > { %v2533_v27 = vmul.f32 %v9248_v5, %v7782_v32  ;;  %v9254_v0 = vrot.slane %v9253_v50, 2  ;;  %v2502_v56 = vadd.f32 %v2498_v39, %v2490_v59  ;;  %v2518_v41 = vrot.slane %v2510_v57, 1  ;;  %v2780_v59 = vld [vmem:[#allocation3 + $0x98] sm:$0xff] }
 0x2e9   : > { %v2432_v15 = vadd.f32 %v9252_v29, %v2408_v42  ;;  %v2519_v20 = vrot.slane %v2511_v36, 1  ;;  %v2500_v35 = vmul.f32 %v7688_v61, %v2002_v23  ;;  %v2512_v21 = vmul.f32 %v7691_v4, %v2002_v23  ;;  %v2781_v29 = vld [vmem:[#allocation3 + $0xa0] sm:$0xff] }
 0x2ea   : > { %v2491_v18 = vadd.f32 %v9254_v0, %v2467_v48  ;;  %v2525_v38 = vadd.f32 %v2517_v10, %v2501_v17  ;;  %v2526_v43 = vadd.f32 %v2518_v41, %v2502_v56  ;;  %v2536_v9 = vmul.f32 %v9248_v5, %v2002_v23  ;;  %v2778_v5 = vld [vmem:[#allocation3 + $0x88] sm:$0xff]  ;;  %v2779_v48 = vld [vmem:[#allocation3 + $0x90] sm:$0xff]  ;;  %v9265_v56 = vld [vmem:[#allocation18_spill] sm:$0xff] }
 0x2eb   : > { %v2444_v13 = vadd.f32 %v9255_v11, %v2432_v15  ;;  %v2542_v49 = vrot.slane %v2534_v28, 2  ;;  %v9257_v32 = vrot.slane %v9256_v40, 1  ;;  %v2541_v62 = vrot.slane %v2533_v27, 2  ;;  %v2782_v15 = vld [vmem:[#allocation3 + $0xa8] sm:$0xff]  ;;  %v2783_v10 = vld [vmem:[#allocation3 + $0xb0] sm:$0xff]  ;;  %v2784_v27 = vld [vmem:[#allocation3 + $0xb8] sm:$0xff] }
 0x2ec   : > { %v2503_v51 = vadd.f32 %v2499_v47, %v2491_v18  ;;  %v2543_v16 = vrot.slane %v2535_v6, 2  ;;  %v2520_v26 = vrot.slane %v2512_v21, 1  ;;  %v6330_v30 = vmov 1983009808   ;;  %v9263_v0 = vld [vmem:[#allocation39_spill] sm:$0xff]  ;;  %v9264_v18 = vld [vmem:[#allocation56_spill] sm:$0xff] }
 0x2ed   : > { %v2468_v14 = vadd.f32 %v9257_v32, %v2444_v13  ;;  %v2550_v44 = vadd.f32 %v2542_v49, %v2526_v43  ;;  %v2549_v61 = vadd.f32 %v2541_v62, %v2525_v38  ;;  %v2576_v4 = vunpack.c.l.s4 %v6330_v30  ;;  %v9266_v41 = vld [vmem:[#allocation30_spill] sm:$0xff]  ;;  %v5174_v49 = vld [vmem:[%s8944_s3] ss:$0 sm:$0xff] }
 0x2ee   : > { %v2527_v22 = vadd.f32 %v2519_v20, %v2503_v51  ;;  %v2544_v47 = vrot.slane %v2536_v9, 2  ;;  %v5947_v23 = vpack.c.bf16 %v2778_v5, %v2777_v52  ;;  %v5950_v39 = vpack.c.bf16 %v2780_v59, %v2779_v48  ;;  %v9267_v20 = vld [vmem:[#allocation19_spill] sm:$0xff]  ;;  %v9268_v43 = vld [vmem:[#allocation58_spill] sm:$0xff]  ;;  %v5175_v32 = vld [vmem:[%s8945_s4] ss:$0 sm:$0xff] }
 0x2ef   : > { %v2492_v33 = vadd.f32 %v2484_v19, %v2468_v14  ;;  %v2558_v2 = vrot.slane %v2550_v44, 1  ;;  %v2557_v37 = vrot.slane %v2549_v61, 1  ;;  %v2577_v36 = vunpack.c.0.s8 %v2576_v4  ;;  %v9258_v19 = vld [vmem:[#allocation14_spill] sm:$0xff]  ;;  %v5203_v5 = vld [vmem:[%s8943_s2 + $0x48] sm:$0x7]  ;;  %v9279_v59 = vld [vmem:[#allocation16_spill] sm:$0xff] }
 0x2f0   : > { %v2551_v54 = vadd.f32 %v2543_v16, %v2527_v22  ;;  %v9261_v28 = vmov 0.0   ;;  %v9262_v45 = vmov 0.0|0.0   ;;  %v5953_v17 = vpack.c.bf16 %v2782_v15, %v2781_v29  ;;  %v2925_v48 = vld [vmem:[#allocation2] sm:$0x3f]  ;;  %v9280_v29 = vld [vmem:[#allocation17_spill] sm:$0xff] }
 0x2f1   : > { %v2504_v60 = vadd.f32 %v2500_v35, %v2492_v33  ;;  %v2566_v7 = vsel %vm1574_vm7, %v2550_v44, %v2558_v2  ;;  %v2565_v46 = vsel %vm1574_vm7, %v2549_v61, %v2557_v37  ;;  %v7921_v3 = vsub.s32 %v2577_v36, %v9258_v19  ;;  %v9270_v33 = vld [vmem:[#allocation57_spill] sm:$0xff] }
 0x2f2   : > { %v2559_v53 = vrot.slane %v2551_v54, 1  ;;  %v2573_v55 = vcombine.low %v2565_v46, %v2566_v7  ;;  %v5956_v50 = vpack.c.bf16 %v2784_v27, %v2783_v10  ;;  %v9273_v7 = vld [vmem:[#allocation21_spill] sm:$0xff]  ;;  %v8013_v15 = vrot.slane %v5203_v5, %v9280_v29  ;;  %v2927_v10 = vld [vmem:[#allocation2 + $0x10] sm:$0x3f] }
 0x2f3   : > { %v2528_v12 = vadd.f32 %v2520_v26, %v2504_v60  ;;  %9259 = vst [vmem:[#allocation24_spill] sm:$0xff] %v7921_v3 }
 0x2f4   : > { %v2567_v1 = vsel %vm1574_vm7, %v2551_v54, %v2559_v53  ;;  %v2581_v25 = vrot.slane %v2573_v55, %v7921_v3 }
 0x2f5   : > { %v2552_v58 = vadd.f32 %v2544_v47, %v2528_v12 }
 0x2f7   : > { %v2560_v24 = vrot.slane %v2552_v58, 1 }
 0x2f9   : > { %v2568_v57 = vsel %vm1574_vm7, %v2552_v58, %v2560_v24  ;;  %v9272_v58 = vld [vmem:[#allocation20_spill] sm:$0xff] }
 0x2fa   : > { %v2574_v34 = vcombine.low %v2567_v1, %v2568_v57 }
 0x2fc   : > { %v2588_v42 = vrot.slane %v2574_v34, %v7921_v3 }
 0x2fe   : > { %v2589_v63 = vcombine.low %v2581_v25, %v2588_v42  ;;  %v9276_v25 = vld [vmem:[#allocation42_spill] sm:$0xff] }
 0x300   : > { %v7927_v6 = vrot.slane %v2589_v63, 7 }
 0x302   : > { %v7932_v31 = vsel %vm1574_vm7, %v9260_v8, %v7927_v6 }
 0x303   : > { %5592 = vmatprep.mubr.msk.f32.mxu0 %vm396_vm2, %v7932_v31 }
 0x304   : > { %5593 = vmatmul.mubr.msk.f32.vlgmr.msra.gmra.mrb[20].mxu0 %vm396_vm2, %v7927_v6 }
 0x305   : > { %5948 = vmatpush3.bf16.msra.mxu0 %v5947_v23  ;;  %5630 = vmatprep.mubr.msk.f32.mxu0 %vm6328_vm0, %v9261_v28  ;;  %v9278_v23 = vld [vmem:[#allocation15_spill] sm:$0xff] }
 0x306   : > { %5949 = vmatprep.subr.bf16.mxu0 %v9262_v45  ;;  %v8007_v8 = vrot.slane %v5203_v5, %v9278_v23 }
 0x309   : > { %5951 = vmatpush3.bf16.msra.mxu0 %v5950_v39  ;;  %v8010_v39 = vrot.slane %v5203_v5, %v9279_v59 }
 0x30a   : > { %5952 = vmatprep.subr.bf16.mxu0 %v9262_v45 }
 0x30b   : > { %v2959_v27 = vmul.f32 %v8010_v39, %v2925_v48 }
 0x30d   : > { %5954 = vmatpush3.bf16.msra.mxu0 %v5953_v17  ;;  %v2971_v17 = vmul.f32 %v8007_v8, %v2925_v48 }
 0x30e   : > { %5955 = vmatprep.subr.bf16.mxu0 %v9262_v45 }
 0x311   : > { %5957 = vmatpush3.bf16.msra.mxu0 %v5956_v50  ;;  %v2979_v50 = vrot.slane %v2971_v17, 1 }
 0x312   : > { %5990 = vmatprep.subr.bf16.mxu0 %v9262_v45 }
 0x314   : > { %5631 = vmatmul.mubr.msk.f32.vlgmr.msra.gmra.mrb[22].mxu0 %vm396_vm2, %v9263_v0  ;;  %v2995_v0 = vmul.f32 %v8013_v15, %v2925_v48 }
 0x315   : > { %5633 = vmatprep.mubr.msk.f32.mxu0 %vm6328_vm0, %v9261_v28 }
 0x318   : > { %5634 = vmatmul.mubr.msk.f32.gmra.mrb[24].mxu0 %vm396_vm2, %v9264_v18  ;;  %v5204_v18 = vld [vmem:[%s8943_s2 + $0x4c] sm:$0x7] }
 0x319   : > { %5636 = vmatprep.mubr.msk.f32.mxu0 %vm6328_vm0, %v9261_v28 }
 0x31c   : > { %5637 = vmatmul.mubr.msk.f32.gmra.mrb[26].mxu0 %vm396_vm2, %v9265_v56  ;;  %v2972_v56 = vmul.f32 %v8007_v8, %v2927_v10 }
 0x31d   : > { %5639 = vmatprep.mubr.msk.f32.mxu0 %vm6328_vm0, %v9261_v28 }
 0x320   : > { %5640 = vmatmul.mubr.msk.f32.gmra.mrb[28].mxu0 %vm396_vm2, %v9266_v41  ;;  %v8023_v41 = vrot.slane %v5204_v18, %v9279_v59 }
 0x321   : > { %5642 = vmatprep.mubr.msk.f32.mxu0 %vm6328_vm0, %v9261_v28 }
 0x324   : > { %5643 = vmatmul.mubr.msk.f32.gmra.mrb[30].mxu0 %vm396_vm2, %v9267_v20  ;;  %v8026_v20 = vrot.slane %v5204_v18, %v9278_v23 }
 0x325   : > { %5687 = vmatprep.mubr.msk.f32.mxu0 %vm6328_vm0, %v9261_v28  ;;  %v1780_v11 = vpop.f32.mrb[10].mxu0 }
 0x326   : > { %v5532_v13 = vpop.f32.mrb[11].mxu0  ;;  %v1781_v4 = vadd.f32 1e-05, %v1780_v11  ;;  %v2987_v11 = vadd.f32 %v2979_v50, %v2959_v27 }
 0x327   : > { %v3003_v13 = vrot.slane %v2995_v0, 2 }
 0x33b   : > { %v1785_v35 = vpop.f32.mrb[12].mxu0 }
 0x33c   : > { %v1786_v21 = vadd.f32 1e-05, %v1785_v35  ;;  %v5535_v38 = vpop.f32.mrb[13].mxu0  ;;  %v2926_v35 = vld [vmem:[#allocation2 + $0x8] sm:$0x3f] }
 0x33d   : > { %v2980_v38 = vrot.slane %v2972_v56, 1 }
 0x33e   : > { %6119 = vrsqrt.f32 %v1786_v21  ;;  %v2960_v21 = vmul.f32 %v8010_v39, %v2927_v10 }
 0x348   : > { %v6120_v51 = vpop.eup %6119 }
 0x349   : > { %v1810_v9 = vmul.f32 %v6120_v51, %v9268_v43  ;;  %v2996_v51 = vmul.f32 %v8013_v15, %v2927_v10  ;;  %v8031_v43 = vrot.slane %v5204_v18, %v9280_v29  ;;  %v5206_v18 = vld [vmem:[%s8943_s2 + $0x54] sm:$0x7] }
 0x34b   : > { %v1821_v40 = vmul.f32 %v5174_v49, %v1810_v9  ;;  %v3011_v9 = vadd.f32 %v3003_v13, %v2987_v11 }
 0x34d   : > { %v7971_v14 = vadd.f32 %v5175_v32, %v1821_v40  ;;  %v3031_v40 = vmul.f32 %v8026_v20, %v2926_v35 }
 0x34f   : > { %9269 = vst [vmem:[#allocation28_spill] sm:$0xff] %v7971_v14  ;;  %3997 = vrot.lane.b32.xlu1 %v7971_v14, %s6331_s19 }
 0x365   : > { %v1790_v62 = vpop.f32.mrb[14].mxu0 }
 0x366   : > { %v1791_v16 = vadd.f32 1e-05, %v1790_v62  ;;  %v5538_v22 = vpop.f32.mrb[15].mxu0  ;;  %v3004_v62 = vrot.slane %v2996_v51, 2 }
 0x368   : > { %6121 = vrsqrt.f32 %v1791_v16  ;;  %v2928_v16 = vld [vmem:[#allocation2 + $0x18] sm:$0x3f] }
 0x369   : > { %6123 = vrsqrt.f32 %v1781_v4  ;;  %v3020_v4 = vmul.f32 %v8023_v41, %v2928_v16 }
 0x372   : > { %v6122_v44 = vpop.eup %6121 }
 0x373   : > { %v1811_v26 = vmul.f32 %v6122_v44, %v9270_v33  ;;  %v6124_v37 = vpop.eup %6123  ;;  %v3039_v44 = vrot.slane %v3031_v40, 1  ;;  %v3055_v33 = vmul.f32 %v8031_v43, %v2926_v35 }
 0x374   : > { %v1809_v53 = vmul.f32 %v6124_v37, %v9272_v58  ;;  %v3056_v58 = vmul.f32 %v8031_v43, %v2928_v16 }
 0x375   : > { %v1822_v61 = vmul.f32 %v5174_v49, %v1811_v26  ;;  %v5205_v26 = vld [vmem:[%s8943_s2 + $0x50] sm:$0x7] }
 0x376   : > { %v1820_v1 = vmul.f32 %v5174_v49, %v1809_v53  ;;  %v8049_v53 = vrot.slane %v5205_v26, %v9280_v29 }
 0x377   : > { %v7976_v30 = vadd.f32 %v5175_v32, %v1822_v61 }
 0x378   : > { %v7986_v57 = vadd.f32 %v5175_v32, %v1820_v1  ;;  %v3115_v0 = vmul.f32 %v8049_v53, %v2927_v10 }
 0x379   : > { %9271 = vst [vmem:[#allocation27_spill] sm:$0xff] %v7976_v30  ;;  %3999 = vrot.lane.b32.xlu1 %v7976_v30, %s6331_s19 }
 0x37a   : > { %9275 = vst [vmem:[#allocation26_spill] sm:$0xff] %v7986_v57  ;;  %v3123_v51 = vrot.slane %v3115_v0, 2  ;;  %v2940_v0 = vld [vmem:[#allocation2 + $0x90] sm:$0x3f] }
 0x37c   : > { %v1795_v60 = vpop.f32.mrb[16].mxu0 }
 0x37d   : > { %v1796_v47 = vadd.f32 1e-05, %v1795_v60  ;;  %v5541_v54 = vpop.f32.mrb[17].mxu0  ;;  %v3032_v60 = vmul.f32 %v8026_v20, %v2928_v16  ;;  %v9283_v16 = vld [vmem:[#allocation10_spill] sm:$0xff] }
 0x37e   : > { %v8045_v54 = vrot.slane %v5205_v26, %v9278_v23 }
 0x37f   : > { %6125 = vrsqrt.f32 %v1796_v47  ;;  %v8042_v47 = vrot.slane %v5205_v26, %v9279_v59 }
 0x380   : > { %v1800_v2 = vpop.f32.mrb[18].mxu0 }
 0x381   : > { %v5544_v12 = vpop.f32.mrb[19].mxu0  ;;  %v1801_v55 = vadd.f32 1e-05, %v1800_v2 }
 0x382   : > { %v3063_v12 = vrot.slane %v3055_v33, 2  ;;  %v9284_v33 = vld [vmem:[#allocation11_spill] sm:$0xff] }
 0x383   : > { %6127 = vrsqrt.f32 %v1801_v55  ;;  %v3091_v55 = vmul.f32 %v8045_v54, %v2927_v10 }
 0x385   : > { %v3099_v50 = vrot.slane %v3091_v55, 1 }
 0x389   : > { %v6126_v36 = vpop.eup %6125 }
 0x38a   : > { %v1812_v24 = vmul.f32 %v6126_v36, %v9273_v7  ;;  %v3040_v36 = vrot.slane %v3032_v60, 1  ;;  %v2930_v7 = vld [vmem:[#allocation2 + $0x30] sm:$0x3f] }
 0x38b   : > { %v2973_v48 = vmul.f32 %v8007_v8, %v2930_v7 }
 0x38c   : > { %v1823_v46 = vmul.f32 %v5174_v49, %v1812_v24 }
 0x38d   : > { %v6128_v34 = vpop.eup %6127 }
 0x38e   : > { %v7982_v19 = vadd.f32 %v5175_v32, %v1823_v46  ;;  %v1813_v42 = vmul.f32 %v6128_v34, %v9276_v25  ;;  %v3079_v46 = vmul.f32 %v8042_v47, %v2927_v10  ;;  %v3064_v34 = vrot.slane %v3056_v58, 2 }
 0x38f   : > { %v2997_v10 = vmul.f32 %v8013_v15, %v2930_v7 }
 0x390   : > { %9274 = vst [vmem:[#allocation22_spill] sm:$0xff] %v7982_v19  ;;  %4001 = vrot.lane.b32.xlu1 %v7982_v19, %s6331_s19  ;;  %v1824_v63 = vmul.f32 %v5174_v49, %v1813_v42  ;;  %v3019_v49 = vmul.f32 %v8023_v41, %v2926_v35  ;;  %v2929_v42 = vld [vmem:[#allocation2 + $0x20] sm:$0x3f]  ;;  %v2961_v35 = vmul.f32 %v8010_v39, %v2930_v7 }
 0x391   : > { %v3080_v11 = vmul.f32 %v8042_v47, %v2929_v42 }
 0x392   : > { %v7999_v52 = vadd.f32 %v5175_v32, %v1824_v63  ;;  %v2988_v32 = vadd.f32 %v2980_v38, %v2960_v21  ;;  %v3023_v22 = vadd.f32 %v3019_v49, %v3011_v9  ;;  %v2981_v21 = vrot.slane %v2973_v48, 1 }
 0x393   : > { %v8074_v9 = vrot.slane %v5206_v18, %v9279_v59  ;;  %v8077_v49 = vrot.slane %v5206_v18, %v9278_v23 }
 0x394   : > { %4281 = vrot.lane.b32.xlu1 %v7986_v57, %s6332_s9  ;;  %9277 = vst [vmem:[#allocation25_spill] sm:$0xff] %v7999_v52  ;;  %v3012_v61 = vadd.f32 %v3004_v62, %v2988_v32  ;;  %v3047_v2 = vadd.f32 %v3039_v44, %v3023_v22  ;;  %v3116_v62 = vmul.f32 %v8049_v53, %v2929_v42  ;;  %v2935_v22 = vld [vmem:[#allocation2 + $0x60] sm:$0x3f] }
 0x395   : > { %v8083_v44 = vrot.slane %v5206_v18, %v9280_v29  ;;  %v2989_v26 = vadd.f32 %v2981_v21, %v2961_v35  ;;  %v5210_v18 = vld [vmem:[%s8943_s2 + $0x64] sm:$0x7]  ;;  %v8135_v35 = vld [vmem:[#allocation2 + $0xa0] sm:$0x3f] }
 0x396   : > { %v3024_v37 = vadd.f32 %v3020_v4, %v3012_v61  ;;  %v3071_v24 = vadd.f32 %v3063_v12, %v3047_v2  ;;  %v3005_v61 = vrot.slane %v2997_v10, 2  ;;  %v5207_v4 = vld [vmem:[%s8943_s2 + $0x58] sm:$0x7]  ;;  %v3139_v2 = vmul.f32 %v8074_v9, %v2930_v7 }
 0x397   : > { %v3151_v12 = vmul.f32 %v8077_v49, %v2930_v7  ;;  %v3124_v58 = vrot.slane %v3116_v62, 2  ;;  %v8100_v55 = vmul.f32 %v8083_v44, %v2935_v22 }
 0x398   : > { %4285 = vrot.lane.b32.xlu1 %v7976_v30, %s6332_s9  ;;  %v3048_v1 = vadd.f32 %v3040_v36, %v3024_v37  ;;  %v3083_v27 = vadd.f32 %v3079_v46, %v3071_v24  ;;  %v5209_v37 = vld [vmem:[%s8943_s2 + $0x60] sm:$0x7]  ;;  %v8095_v24 = vmul.f32 %v8077_v49, %v2935_v22  ;;  %v3175_v46 = vmul.f32 %v8083_v44, %v2930_v7 }
 0x399   : > { %v8115_v7 = vrot.slane %v5209_v37, %v9279_v59 }
 0x39a   : > { %v3072_v56 = vadd.f32 %v3064_v34, %v3048_v1  ;;  %v3107_v38 = vadd.f32 %v3099_v50, %v3083_v27  ;;  %v9285_v1 = vld [vmem:[#allocation12_spill] sm:$0xff]  ;;  %v5208_v34 = vld [vmem:[%s8943_s2 + $0x5c] sm:$0x7]  ;;  %v3159_v27 = vrot.slane %v3151_v12, 1  ;;  %v8118_v50 = vrot.slane %v5209_v37, %v9278_v23 }
 0x39b   : > { %v3183_v21 = vrot.slane %v3175_v46, 2  ;;  %v8164_v46 = vmul.f32 %v8115_v7, %v2940_v0 }
 0x39c   : > { %4287 = vrot.lane.b32.xlu1 %v7982_v19, %s6332_s9  ;;  %v3084_v40 = vadd.f32 %v3080_v11, %v3072_v56  ;;  %v3131_v60 = vadd.f32 %v3123_v51, %v3107_v38  ;;  %v8139_v38 = vrot.slane %v5208_v34, %v9279_v59  ;;  %v8142_v51 = vrot.slane %v5209_v37, %v9280_v29 }
 0x39d   : > { %v8158_v12 = vmul.f32 %v8118_v50, %v2935_v22  ;;  %v8161_v37 = vrot.slane %v5210_v18, %v9279_v59  ;;  %v8185_v11 = vrot.slane %v5210_v18, %v9278_v23 }
 0x39e   : > { %v3143_v48 = vadd.f32 %v3139_v2, %v3131_v60  ;;  %v8155_v2 = vmul.f32 %v8115_v7, %v2935_v22  ;;  %v8182_v10 = vmul.f32 %v8142_v51, %v2940_v0 }
 0x3a0   : > { %4566 = vrot.lane.b32.xlu1 %v7986_v57, %s6333_s21  ;;  %v3167_v60 = vadd.f32 %v3159_v27, %v3143_v48  ;;  %v8176_v27 = vmul.f32 %v8118_v50, %v8135_v35 }
 0x3a2   : > { %9288 = vst [vmem:[#allocation48_spill] sm:$0xff] %v8176_v27 }
 0x3a4   : > { %4570 = vrot.lane.b32.xlu1 %v7976_v30, %s6333_s21 }
 0x3a8   : > { %4574 = vrot.lane.b32.xlu1 %v7999_v52, %s6333_s21 }
 0x3d7   : > { %v5594_v25 = vpop.f32.mrb[20].mxu0 }
 0x3d8   : > { %v8054_v63 = vsub.f32 %v7927_v6, %v5594_v25  ;;  %v2664_v5 = vpop.f32.mrb[21].mxu0  ;;  %v3092_v6 = vmul.f32 %v8045_v54, %v2929_v42  ;;  %v8106_v25 = vadd.f32 %v3005_v61, %v2989_v26  ;;  %v8109_v42 = vmul.f32 %v8074_v9, %v2935_v22  ;;  %v9287_v26 = vld [vmem:[#allocation13_spill] sm:$0xff] }
 0x3d9   : > { %v8058_v17 = vsub.f32 %v7932_v31, %v2664_v5  ;;  %v8112_v5 = vrot.slane %v5207_v4, %v9279_v59  ;;  %v8149_v61 = vrot.slane %v5208_v34, %v9278_v23 }
 0x3da   : > { %9281 = vst [vmem:[#allocation41_spill] sm:$0xff] %v8054_v63  ;;  %v2676_v31 = vmul.f32 %v8054_v63, %v8054_v63  ;;  %v3100_v32 = vrot.slane %v3092_v6, 1  ;;  %v8127_v6 = vrot.slane %v5207_v4, %v9278_v23 }
 0x3db   : > { %9282 = vst [vmem:[#allocation47_spill] sm:$0xff] %v8058_v17  ;;  %v2675_v13 = vmul.f32 %v8058_v17, %v8058_v17  ;;  %v8191_v17 = vadd.f32 %v3183_v21, %v3167_v60  ;;  %v5211_v21 = vld [vmem:[%s8943_s2 + $0x68] sm:$0x7] }
 0x3dc   : > { %v3108_v36 = vadd.f32 %v3100_v32, %v3084_v40 }
 0x3dd   : > { %5611 = vmatprep.mubr.msk.f32.mxu1 %vm396_vm2, %v2675_v13  ;;  %v8130_v13 = vrot.slane %v5207_v4, %v9280_v29  ;;  %v8152_v4 = vrot.slane %v5208_v34, %v9280_v29  ;;  %v8171_v34 = vmul.f32 %v8118_v50, %v2940_v0  ;;  %v8196_v0 = vmul.f32 %v8142_v51, %v8135_v35 }
 0x3de   : > { %5612 = vmatmul.mubr.msk.f32.vlgmr.msra.gmra.mrb[20].mxu1 %vm396_vm2, %v2676_v31  ;;  %v8123_v56 = vadd.f32 %v3124_v58, %v3108_v36  ;;  %v2941_v58 = vld [vmem:[#allocation2 + $0x98] sm:$0x3f] }
 0x3df   : > { %5961 = vmatpush3.bf16.msra.mxu1 %v9283_v16  ;;  %9290 = vst [vmem:[#allocation36_spill] sm:$0xff] %v8196_v0  ;;  %v8199_v63 = vmul.f32 %v8161_v37, %v2941_v58 }
 0x3e0   : > { %5963 = vmatprep.subr.bf16.mxu1 %v9284_v33 }
 0x3e1   : > { %9291 = vst [vmem:[#allocation45_spill] sm:$0xff] %v8199_v63 }
 0x3e3   : > { %5965 = vmatpush3.bf16.msra.mxu1 %v9284_v33  ;;  %v8238_v33 = vrot.slane %v5211_v21, %v9278_v23 }
 0x3e4   : > { %5967 = vmatprep.subr.bf16.mxu1 %v9285_v1 }
 0x3e7   : > { %v8132_v31 = vpop.f32.mrb[22].mxu0  ;;  %5969 = vmatpush3.bf16.msra.mxu1 %v9285_v1 }
 0x3e8   : > { %9286 = vst [vmem:[#allocation43_spill] sm:$0xff] %v8132_v31  ;;  %v2880_v40 = vcombine.high %v8132_v31, %v8132_v31  ;;  %v5202_v32 = vrot.slane %v8132_v31, 9  ;;  %v5632_v62 = vpop.f32.mrb[23].mxu0  ;;  %5971 = vmatprep.subr.bf16.mxu1 %v9287_v26  ;;  %v8241_v31 = vrot.slane %v5211_v21, %v9280_v29 }
 0x3e9   : > { %v8168_v62 = vmul.f32 %v8115_v7, %v8135_v35 }
 0x3ea   : > { %v2886_v36 = vrot.slane %v2880_v40, 5  ;;  %v8179_v40 = vmul.f32 %v8142_v51, %v2935_v22  ;;  %9295 = vst [vmem:[#allocation46_spill] sm:$0xff] %v8241_v31 }
 0x3eb   : > { %v2856_v48 = vpop.f32.mrb[24].mxu0  ;;  %5973 = vmatpush3.bf16.msra.mxu1 %v9287_v26  ;;  %v8211_v26 = vmul.f32 %v8185_v11, %v2941_v58 }
 0x3ec   : > { %v2887_v30 = vsel %vm6864_vm6, %v5202_v32, %v2886_v36  ;;  %v2888_v52 = vrot.slane %v2886_v36, 4  ;;  %v2881_v14 = vcombine.high %v2856_v48, %v2856_v48  ;;  %v2889_v28 = vrot.slane %v2856_v48, 5  ;;  %v5635_v57 = vpop.f32.mrb[25].mxu0  ;;  %5975 = vmatprep.subr.bf16.mxu1 %v9283_v16  ;;  %v2943_v48 = vld [vmem:[#allocation2 + $0xa8] sm:$0x3f] }
 0x3ed   : > { %2917 = vst.msk [vmem:[#allocation2 + $0x39] sm:$0xf] %vm548_vm5, %v2887_v30  ;;  %9292 = vst [vmem:[#allocation44_spill] sm:$0xff] %v8211_v26  ;;  %v8222_v22 = vmul.f32 %v8161_v37, %v2943_v48  ;;  %v8225_v16 = vmul.f32 %v8185_v11, %v2943_v48 }
 0x3ee   : > { %v2890_v32 = vsel %vm6864_vm6, %v2888_v52, %v2889_v28  ;;  %v2891_v36 = vrot.slane %v2889_v28, 4  ;;  %v2892_v57 = vrot.slane %v2881_v14, 5  ;;  %v8214_v28 = vrot.slane %v5210_v18, %v9280_v29 }
 0x3ef   : > { %2918 = vst.msk [vmem:[#allocation2 + $0x41] sm:$0xf] %vm548_vm5, %v2890_v32  ;;  %v2861_v30 = vpop.f32.mrb[26].mxu0  ;;  %9293 = vst [vmem:[#allocation32_spill] sm:$0xff] %v8222_v22 }
 0x3f0   : > { %v2893_v14 = vsel %vm6864_vm6, %v2891_v36, %v2892_v57  ;;  %v2894_v52 = vrot.slane %v2892_v57, 4  ;;  %v2882_v32 = vcombine.high %v2861_v30, %v2861_v30  ;;  %v2895_v45 = vrot.slane %v2861_v30, 5  ;;  %v5638_v1 = vpop.f32.mrb[27].mxu0  ;;  %9294 = vst [vmem:[#allocation51_spill] sm:$0xff] %v8225_v16 }
 0x3f1   : > { %2919 = vst.msk [vmem:[#allocation2 + $0x49] sm:$0xf] %vm548_vm5, %v2893_v14  ;;  %v8230_v30 = vrot.slane %v5211_v21, %v9279_v59  ;;  %v8235_v60 = vmul.f32 %v8214_v28, %v2941_v58  ;;  %v8255_v29 = vmul.f32 %v8214_v28, %v2943_v48 }
 0x3f2   : > { %v2896_v18 = vsel %vm6864_vm6, %v2894_v52, %v2895_v45  ;;  %v2897_v36 = vrot.slane %v2895_v45, 4  ;;  %v2898_v57 = vrot.slane %v2882_v32, 5 }
 0x3f3   : > { %2920 = vst.msk [vmem:[#allocation2 + $0x51] sm:$0xf] %vm548_vm5, %v2896_v18  ;;  %v2866_v1 = vpop.f32.mrb[28].mxu0  ;;  %9296 = vst [vmem:[#allocation55_spill] sm:$0xff] %v8255_v29 }
 0x3f4   : > { %v8243_v52 = vld [vmem:[#allocation2 + $0x38] sm:$0x3f]  ;;  %v2899_v45 = vsel %vm6864_vm6, %v2897_v36, %v2898_v57  ;;  %v2900_v59 = vrot.slane %v2898_v57, 4  ;;  %v2883_v32 = vcombine.high %v2866_v1, %v2866_v1  ;;  %v2901_v18 = vrot.slane %v2866_v1, 5  ;;  %v5641_v3 = vpop.f32.mrb[29].mxu0 }
 0x3f5   : > { %v3021_v14 = vmul.f32 %v8023_v41, %v8243_v52  ;;  %v3033_v58 = vmul.f32 %v8026_v20, %v8243_v52  ;;  %v3057_v23 = vmul.f32 %v8031_v43, %v8243_v52  ;;  %2921 = vst.msk [vmem:[#allocation2 + $0x69] sm:$0xf] %vm548_vm5, %v2899_v45  ;;  %v3199_v1 = vmul.f32 %v8112_v5, %v8243_v52 }
 0x3f6   : > { %v8257_v21 = vld [vmem:[#allocation2 + $0x40] sm:$0x3f]  ;;  %v2902_v36 = vsel %vm6864_vm6, %v2900_v59, %v2901_v18  ;;  %v2903_v3 = vrot.slane %v2901_v18, 4  ;;  %v2904_v57 = vrot.slane %v2883_v32, 5  ;;  %v8270_v29 = vmul.f32 %v8127_v6, %v8243_v52 }
 0x3f7   : > { %v3041_v22 = vrot.slane %v3033_v58, 1  ;;  %v2962_v16 = vmul.f32 %v8010_v39, %v8257_v21  ;;  %v2974_v45 = vmul.f32 %v8007_v8, %v8257_v21  ;;  %2922 = vst.msk [vmem:[#allocation2 + $0x71] sm:$0xf] %vm548_vm5, %v2902_v36  ;;  %v2871_v48 = vpop.f32.mrb[30].mxu0  ;;  %v2998_v32 = vmul.f32 %v8013_v15, %v8257_v21 }
 0x3f8   : > { %v8272_v59 = vld [vmem:[#allocation2 + $0x48] sm:$0x3f]  ;;  %v2905_v18 = vsel %vm6864_vm6, %v2903_v3, %v2904_v57  ;;  %v2906_v58 = vrot.slane %v2904_v57, 4  ;;  %v2907_v39 = vrot.slane %v2871_v48, 5  ;;  %v5644_v0 = vpop.f32.mrb[31].mxu0  ;;  %v3065_v26 = vrot.slane %v3057_v23, 2 }
 0x3f9   : > { %v2982_v8 = vrot.slane %v2974_v45, 1  ;;  %v3034_v36 = vmul.f32 %v8026_v20, %v8272_v59  ;;  %v3058_v27 = vmul.f32 %v8031_v43, %v8272_v59  ;;  %2923 = vst.msk [vmem:[#allocation2 + $0x79] sm:$0xf] %vm548_vm5, %v2905_v18  ;;  %v3006_v63 = vrot.slane %v2998_v32, 2 }
 0x3fa   : > { %v3022_v15 = vmul.f32 %v8023_v41, %v8272_v59  ;;  %v8285_v31 = vld [vmem:[#allocation2 + $0x50] sm:$0x3f]  ;;  %v2908_v3 = vsel %vm6864_vm6, %v2906_v58, %v2907_v39  ;;  %v3025_v0 = vadd.f32 %v3021_v14, %v8106_v25  ;;  %v3081_v20 = vmul.f32 %v8042_v47, %v8257_v21 }
 0x3fb   : > { %v2990_v23 = vadd.f32 %v2982_v8, %v2962_v16  ;;  %v3042_v57 = vrot.slane %v3034_v36, 1  ;;  %v3066_v45 = vrot.slane %v3058_v27, 2  ;;  %2924 = vst.msk [vmem:[#allocation2 + $0x81] sm:$0xf] %vm548_vm5, %v2908_v3  ;;  %v3094_v43 = vmul.f32 %v8045_v54, %v8285_v31 }
 0x3fc   : > { %v3118_v41 = vmul.f32 %v8049_v53, %v8285_v31  ;;  %v3049_v48 = vadd.f32 %v3041_v22, %v3025_v0  ;;  %v3093_v19 = vmul.f32 %v8045_v54, %v8257_v21  ;;  %v3117_v16 = vmul.f32 %v8049_v53, %v8257_v21  ;;  %v8309_v54 = vld [vmem:[#allocation2 + $0x68] sm:$0x3f] }
 0x3fd   : > { %v3014_v32 = vadd.f32 %v3006_v63, %v2990_v23  ;;  %v3140_v25 = vmul.f32 %v8074_v9, %v8257_v21  ;;  %v3152_v27 = vmul.f32 %v8077_v49, %v8257_v21  ;;  %v3082_v14 = vmul.f32 %v8042_v47, %v8285_v31 }
 0x3fe   : > { %v3102_v18 = vrot.slane %v3094_v43, 1  ;;  %v8307_v58 = vld [vmem:[#allocation2 + $0x70] sm:$0x3f]  ;;  %v3073_v22 = vadd.f32 %v3065_v26, %v3049_v48  ;;  %v3101_v39 = vrot.slane %v3093_v19, 1  ;;  %v3125_v63 = vrot.slane %v3117_v16, 2 }
 0x3ff   : > { %v3026_v8 = vadd.f32 %v3022_v15, %v3014_v32  ;;  %v3126_v36 = vrot.slane %v3118_v41, 2  ;;  %v3144_v53 = vadd.f32 %v3140_v25, %v8123_v56  ;;  %v3154_v0 = vmul.f32 %v8077_v49, %v8307_v58 }
 0x400   : > { %v3085_v3 = vadd.f32 %v3081_v20, %v3073_v22  ;;  %v3160_v23 = vrot.slane %v3152_v27, 1  ;;  %v3176_v47 = vmul.f32 %v8083_v44, %v8257_v21  ;;  %v3142_v26 = vmul.f32 %v8074_v9, %v8307_v58  ;;  %v8322_v48 = vld [vmem:[#allocation2 + $0x78] sm:$0x3f] }
 0x401   : > { %v3050_v43 = vadd.f32 %v3042_v57, %v3026_v8  ;;  %v3178_v15 = vmul.f32 %v8083_v44, %v8307_v58  ;;  %v3200_v41 = vmul.f32 %v8112_v5, %v8272_v59  ;;  %v3201_v49 = vmul.f32 %v8112_v5, %v8309_v54 }
 0x402   : > { %v3109_v56 = vadd.f32 %v3101_v39, %v3085_v3  ;;  %v3168_v20 = vadd.f32 %v3160_v23, %v3144_v53  ;;  %v3184_v19 = vrot.slane %v3176_v47, 2  ;;  %v3162_v16 = vrot.slane %v3154_v0, 1 }
 0x403   : > { %v3074_v32 = vadd.f32 %v3066_v45, %v3050_v43  ;;  %v3186_v57 = vrot.slane %v3178_v15, 2  ;;  %v3203_v25 = vadd.f32 %v3199_v1, %v8191_v17  ;;  %v3212_v44 = vmul.f32 %v8127_v6, %v8272_v59 }
 0x404   : > { %v3133_v9 = vadd.f32 %v3125_v63, %v3109_v56  ;;  %v3192_v27 = vadd.f32 %v3184_v19, %v3168_v20  ;;  %v3213_v22 = vmul.f32 %v8127_v6, %v8309_v54  ;;  %v3202_v39 = vmul.f32 %v8112_v5, %v8322_v48 }
 0x405   : > { %v3086_v8 = vadd.f32 %v3082_v14, %v3074_v32  ;;  %v3219_v53 = vrot.slane %v8270_v29, 1  ;;  %v3235_v45 = vmul.f32 %v8130_v13, %v8243_v52  ;;  %v3214_v1 = vmul.f32 %v8127_v6, %v8322_v48  ;;  %v8353_v32 = vld [vmem:[#allocation2 + $0x80] sm:$0x3f] }
 0x406   : > { %v3145_v3 = vadd.f32 %v8109_v42, %v3133_v9  ;;  %v3204_v17 = vadd.f32 %v3200_v41, %v3192_v27  ;;  %v3220_v63 = vrot.slane %v3212_v44, 1  ;;  %v3221_v23 = vrot.slane %v3213_v22, 1 }
 0x407   : > { %v3110_v0 = vadd.f32 %v3102_v18, %v3086_v8  ;;  %v3227_v47 = vadd.f32 %v3219_v53, %v3203_v25  ;;  %v3236_v14 = vmul.f32 %v8130_v13, %v8272_v59  ;;  %v9297_v5 = vrot.slane %v8095_v24, 1 }
 0x408   : > { %v3228_v29 = vadd.f32 %v3220_v63, %v3204_v17  ;;  %v3237_v52 = vmul.f32 %v8130_v13, %v8309_v54  ;;  %v3238_v42 = vmul.f32 %v8130_v13, %v8322_v48  ;;  %v3243_v41 = vrot.slane %v3235_v45, 2 }
 0x409   : > { %v3169_v43 = vadd.f32 %v9297_v5, %v3145_v3  ;;  %v3134_v15 = vadd.f32 %v3126_v36, %v3110_v0  ;;  %v3244_v6 = vrot.slane %v3236_v14, 2  ;;  %v3259_v18 = vmul.f32 %v8139_v38, %v8257_v21 }
 0x40a   : > { %v9298_v56 = vrot.slane %v8100_v55, 2  ;;  %v3222_v59 = vrot.slane %v3214_v1, 1  ;;  %v3245_v19 = vrot.slane %v3237_v52, 2  ;;  %v3260_v24 = vmul.f32 %v8139_v38, %v8285_v31 }
 0x40b   : > { %v3146_v25 = vadd.f32 %v3142_v26, %v3134_v15  ;;  %v3246_v9 = vrot.slane %v3238_v42, 2  ;;  %v3251_v27 = vadd.f32 %v3243_v41, %v3227_v47  ;;  %v3252_v13 = vadd.f32 %v3244_v6, %v3228_v29 }
 0x40c   : > { %v3193_v20 = vadd.f32 %v9298_v56, %v3169_v43  ;;  %v3261_v44 = vmul.f32 %v8139_v38, %v8307_v58  ;;  %v3271_v22 = vmul.f32 %v8149_v61, %v8257_v21  ;;  %v3272_v55 = vmul.f32 %v8149_v61, %v8285_v31 }
 0x40d   : > { %v3170_v8 = vadd.f32 %v3162_v16, %v3146_v25  ;;  %v3263_v53 = vadd.f32 %v3259_v18, %v3251_v27  ;;  %v3264_v45 = vadd.f32 %v3260_v24, %v3252_v13  ;;  %v3273_v3 = vmul.f32 %v8149_v61, %v8307_v58 }
 0x40e   : > { %v3205_v36 = vadd.f32 %v3201_v49, %v3193_v20  ;;  %v3262_v17 = vmul.f32 %v8139_v38, %v8353_v32  ;;  %v3279_v49 = vrot.slane %v3271_v22, 1  ;;  %v3280_v1 = vrot.slane %v3272_v55, 1 }
 0x40f   : > { %v3194_v63 = vadd.f32 %v3186_v57, %v3170_v8  ;;  %v3274_v0 = vmul.f32 %v8149_v61, %v8353_v32  ;;  %v3295_v47 = vmul.f32 %v8152_v4, %v8257_v21  ;;  %v3296_v16 = vmul.f32 %v8152_v4, %v8285_v31 }
 0x410   : > { %v3229_v26 = vadd.f32 %v3221_v23, %v3205_v36  ;;  %v3281_v5 = vrot.slane %v3273_v3, 1  ;;  %v3287_v43 = vadd.f32 %v3279_v49, %v3263_v53  ;;  %v3288_v29 = vadd.f32 %v3280_v1, %v3264_v45 }
 0x411   : > { %v3206_v23 = vadd.f32 %v3202_v39, %v3194_v63  ;;  %v3297_v38 = vmul.f32 %v8152_v4, %v8307_v58  ;;  %v3298_v57 = vmul.f32 %v8152_v4, %v8353_v32  ;;  %v3303_v52 = vrot.slane %v3295_v47, 2 }
 0x412   : > { %v3253_v14 = vadd.f32 %v3245_v19, %v3229_v26  ;;  %v3304_v61 = vrot.slane %v3296_v16, 2  ;;  %v3320_v21 = vmul.f32 %v8115_v7, %v8307_v58  ;;  %v3332_v31 = vmul.f32 %v8118_v50, %v8307_v58 }
 0x413   : > { %v3230_v15 = vadd.f32 %v3222_v59, %v3206_v23  ;;  %v3282_v41 = vrot.slane %v3274_v0, 1  ;;  %v3305_v6 = vrot.slane %v3297_v38, 2  ;;  %v3311_v18 = vadd.f32 %v3303_v52, %v3287_v43  ;;  %v9303_v43 = vld [vmem:[#allocation46_spill] sm:$0xff]  ;;  %v9304_v23 = vld [vmem:[#allocation45_spill] sm:$0xff] }
 0x414   : > { %v3265_v42 = vadd.f32 %v3261_v44, %v3253_v14  ;;  %v3312_v56 = vadd.f32 %v3304_v61, %v3288_v29  ;;  %v3340_v20 = vrot.slane %v3332_v31, 1  ;;  %v3356_v19 = vmul.f32 %v8142_v51, %v8307_v58 }
 0x415   : > { %v3254_v4 = vadd.f32 %v3246_v9, %v3230_v15  ;;  %v3306_v24 = vrot.slane %v3298_v57, 2  ;;  %v3323_v25 = vadd.f32 %v8155_v2, %v3311_v18  ;;  %v3379_v7 = vmul.f32 %v8161_v37, %v8309_v54 }
 0x416   : > { %v3289_v39 = vadd.f32 %v3281_v5, %v3265_v42  ;;  %v3324_v13 = vadd.f32 %v3320_v21, %v3312_v56  ;;  %v3364_v50 = vrot.slane %v3356_v19, 2  ;;  %v3391_v59 = vmul.f32 %v8185_v11, %v8309_v54  ;;  %v9305_v42 = vld [vmem:[#allocation48_spill] sm:$0xff] }
 0x417   : > { %v3266_v36 = vadd.f32 %v3262_v17, %v3254_v4  ;;  %v9299_v44 = vrot.slane %v8158_v12, 1  ;;  %v3392_v51 = vmul.f32 %v8185_v11, %v8322_v48  ;;  %v3415_v9 = vmul.f32 %v8214_v28, %v8309_v54  ;;  %v9309_v19 = vld [vmem:[#allocation36_spill] sm:$0xff] }
 0x418   : > { %v3313_v27 = vadd.f32 %v3305_v6, %v3289_v39  ;;  %v3348_v55 = vadd.f32 %v3340_v20, %v3324_v13  ;;  %v3380_v8 = vmul.f32 %v8161_v37, %v8322_v48  ;;  %v3416_v53 = vmul.f32 %v8214_v28, %v8322_v48  ;;  %v9307_v6 = vld [vmem:[#allocation44_spill] sm:$0xff] }
 0x419   : > { %v3347_v22 = vadd.f32 %v9299_v44, %v3323_v25  ;;  %v3290_v45 = vadd.f32 %v3282_v41, %v3266_v36  ;;  %v9300_v3 = vrot.slane %v8179_v40, 2  ;;  %v3399_v26 = vrot.slane %v3391_v59, 1  ;;  %v2944_v41 = vld [vmem:[#allocation2 + $0xb0] sm:$0x3f] }
 0x41a   : > { %v3325_v2 = vadd.f32 %v8164_v46, %v3313_v27  ;;  %v3453_v11 = vmul.f32 %v8238_v33, %v8135_v35  ;;  %v9301_v17 = vrot.slane %v8171_v34, 1  ;;  %v3372_v49 = vadd.f32 %v3364_v50, %v3348_v55  ;;  %v9312_v44 = vld [vmem:[#allocation32_spill] sm:$0xff] }
 0x41b   : > { %v3371_v12 = vadd.f32 %v9300_v3, %v3347_v22  ;;  %v3400_v46 = vrot.slane %v3392_v51, 1  ;;  %v3425_v1 = vrot.slane %v8235_v60, 2  ;;  %v3314_v63 = vadd.f32 %v3306_v24, %v3290_v45  ;;  %v9311_v24 = vld [vmem:[#allocation51_spill] sm:$0xff] }
 0x41c   : > { %v3349_v54 = vadd.f32 %v9301_v17, %v3325_v2  ;;  %v3423_v0 = vrot.slane %v3415_v9, 2  ;;  %v3451_v28 = vmul.f32 %v8238_v33, %v8307_v58  ;;  %v9302_v40 = vrot.slane %v8182_v10, 2  ;;  %v9313_v51 = vld [vmem:[#allocation55_spill] sm:$0xff] }
 0x41d   : > { %v3383_v37 = vadd.f32 %v3379_v7, %v3371_v12  ;;  %v3384_v47 = vadd.f32 %v3380_v8, %v3372_v49  ;;  %v3424_v16 = vrot.slane %v3416_v53, 2  ;;  %v3452_v14 = vmul.f32 %v8238_v33, %v8353_v32 }
 0x41e   : > { %v3373_v48 = vadd.f32 %v9302_v40, %v3349_v54  ;;  %v3326_v34 = vadd.f32 %v8168_v62, %v3314_v63  ;;  %v3439_v60 = vmul.f32 %v8230_v30, %v8307_v58  ;;  %v3475_v29 = vmul.f32 %v9303_v43, %v8307_v58 }
 0x41f   : > { %v3407_v5 = vadd.f32 %v3399_v26, %v3383_v37  ;;  %v3408_v57 = vadd.f32 %v3400_v46, %v3384_v47  ;;  %v3440_v10 = vmul.f32 %v8230_v30, %v8353_v32  ;;  %v3476_v52 = vmul.f32 %v9303_v43, %v8353_v32 }
 0x420   : > { %v3385_v38 = vadd.f32 %v9304_v23, %v3373_v48  ;;  %v9306_v61 = vrot.slane %v9305_v42, 1  ;;  %v3441_v31 = vmul.f32 %v8230_v30, %v8135_v35  ;;  %v3459_v15 = vrot.slane %v3451_v28, 1  ;;  %v9317_v42 = vld [vmem:[#allocation11_spill] sm:$0xff] }
 0x421   : > { %v3431_v62 = vadd.f32 %v3423_v0, %v3407_v5  ;;  %v9308_v58 = vrot.slane %v9307_v6, 1  ;;  %v3432_v39 = vadd.f32 %v3424_v16, %v3408_v57  ;;  %v3460_v56 = vrot.slane %v3452_v14, 1  ;;  %v9315_v57 = vld [vmem:[#allocation43_spill] sm:$0xff] }
 0x422   : > { %v3350_v21 = vadd.f32 %v9306_v61, %v3326_v34  ;;  %v3477_v20 = vmul.f32 %v9303_v43, %v8135_v35  ;;  %v9310_v4 = vrot.slane %v9309_v19, 2  ;;  %v3402_v25 = vrot.slane %v9311_v24, 1  ;;  %v9318_v61 = vld [vmem:[#allocation12_spill] sm:$0xff]  ;;  %v9322_v19 = vld [vmem:[#allocation47_spill] sm:$0xff] }
 0x423   : > { %v3409_v18 = vadd.f32 %v9308_v58, %v3385_v38  ;;  %v3443_v7 = vadd.f32 %v3439_v60, %v3431_v62  ;;  %v3483_v27 = vrot.slane %v3475_v29, 2  ;;  %v3444_v50 = vadd.f32 %v3440_v10, %v3432_v39  ;;  %v9314_v60 = vld [vmem:[#allocation24_spill] sm:$0xff] }
 0x424   : > { %v3374_v32 = vadd.f32 %v9310_v4, %v3350_v21  ;;  %v3461_v59 = vrot.slane %v3453_v11, 1  ;;  %v3484_v36 = vrot.slane %v3476_v52, 2  ;;  %v3426_v9 = vrot.slane %v9313_v51, 2  ;;  %v9316_v52 = vld [vmem:[#allocation10_spill] sm:$0xff]  ;;  %v9319_v21 = vld [vmem:[#allocation13_spill] sm:$0xff] }
 0x425   : > { %v3433_v13 = vadd.f32 %v3425_v1, %v3409_v18  ;;  %v3454_v2 = vmul.f32 %v8238_v33, %v2944_v41  ;;  %v3467_v55 = vadd.f32 %v3459_v15, %v3443_v7  ;;  %v3468_v35 = vadd.f32 %v3460_v56, %v3444_v50  ;;  %v5195_v18 = vld [vmem:[%s8944_s3 + $0x1] ss:$0 sm:$0xff]  ;;  %v9321_v56 = vld [vmem:[#allocation41_spill] sm:$0xff] }
 0x426   : > { %v3386_v22 = vadd.f32 %v9312_v44, %v3374_v32  ;;  %v3485_v53 = vrot.slane %v3477_v20, 2  ;;  %v3442_v3 = vmul.f32 %v8230_v30, %v2944_v41  ;;  %v3478_v12 = vmul.f32 %v9303_v43, %v2944_v41  ;;  %v5196_v32 = vld [vmem:[%s8945_s4 + $0x1] ss:$0 sm:$0xff]  ;;  %v9328_v51 = vld [vmem:[#allocation25_spill] sm:$0xff] }
 0x427   : > { %v3445_v8 = vadd.f32 %v3441_v31, %v3433_v13  ;;  %v3491_v26 = vadd.f32 %v3483_v27, %v3467_v55  ;;  %v3492_v54 = vadd.f32 %v3484_v36, %v3468_v35  ;;  %v3462_v49 = vrot.slane %v3454_v2, 1  ;;  %v9325_v36 = vld [vmem:[#allocation26_spill] sm:$0xff] }
 0x428   : > { %v3410_v45 = vadd.f32 %v3402_v25, %v3386_v22  ;;  %v3486_v0 = vrot.slane %v3478_v12, 2  ;;  %v9320_v62 = vmov 0.0|0.0   ;;  %v9326_v44 = vmov 0.0   ;;  %v9327_v22 = vld [vmem:[#allocation28_spill] sm:$0xff]  ;;  %v9330_v2 = vld [vmem:[#allocation22_spill] sm:$0xff] }
 0x429   : > { %v3469_v17 = vadd.f32 %v3461_v59, %v3445_v8  ;;  %v3499_v46 = vrot.slane %v3491_v26, 1  ;;  %v3500_v63 = vrot.slane %v3492_v54, 1 }
 0x42a   : > { %v3434_v11 = vadd.f32 %v3426_v9, %v3410_v45  ;;  %v9329_v9 = vld [vmem:[#allocation27_spill] sm:$0xff] }
 0x42b   : > { %v3493_v1 = vadd.f32 %v3485_v53, %v3469_v17  ;;  %v3507_v40 = vsel %vm1574_vm7, %v3491_v26, %v3499_v46  ;;  %v3508_v48 = vsel %vm1574_vm7, %v3492_v54, %v3500_v63 }
 0x42c   : > { %v3446_v37 = vadd.f32 %v3442_v3, %v3434_v11  ;;  %v3515_v30 = vcombine.low %v3507_v40, %v3508_v48 }
 0x42d   : > { %v3501_v28 = vrot.slane %v3493_v1, 1 }
 0x42e   : > { %v3470_v33 = vadd.f32 %v3462_v49, %v3446_v37  ;;  %v3523_v43 = vrot.slane %v3515_v30, %v9314_v60 }
 0x42f   : > { %v3509_v14 = vsel %vm1574_vm7, %v3493_v1, %v3501_v28 }
 0x430   : > { %v3494_v47 = vadd.f32 %v3486_v0, %v3470_v33  ;;  %v3998_v0 = vpop.permute.xlu1 %3997 }
 0x432   : > { %v3502_v16 = vrot.slane %v3494_v47, 1 }
 0x434   : > { %v3510_v34 = vsel %vm1574_vm7, %v3494_v47, %v3502_v16  ;;  %v4000_v33 = vpop.permute.xlu1 %3999 }
 0x435   : > { %v3516_v5 = vcombine.low %v3509_v14, %v3510_v34 }
 0x437   : > { %v3530_v29 = vrot.slane %v3516_v5, %v9314_v60 }
 0x438   : > { %v4002_v40 = vpop.permute.xlu1 %4001 }
 0x439   : > { %v3531_v23 = vcombine.low %v3523_v43, %v3530_v29 }
 0x43b   : > { %v3532_v38 = vrot.slane %v3531_v23, 7 }
 0x43c   : > { %v4282_v16 = vpop.permute.xlu1 %4281 }
 0x43d   : > { %v3534_v10 = vsel %vm1574_vm7, %v9315_v57, %v3532_v38 }
 0x43e   : > { %5661 = vmatprep.mubr.msk.f32.mxu1 %vm396_vm2, %v3534_v10 }
 0x43f   : > { %5662 = vmatmul.mubr.msk.f32.vlgmr.msra.gmra.mrb[22].mxu1 %vm396_vm2, %v3532_v38 }
 0x440   : > { %5977 = vmatpush3.bf16.msra.mxu1 %v9316_v52  ;;  %v4286_v34 = vpop.permute.xlu1 %4285 }
 0x441   : > { %5979 = vmatprep.subr.bf16.mxu1 %v9317_v42 }
 0x444   : > { %5981 = vmatpush3.bf16.msra.mxu1 %v9317_v42  ;;  %v4288_v5 = vpop.permute.xlu1 %4287 }
 0x445   : > { %5983 = vmatprep.subr.bf16.mxu1 %v9318_v61 }
 0x448   : > { %5985 = vmatpush3.bf16.msra.mxu1 %v9318_v61  ;;  %v4567_v43 = vpop.permute.xlu1 %4566 }
 0x449   : > { %5987 = vmatprep.subr.bf16.mxu1 %v9319_v21 }
 0x44c   : > { %5989 = vmatpush3.bf16.msra.mxu1 %v9319_v21  ;;  %v4571_v23 = vpop.permute.xlu1 %4570 }
 0x44d   : > { %6034 = vmatprep.subr.bf16.mxu1 %v9320_v62 }
 0x450   : > { %v4575_v57 = vpop.permute.xlu1 %4574 }
 0x4b1   : > { %v5613_v31 = vpop.f32.mrb[20].mxu1 }
 0x4b2   : > { %v2755_v15 = vadd.f32 1e-05, %v5613_v31  ;;  %v2749_v41 = vpop.f32.mrb[21].mxu1 }
 0x4b3   : > { %v2750_v6 = vadd.f32 1e-05, %v2749_v41 }
 0x4b4   : > { %6129 = vrsqrt.f32 %v2755_v15 }
 0x4b5   : > { %6131 = vrsqrt.f32 %v2750_v6 }
 0x4be   : > { %v6130_v58 = vpop.eup %6129 }
 0x4bf   : > { %v6132_v39 = vpop.eup %6131  ;;  %v2761_v20 = vmul.f32 %v6130_v58, %v9321_v56 }
 0x4c0   : > { %v2760_v4 = vmul.f32 %v6132_v39, %v9322_v19 }
 0x4c1   : > { %v2769_v24 = vmul.f32 %v5195_v18, %v2761_v20 }
 0x4c2   : > { %v2768_v25 = vmul.f32 %v5195_v18, %v2760_v4 }
 0x4c3   : > { %v2775_v7 = vadd.f32 %v5196_v32, %v2769_v24 }
 0x4c4   : > { %v2774_v27 = vadd.f32 %v5196_v32, %v2768_v25  ;;  %v5216_v25 = vld [vmem:[%s8944_s3 + $0x2] ss:$0 sm:$0xff] }
 0x4c6   : > { %v6089_v50 = vpack.i.bf16 %v2775_v7, %v2774_v27  ;;  %v5991_v59 = vpack.c.bf16 %v2775_v7, %v2774_v27 }
 0x4c8   : > { %6090 = vrot.lane.b32.xlu0 %v6089_v50, %s6331_s19  ;;  %5993 = vmatpush3.bf16.xpose.msk.msra.mxu0 %vm8464_vm9, %v5991_v59 }
 0x4c9   : > { %5998 = vmatprep.subr.bf16.mxu0 %v9320_v62 }
 0x4cc   : > { %3995 = vrot.lane.b32.xlu0 %v9325_v36, %s6331_s19 }
 0x4cf   : > { %5688 = vmatmul.mubr.msk.f32.vlgmr.msra.gmra.mrb[32].mxu0 %vm3718_vm8, %v9325_v36 }
 0x4d0   : > { %6095 = vrot.lane.b32.xlu0 %v6089_v50, %s6332_s9  ;;  %5690 = vmatprep.mubr.msk.f32.mxu0 %vm6328_vm0, %v9326_v44 }
 0x4d3   : > { %5691 = vmatmul.mubr.msk.f32.gmra.mrb[34].mxu0 %vm3718_vm8, %v9327_v22 }
 0x4d4   : > { %4003 = vrot.lane.b32.xlu0 %v9328_v51, %s6331_s19  ;;  %5693 = vmatprep.mubr.msk.f32.mxu0 %vm6328_vm0, %v9326_v44 }
 0x4d7   : > { %5694 = vmatmul.mubr.msk.f32.gmra.mrb[36].mxu0 %vm3718_vm8, %v9329_v9 }
 0x4d8   : > { %4283 = vrot.lane.b32.xlu0 %v9327_v22, %s6332_s9  ;;  %5725 = vmatprep.mubr.msk.f32.mxu0 %vm6328_vm0, %v9326_v44 }
 0x4dc   : > { %6100 = vrot.lane.b32.xlu0 %v6089_v50, %s6333_s21 }
 0x4e0   : > { %4289 = vrot.lane.b32.xlu0 %v9328_v51, %s6332_s9 }
 0x4e4   : > { %4568 = vrot.lane.b32.xlu0 %v9327_v22, %s6333_s21 }
 0x4e8   : > { %4572 = vrot.lane.b32.xlu0 %v9330_v2, %s6333_s21 }
 0x512   : > { %v5663_v55 = vpop.f32.mrb[22].mxu1 }
 0x513   : > { %v8498_v8 = vsub.f32 %v3532_v38, %v5663_v55  ;;  %v3606_v35 = vpop.f32.mrb[23].mxu1 }
 0x514   : > { %v8500_v53 = vsub.f32 %v3534_v10, %v3606_v35 }
 0x515   : > { %v3618_v3 = vmul.f32 %v8498_v8, %v8498_v8 }
 0x516   : > { %v3617_v45 = vmul.f32 %v8500_v53, %v8500_v53 }
 0x518   : > { %5680 = vmatprep.mubr.msk.f32.mxu1 %vm396_vm2, %v3617_v45 }
 0x519   : > { %5681 = vmatmul.mubr.msk.f32.vlgmr.msra.gmra.mrb[24].mxu1 %vm396_vm2, %v3618_v3 }
 0x51a   : > { %6035 = vmatpush3.bf16.xpose.msk.msra.mxu1 %vm8464_vm9, %v5991_v59  ;;  %5696 = vmatprep.mubr.msk.f32.mxu1 %vm6328_vm0, %v9326_v44  ;;  %v5217_v59 = vld [vmem:[%s8945_s4 + $0x2] ss:$0 sm:$0xff] }
 0x51b   : > { %5994 = vmatprep.subr.bf16.mxu1 %v9320_v62 }
 0x521   : > { %5697 = vmatmul.mubr.msk.f32.vlgmr.msra.gmra.mrb[26].mxu1 %vm3718_vm8, %v9330_v2 }
 0x522   : > { %5699 = vmatprep.mubr.msk.f32.mxu1 %vm6328_vm0, %v9326_v44 }
 0x525   : > { %5700 = vmatmul.mubr.msk.f32.gmra.mrb[28].mxu1 %vm3718_vm8, %v9328_v51 }
 0x526   : > { %5706 = vmatprep.mubr.msk.f32.mxu1 %vm6328_vm0, %v9326_v44 }
 0x53a   : > { %v6091_v12 = vpop.permute.xlu0 %6090 }
 0x53b   : > { %v6093_v26 = vunpack.i.h.bf16 %v6091_v12  ;;  %v6092_v17 = vunpack.i.l.bf16 %v6091_v12 }
 0x53d   : > { %v5999_v54 = vpack.c.bf16 %v6093_v26, %v6092_v17 }
 0x53e   : > { %v3996_v11 = vpop.permute.xlu0 %3995 }
 0x53f   : > { %6001 = vmatpush3.bf16.xpose.msk.msra.mxu0 %vm8464_vm9, %v5999_v54 }
 0x540   : > { %6006 = vmatprep.subr.bf16.mxu0 %v9320_v62 }
 0x542   : > { %v6096_v49 = vpop.permute.xlu0 %6095 }
 0x543   : > { %v6098_v46 = vunpack.i.h.bf16 %v6096_v49  ;;  %v6097_v1 = vunpack.i.l.bf16 %v6096_v49 }
 0x545   : > { %v6007_v63 = vpack.c.bf16 %v6098_v46, %v6097_v1 }
 0x546   : > { %v4004_v37 = vpop.permute.xlu0 %4003  ;;  %5726 = vmatmul.mubr.msk.f32.vlgmr.msra.gmra.mrb[38].mxu0 %vm3718_vm8, %v3996_v11 }
 0x547   : > { %6009 = vmatpush3.bf16.xpose.msk.msra.mxu0 %vm8464_vm9, %v6007_v63  ;;  %5728 = vmatprep.mubr.msk.f32.mxu0 %vm6328_vm0, %v9326_v44 }
 0x548   : > { %6014 = vmatprep.subr.bf16.mxu0 %v9320_v62 }
 0x54a   : > { %5729 = vmatmul.mubr.msk.f32.gmra.mrb[40].mxu0 %vm3718_vm8, %v3998_v0  ;;  %v4284_v28 = vpop.permute.xlu0 %4283 }
 0x54b   : > { %5731 = vmatprep.mubr.msk.f32.mxu0 %vm6328_vm0, %v9326_v44 }
 0x54e   : > { %5732 = vmatmul.mubr.msk.f32.gmra.mrb[42].mxu0 %vm3718_vm8, %v4000_v33  ;;  %v6101_v48 = vpop.permute.xlu0 %6100 }
 0x54f   : > { %5734 = vmatprep.mubr.msk.f32.mxu0 %vm6328_vm0, %v9326_v44  ;;  %v6103_v47 = vunpack.i.h.bf16 %v6101_v48  ;;  %v6102_v30 = vunpack.i.l.bf16 %v6101_v48 }
 0x551   : > { %v6015_v14 = vpack.c.bf16 %v6103_v47, %v6102_v30 }
 0x552   : > { %5735 = vmatmul.mubr.msk.f32.gmra.mrb[44].mxu0 %vm3718_vm8, %v4002_v40  ;;  %v4290_v60 = vpop.permute.xlu0 %4289 }
 0x553   : > { %5737 = vmatprep.mubr.msk.f32.mxu0 %vm6328_vm0, %v9326_v44 }
 0x556   : > { %5738 = vmatmul.mubr.msk.f32.gmra.mrb[46].mxu0 %vm3718_vm8, %v4004_v37  ;;  %v4569_v29 = vpop.permute.xlu0 %4568 }
 0x557   : > { %5763 = vmatprep.mubr.msk.f32.mxu0 %vm6328_vm0, %v9326_v44 }
 0x55a   : > { %5764 = vmatmul.mubr.msk.f32.vlgmr.msra.gmra.mrb[48].mxu0 %vm3718_vm8, %v4282_v16  ;;  %v4573_v38 = vpop.permute.xlu0 %4572 }
 0x55b   : > { %6017 = vmatpush3.bf16.xpose.msk.msra.mxu0 %vm8464_vm9, %v6015_v14  ;;  %5766 = vmatprep.mubr.msk.f32.mxu0 %vm6328_vm0, %v9326_v44 }
 0x55c   : > { %6022 = vmatprep.subr.bf16.mxu0 %v9320_v62 }
 0x55e   : > { %5767 = vmatmul.mubr.msk.f32.gmra.mrb[50].mxu0 %vm3718_vm8, %v4284_v28 }
 0x55f   : > { %5769 = vmatprep.mubr.msk.f32.mxu0 %vm6328_vm0, %v9326_v44 }
 0x562   : > { %5770 = vmatmul.mubr.msk.f32.gmra.mrb[52].mxu0 %vm3718_vm8, %v4286_v34 }
 0x563   : > { %5772 = vmatprep.mubr.msk.f32.mxu0 %vm6328_vm0, %v9326_v44 }
 0x566   : > { %5773 = vmatmul.mubr.msk.f32.gmra.mrb[54].mxu0 %vm3718_vm8, %v4288_v5 }
 0x567   : > { %5775 = vmatprep.mubr.msk.f32.mxu0 %vm6328_vm0, %v9326_v44 }
 0x56a   : > { %5776 = vmatmul.mubr.msk.f32.gmra.mrb[56].mxu0 %vm3718_vm8, %v4290_v60 }
 0x56b   : > { %5801 = vmatprep.mubr.msk.f32.mxu0 %vm6328_vm0, %v9326_v44 }
 0x56e   : > { %5802 = vmatmul.mubr.msk.f32.vlgmr.msra.gmra.mrb[58].mxu0 %vm3718_vm8, %v4567_v43 }
 0x56f   : > { %5804 = vmatprep.mubr.msk.f32.mxu0 %vm6328_vm0, %v9326_v44 }
 0x572   : > { %5805 = vmatmul.mubr.msk.f32.gmra.mrb[60].mxu0 %vm3718_vm8, %v4569_v29 }
 0x573   : > { %5807 = vmatprep.mubr.msk.f32.mxu0 %vm6328_vm0, %v9326_v44 }
 0x576   : > { %5808 = vmatmul.mubr.msk.f32.gmra.mrb[62].mxu0 %vm3718_vm8, %v4571_v23 }
 0x577   : > { %5810 = vmatprep.mubr.msk.f32.mxu0 %vm6328_vm0, %v9326_v44 }
 0x57a   : > { %5811 = vmatmul.mubr.msk.f32.gmra.mrb[64].mxu0 %vm3718_vm8, %v4573_v38 }
 0x57b   : > { %5813 = vmatprep.mubr.msk.f32.mxu0 %vm6328_vm0, %v9326_v44 }
 0x57e   : > { %5814 = vmatmul.mubr.msk.f32.gmra.mrb[66].mxu0 %vm3718_vm8, %v4575_v57 }
 0x57f   : > { %5851 = vmatprep.mubr.msk.f32.mxu0 %vm6328_vm0, %v9326_v44 }
 0x5a2   : > { %v8575_v10 = vpop.f32.mrb[32].mxu0 }
 0x5a3   : > { %v5689_v52 = vpop.f32.mrb[33].mxu0  ;;  %v3831_v42 = vsel %vm3830_vm10, %v8575_v10, -inf }
 0x5a4   : > { %3832 = vmax.xlane.f32.xlu0 %v3831_v42 }
 0x5a6   : > { %v8579_v61 = vpop.f32.mrb[34].mxu0 }
 0x5a7   : > { %v5692_v21 = vpop.f32.mrb[35].mxu0  ;;  %v3834_v31 = vsel %vm3830_vm10, %v8579_v61, -inf }
 0x5a8   : > { %3835 = vmax.xlane.f32.xlu1 %v3834_v31 }
 0x5aa   : > { %v8583_v15 = vpop.f32.mrb[36].mxu0 }
 0x5ab   : > { %v5695_v41 = vpop.f32.mrb[37].mxu0  ;;  %v3837_v6 = vsel %vm3830_vm10, %v8583_v15, -inf }
 0x5ac   : > { %3838 = vmax.xlane.f32.xlu0 %v3837_v6 }
 0x5ec   : > { %v5682_v58 = vpop.f32.mrb[24].mxu1 }
 0x5ed   : > { %v3697_v18 = vadd.f32 1e-05, %v5682_v58  ;;  %v3691_v39 = vpop.f32.mrb[25].mxu1 }
 0x5ee   : > { %v3692_v56 = vadd.f32 1e-05, %v3691_v39 }
 0x5ef   : > { %6133 = vrsqrt.f32 %v3697_v18 }
 0x5f0   : > { %6135 = vrsqrt.f32 %v3692_v56 }
 0x5f4   : > { %v8587_v20 = vpop.f32.mrb[26].mxu1 }
 0x5f5   : > { %v5698_v19 = vpop.f32.mrb[27].mxu1  ;;  %v3840_v4 = vsel %vm3830_vm10, %v8587_v20, -inf }
 0x5f6   : > { %3841 = vmax.xlane.f32.xlu0 %v3840_v4 }
 0x5f8   : > { %v8591_v32 = vpop.f32.mrb[28].mxu1 }
 0x5f9   : > { %v6134_v24 = vpop.eup %6133  ;;  %v5701_v7 = vpop.f32.mrb[29].mxu1  ;;  %v3844_v27 = vsel %vm3843_vm11, %v8591_v32, -inf }
 0x5fa   : > { %v6136_v13 = vpop.eup %6135  ;;  %v3703_v50 = vmul.f32 %v6134_v24, %v8498_v8  ;;  %3845 = vmax.xlane.f32.xlu1 %v3844_v27 }
 0x5fb   : > { %v3702_v55 = vmul.f32 %v6136_v13, %v8500_v53 }
 0x5fc   : > { %v3711_v35 = vmul.f32 %v5216_v25, %v3703_v50 }
 0x5fd   : > { %v3710_v45 = vmul.f32 %v5216_v25, %v3702_v55 }
 0x5fe   : > { %v3717_v3 = vadd.f32 %v5217_v59, %v3711_v35 }
 0x5ff   : > { %v3716_v12 = vadd.f32 %v5217_v59, %v3710_v45 }
 0x601   : > { %v5995_v17 = vpack.c.bf16 %v3717_v3, %v3716_v12  ;;  %v8608_v54 = vpack.i.bf16 %v3717_v3, %v3716_v12 }
 0x603   : > { %5997 = vmatpush3.bf16.msk.msra.mxu1 %vm8604_vm13, %v5995_v17 }
 0x604   : > { %6002 = vmatprep.subr.bf16.mxu1 %v9320_v62 }
 0x619   : > { %v8613_v8 = vpop.f32.mrb[38].mxu0 }
 0x61a   : > { %v5727_v53 = vpop.f32.mrb[39].mxu0  ;;  %v4113_v11 = vsel %vm3830_vm10, %v8613_v8, -inf }
 0x61b   : > { %4114 = vmax.xlane.f32.xlu0 %v4113_v11 }
 0x61d   : > { %v8617_v49 = vpop.f32.mrb[40].mxu0 }
 0x61e   : > { %v5730_v46 = vpop.f32.mrb[41].mxu0  ;;  %v4116_v1 = vsel %vm3830_vm10, %v8617_v49, -inf }
 0x61f   : > { %4117 = vmax.xlane.f32.xlu1 %v4116_v1 }
 0x621   : > { %v8621_v63 = vpop.f32.mrb[42].mxu0 }
 0x622   : > { %v5733_v37 = vpop.f32.mrb[43].mxu0  ;;  %v4119_v0 = vsel %vm3830_vm10, %v8621_v63, -inf }
 0x623   : > { %4120 = vmax.xlane.f32.xlu0 %v4119_v0 }
 0x625   : > { %v8625_v33 = vpop.f32.mrb[44].mxu0 }
 0x626   : > { %v5736_v28 = vpop.f32.mrb[45].mxu0  ;;  %v4122_v40 = vsel %vm3830_vm10, %v8625_v33, -inf }
 0x627   : > { %4123 = vmax.xlane.f32.xlu1 %v4122_v40 }
 0x629   : > { %v8629_v48 = vpop.f32.mrb[46].mxu0 }
 0x62a   : > { %v5739_v47 = vpop.f32.mrb[47].mxu0  ;;  %v4125_v30 = vsel %vm3843_vm11, %v8629_v48, -inf }
 0x62b   : > { %4126 = vmax.xlane.f32.xlu0 %v4125_v30 }
 0x62d   : > { %v8633_v16 = vpop.f32.mrb[48].mxu0 }
 0x62e   : > { %v5765_v14 = vpop.f32.mrb[49].mxu0  ;;  %v4399_v34 = vsel %vm3830_vm10, %v8633_v16, -inf }
 0x62f   : > { %4400 = vmax.xlane.f32.xlu1 %v4399_v34 }
 0x631   : > { %v3833_v5 = vpop.xlane.xlu0 %3832  ;;  %v8637_v60 = vpop.f32.mrb[50].mxu0 }
 0x632   : > { %v3847_v43 = vsub.f32 %v8575_v10, %v3833_v5  ;;  %v5768_v29 = vpop.f32.mrb[51].mxu0  ;;  %v4402_v23 = vsel %vm3830_vm10, %v8637_v60, -inf }
 0x633   : > { %4403 = vmax.xlane.f32.xlu0 %v4402_v23 }
 0x634   : > { %v3852_v38 = vmul.f32 1.442695, %v3847_v43 }
 0x635   : > { %v3836_v57 = vpop.xlane.xlu1 %3835  ;;  %v8642_v52 = vpop.f32.mrb[52].mxu0 }
 0x636   : > { %6137 = vpow2.f32 %v3852_v38  ;;  %v3848_v42 = vsub.f32 %v8579_v61, %v3836_v57  ;;  %v5771_v21 = vpop.f32.mrb[53].mxu0  ;;  %v4405_v31 = vsel %vm3830_vm10, %v8642_v52, -inf }
 0x637   : > { %4406 = vmax.xlane.f32.xlu1 %v4405_v31 }
 0x638   : > { %v3854_v41 = vmul.f32 1.442695, %v3848_v42 }
 0x639   : > { %v3839_v6 = vpop.xlane.xlu0 %3838  ;;  %v8647_v10 = vpop.f32.mrb[54].mxu0 }
 0x63a   : > { %6139 = vpow2.f32 %v3854_v41  ;;  %v3849_v58 = vsub.f32 %v8583_v15, %v3839_v6  ;;  %v5774_v18 = vpop.f32.mrb[55].mxu0  ;;  %v4408_v39 = vsel %vm3830_vm10, %v8647_v10, -inf }
 0x63b   : > { %4409 = vmax.xlane.f32.xlu0 %v4408_v39 }
 0x63c   : > { %v3856_v56 = vmul.f32 1.442695, %v3849_v58 }
 0x63d   : > { %v8652_v19 = vpop.f32.mrb[56].mxu0 }
 0x63e   : > { %6141 = vpow2.f32 %v3856_v56  ;;  %v5777_v61 = vpop.f32.mrb[57].mxu0  ;;  %v4411_v4 = vsel %vm3843_vm11, %v8652_v19, -inf }
 0x63f   : > { %4412 = vmax.xlane.f32.xlu1 %v4411_v4 }
 0x640   : > { %v8656_v24 = vpop.eup %6137 }
 0x641   : > { %v8658_v25 = vpop.f32.mrb[58].mxu0  ;;  %v3862_v15 = vsel %vm3830_vm10, %v8656_v24, 0.0 }
 0x642   : > { %v5803_v7 = vpop.f32.mrb[59].mxu0  ;;  %v4684_v27 = vsel %vm3830_vm10, %v8658_v25, -inf }
 0x643   : > { %3863 = vadd.xlane.f32.xlu1 %v3862_v15  ;;  %4685 = vmax.xlane.f32.xlu0 %v4684_v27 }
 0x644   : > { %v8664_v13 = vpop.eup %6139 }
 0x645   : > { %v8666_v50 = vpop.f32.mrb[60].mxu0  ;;  %v3865_v59 = vsel %vm3830_vm10, %v8664_v13, 0.0 }
 0x646   : > { %v5806_v55 = vpop.f32.mrb[61].mxu0  ;;  %v4687_v35 = vsel %vm3830_vm10, %v8666_v50, -inf }
 0x647   : > { %3866 = vadd.xlane.f32.xlu0 %v3865_v59  ;;  %4688 = vmax.xlane.f32.xlu1 %v4687_v35 }
 0x648   : > { %v8672_v45 = vpop.eup %6141 }
 0x649   : > { %v8674_v3 = vpop.f32.mrb[62].mxu0  ;;  %v3868_v12 = vsel %vm3830_vm10, %v8672_v45, 0.0 }
 0x64a   : > { %v5809_v17 = vpop.f32.mrb[63].mxu0  ;;  %v4690_v53 = vsel %vm3830_vm10, %v8674_v3, -inf }
 0x64b   : > { %3869 = vadd.xlane.f32.xlu1 %v3868_v12  ;;  %4691 = vmax.xlane.f32.xlu0 %v4690_v53 }
 0x64d   : > { %v8680_v11 = vpop.f32.mrb[64].mxu0 }
 0x64e   : > { %v5812_v46 = vpop.f32.mrb[65].mxu0  ;;  %v4693_v1 = vsel %vm3830_vm10, %v8680_v11, -inf }
 0x64f   : > { %4694 = vmax.xlane.f32.xlu1 %v4693_v1 }
 0x651   : > { %v8684_v37 = vpop.f32.mrb[66].mxu0 }
 0x652   : > { %v5815_v0 = vpop.f32.mrb[67].mxu0  ;;  %v4696_v28 = vsel %vm3843_vm11, %v8684_v37, -inf }
 0x653   : > { %4697 = vmax.xlane.f32.xlu0 %v4696_v28 }
 0x683   : > { %v3842_v40 = vpop.xlane.xlu0 %3841 }
 0x684   : > { %v3850_v47 = vsub.f32 %v8587_v20, %v3842_v40 }
 0x686   : > { %v3858_v30 = vmul.f32 1.442695, %v3850_v47 }
 0x687   : > { %v3846_v14 = vpop.xlane.xlu1 %3845 }
 0x688   : > { %6143 = vpow2.f32 %v3858_v30  ;;  %v3851_v34 = vsub.f32 %v8591_v32, %v3846_v14 }
 0x68a   : > { %v3860_v5 = vmul.f32 1.442695, %v3851_v34 }
 0x68c   : > { %6145 = vpow2.f32 %v3860_v5 }
 0x692   : > { %v8690_v43 = vpop.eup %6143 }
 0x693   : > { %v3871_v29 = vsel %vm3830_vm10, %v8690_v43, 0.0 }
 0x694   : > { %3872 = vadd.xlane.f32.xlu0 %v3871_v29 }
 0x696   : > { %v8694_v23 = vpop.eup %6145 }
 0x697   : > { %v3874_v38 = vsel %vm3843_vm11, %v8694_v23, 0.0 }
 0x698   : > { %3875 = vadd.xlane.f32.xlu1 %v3874_v38 }
 0x6a8   : > { %v4115_v20 = vpop.xlane.xlu0 %4114 }
 0x6a9   : > { %v4128_v57 = vsub.f32 %v8613_v8, %v4115_v20 }
 0x6ab   : > { %v4133_v42 = vmul.f32 1.442695, %v4128_v57 }
 0x6ac   : > { %v4118_v21 = vpop.xlane.xlu1 %4117 }
 0x6ad   : > { %6147 = vpow2.f32 %v4133_v42  ;;  %v4129_v32 = vsub.f32 %v8617_v49, %v4118_v21 }
 0x6af   : > { %v4135_v31 = vmul.f32 1.442695, %v4129_v32 }
 0x6b0   : > { %v4121_v41 = vpop.xlane.xlu0 %4120 }
 0x6b1   : > { %6149 = vpow2.f32 %v4135_v31  ;;  %v4130_v6 = vsub.f32 %v8621_v63, %v4121_v41 }
 0x6b3   : > { %v4137_v58 = vmul.f32 1.442695, %v4130_v6 }
 0x6b4   : > { %v4124_v18 = vpop.xlane.xlu1 %4123 }
 0x6b5   : > { %6151 = vpow2.f32 %v4137_v58  ;;  %v4131_v39 = vsub.f32 %v8625_v33, %v4124_v18 }
 0x6b7   : > { %v8702_v56 = vpop.eup %6147  ;;  %v4139_v61 = vmul.f32 1.442695, %v4131_v39 }
 0x6b8   : > { %v4127_v4 = vpop.xlane.xlu0 %4126  ;;  %v4143_v8 = vsel %vm3830_vm10, %v8702_v56, 0.0 }
 0x6b9   : > { %6153 = vpow2.f32 %v4139_v61  ;;  %v4132_v49 = vsub.f32 %v8629_v48, %v4127_v4  ;;  %4144 = vadd.xlane.f32.xlu0 %v4143_v8 }
 0x6bb   : > { %v8707_v15 = vpop.eup %6149  ;;  %v4141_v7 = vmul.f32 1.442695, %v4132_v49 }
 0x6bc   : > { %v4401_v63 = vpop.xlane.xlu1 %4400  ;;  %v4146_v27 = vsel %vm3830_vm10, %v8707_v15, 0.0 }
 0x6bd   : > { %6155 = vpow2.f32 %v4141_v7  ;;  %v4414_v33 = vsub.f32 %v8633_v16, %v4401_v63  ;;  %4147 = vadd.xlane.f32.xlu1 %v4146_v27 }
 0x6bf   : > { %v8712_v59 = vpop.eup %6151  ;;  %v4419_v55 = vmul.f32 1.442695, %v4414_v33 }
 0x6c0   : > { %v4404_v35 = vpop.xlane.xlu0 %4403  ;;  %v4149_v12 = vsel %vm3830_vm10, %v8712_v59, 0.0 }
 0x6c1   : > { %6157 = vpow2.f32 %v4419_v55  ;;  %v4415_v48 = vsub.f32 %v8637_v60, %v4404_v35  ;;  %4150 = vadd.xlane.f32.xlu0 %v4149_v12 }
 0x6c3   : > { %v8717_v17 = vpop.eup %6153  ;;  %v4421_v53 = vmul.f32 1.442695, %v4415_v48 }
 0x6c4   : > { %v4407_v46 = vpop.xlane.xlu1 %4406  ;;  %v4152_v1 = vsel %vm3830_vm10, %v8717_v17, 0.0 }
 0x6c5   : > { %6159 = vpow2.f32 %v4421_v53  ;;  %v4416_v16 = vsub.f32 %v8642_v52, %v4407_v46  ;;  %4153 = vadd.xlane.f32.xlu1 %v4152_v1 }
 0x6c7   : > { %v8722_v0 = vpop.eup %6155  ;;  %v4423_v28 = vmul.f32 1.442695, %v4416_v16 }
 0x6c8   : > { %v4410_v40 = vpop.xlane.xlu0 %4409  ;;  %v4155_v47 = vsel %vm3843_vm11, %v8722_v0, 0.0 }
 0x6c9   : > { %6161 = vpow2.f32 %v4423_v28  ;;  %v4417_v60 = vsub.f32 %v8647_v10, %v4410_v40  ;;  %4156 = vadd.xlane.f32.xlu0 %v4155_v47 }
 0x6cb   : > { %v8727_v30 = vpop.eup %6157  ;;  %v4425_v14 = vmul.f32 1.442695, %v4417_v60 }
 0x6cc   : > { %v4413_v34 = vpop.xlane.xlu1 %4412  ;;  %v4429_v5 = vsel %vm3830_vm10, %v8727_v30, 0.0 }
 0x6cd   : > { %6163 = vpow2.f32 %v4425_v14  ;;  %v4418_v52 = vsub.f32 %v8652_v19, %v4413_v34  ;;  %4430 = vadd.xlane.f32.xlu1 %v4429_v5 }
 0x6cf   : > { %v8732_v29 = vpop.eup %6159  ;;  %v4427_v38 = vmul.f32 1.442695, %v4418_v52 }
 0x6d0   : > { %v3864_v20 = vpop.xlane.xlu1 %3863  ;;  %v4686_v57 = vpop.xlane.xlu0 %4685  ;;  %v4432_v10 = vsel %vm3830_vm10, %v8732_v29, 0.0 }
 0x6d1   : > { %6165 = vpow2.f32 %v4427_v38  ;;  %v4699_v42 = vsub.f32 %v8658_v25, %v4686_v57  ;;  %4433 = vadd.xlane.f32.xlu1 %v4432_v10 }
 0x6d2   : > { %6167 = vrcp.f32 %v3864_v20 }
 0x6d3   : > { %v8737_v21 = vpop.eup %6161  ;;  %v4704_v32 = vmul.f32 1.442695, %v4699_v42 }
 0x6d4   : > { %v3867_v31 = vpop.xlane.xlu0 %3866  ;;  %v4689_v41 = vpop.xlane.xlu1 %4688  ;;  %v4435_v19 = vsel %vm3830_vm10, %v8737_v21, 0.0 }
 0x6d5   : > { %6169 = vpow2.f32 %v4704_v32  ;;  %4436 = vadd.xlane.f32.xlu1 %v4435_v19  ;;  %v4700_v33 = vsub.f32 %v8666_v50, %v4689_v41 }
 0x6d6   : > { %6171 = vrcp.f32 %v3867_v31 }
 0x6d7   : > { %v8741_v6 = vpop.eup %6163  ;;  %v4706_v12 = vmul.f32 1.442695, %v4700_v33 }
 0x6d8   : > { %v3870_v58 = vpop.xlane.xlu1 %3869  ;;  %v4438_v18 = vsel %vm3830_vm10, %v8741_v6, 0.0  ;;  %v4692_v55 = vpop.xlane.xlu0 %4691 }
 0x6d9   : > { %4439 = vadd.xlane.f32.xlu1 %v4438_v18  ;;  %6173 = vrcp.f32 %v3870_v58 }
 0x6da   : > { %6175 = vpow2.f32 %v4706_v12 }
 0x6db   : > { %v8745_v25 = vpop.eup %6165 }
 0x6dc   : > { %v6168_v39 = vpop.eup %6167  ;;  %v4441_v61 = vsel %vm3843_vm11, %v8745_v25, 0.0  ;;  %v4695_v35 = vpop.xlane.xlu1 %4694 }
 0x6dd   : > { %v3878_v4 = vmul.f32 %v6168_v39, %v8656_v24  ;;  %4442 = vadd.xlane.f32.xlu1 %v4441_v61 }
 0x6df   : > { %v8750_v8 = vpop.eup %6169  ;;  %5707 = vmatmul.mubr.msk.f32.vlgmr.msra.gmra.mrb[30].mxu1 %vm3830_vm10, %v3878_v4  ;;  %6105 = vrot.lane.b32.xlu0 %v8608_v54, %s6331_s19  ;;  %s6335_s19 = smov 16  }
 0x6e0   : > { %v6172_v49 = vpop.eup %6171  ;;  %5709 = vmatprep.mubr.msk.f32.mxu1 %vm6328_vm0, %v9326_v44  ;;  %v4714_v7 = vsel %vm3830_vm10, %v8750_v8, 0.0  ;;  %v4698_v48 = vpop.xlane.xlu0 %4697 }
 0x6e1   : > { %4715 = vadd.xlane.f32.xlu1 %v4714_v7  ;;  %v3880_v63 = vmul.f32 %v6172_v49, %v8664_v13  ;;  %v4702_v13 = vsub.f32 %v8680_v11, %v4695_v35  ;;  %v4703_v46 = vsub.f32 %v8684_v37, %v4698_v48  ;;  %v4701_v11 = vsub.f32 %v8674_v3, %v4692_v55 }
 0x6e3   : > { %5710 = vmatmul.mubr.msk.f32.gmra.mrb[32].mxu1 %vm3830_vm10, %v3880_v63  ;;  %v6174_v24 = vpop.eup %6173  ;;  %v4710_v53 = vmul.f32 1.442695, %v4702_v13  ;;  %v4708_v40 = vmul.f32 1.442695, %v4701_v11 }
 0x6e4   : > { %5712 = vmatprep.mubr.msk.f32.mxu1 %vm6328_vm0, %v9326_v44  ;;  %v3882_v27 = vmul.f32 %v6174_v24, %v8672_v45  ;;  %v4712_v45 = vmul.f32 1.442695, %v4703_v46  ;;  %v8772_v50 = vpop.eup %6175 }
 0x6e5   : > { %6177 = vpow2.f32 %v4710_v53  ;;  %v4717_v1 = vsel %vm3830_vm10, %v8772_v50, 0.0 }
 0x6e6   : > { %6179 = vpow2.f32 %v4712_v45 }
 0x6e7   : > { %5713 = vmatmul.mubr.msk.f32.gmra.mrb[34].mxu1 %vm3830_vm10, %v3882_v27  ;;  %6181 = vpow2.f32 %v4708_v40 }
 0x6e8   : > { %5715 = vmatprep.mubr.msk.f32.mxu1 %vm6328_vm0, %v9326_v44 }
 0x6ef   : > { %v8776_v16 = vpop.eup %6177 }
 0x6f0   : > { %v4723_v28 = vsel %vm3830_vm10, %v8776_v16, 0.0  ;;  %v8781_v37 = vpop.eup %6179 }
 0x6f1   : > { %v4726_v47 = vsel %vm3843_vm11, %v8781_v37, 0.0  ;;  %v8785_v60 = vpop.eup %6181 }
 0x6f2   : > { %6110 = vrot.lane.b32.xlu1 %v8608_v54, %s6332_s9  ;;  %v4720_v14 = vsel %vm3830_vm10, %v8785_v60, 0.0  ;;  %s6336_s9 = smov 32  }
 0x6fe   : > { %4718 = vadd.xlane.f32.xlu0 %v4717_v1 }
 0x702   : > { %4724 = vadd.xlane.f32.xlu0 %v4723_v28 }
 0x706   : > { %4727 = vadd.xlane.f32.xlu0 %v4726_v47 }
 0x716   : > { %4721 = vadd.xlane.f32.xlu1 %v4720_v14 }
 0x71c   : > { %6115 = vrot.lane.b32.xlu0 %v8608_v54, %s6333_s21  ;;  %s6337_s21 = smov 48  }
 0x721   : > { %v3873_v3 = vpop.xlane.xlu0 %3872 }
 0x722   : > { %6183 = vrcp.f32 %v3873_v3 }
 0x725   : > { %v3876_v34 = vpop.xlane.xlu1 %3875 }
 0x726   : > { %6185 = vrcp.f32 %v3876_v34 }
 0x72c   : > { %v6184_v5 = vpop.eup %6183 }
 0x72d   : > { %v3884_v52 = vmul.f32 %v6184_v5, %v8690_v43 }
 0x72f   : > { %5716 = vmatmul.mubr.msk.f32.gmra.mrb[36].mxu1 %vm3830_vm10, %v3884_v52 }
 0x730   : > { %v6186_v38 = vpop.eup %6185  ;;  %5718 = vmatprep.mubr.msk.f32.mxu1 %vm6328_vm0, %v9326_v44 }
 0x731   : > { %v3886_v20 = vmul.f32 %v6186_v38, %v8694_v23 }
 0x733   : > { %5719 = vmatmul.mubr.msk.f32.gmra.mrb[38].mxu1 %vm3830_vm10, %v3886_v20 }
 0x734   : > { %5744 = vmatprep.mubr.msk.f32.mxu1 %vm6328_vm0, %v9326_v44 }
 0x746   : > { %v4145_v54 = vpop.xlane.xlu0 %4144 }
 0x747   : > { %6187 = vrcp.f32 %v4145_v54 }
 0x74a   : > { %v4148_v57 = vpop.xlane.xlu1 %4147 }
 0x74b   : > { %6189 = vrcp.f32 %v4148_v57 }
 0x74e   : > { %v4151_v10 = vpop.xlane.xlu0 %4150 }
 0x74f   : > { %6191 = vrcp.f32 %v4151_v10 }
 0x751   : > { %v6188_v58 = vpop.eup %6187 }
 0x752   : > { %v4154_v42 = vpop.xlane.xlu1 %4153  ;;  %v4159_v39 = vmul.f32 %v6188_v58, %v8702_v56 }
 0x753   : > { %6193 = vrcp.f32 %v4154_v42 }
 0x755   : > { %v6190_v61 = vpop.eup %6189 }
 0x756   : > { %v4157_v32 = vpop.xlane.xlu0 %4156  ;;  %v4161_v49 = vmul.f32 %v6190_v61, %v8707_v15 }
 0x757   : > { %6195 = vrcp.f32 %v4157_v32 }
 0x759   : > { %v6192_v7 = vpop.eup %6191 }
 0x75a   : > { %v4431_v43 = vpop.xlane.xlu1 %4430  ;;  %v6106_v31 = vpop.permute.xlu0 %6105  ;;  %v4163_v56 = vmul.f32 %v6192_v7, %v8712_v59 }
 0x75b   : > { %v6108_v41 = vunpack.i.h.bf16 %v6106_v31  ;;  %v6107_v19 = vunpack.i.l.bf16 %v6106_v31  ;;  %6197 = vrcp.f32 %v4431_v43 }
 0x75d   : > { %v6003_v18 = vpack.c.bf16 %v6108_v41, %v6107_v19  ;;  %v6194_v24 = vpop.eup %6193 }
 0x75e   : > { %v4434_v23 = vpop.xlane.xlu1 %4433  ;;  %v4165_v33 = vmul.f32 %v6194_v24, %v8717_v17 }
 0x75f   : > { %6005 = vmatpush3.bf16.msk.msra.mxu1 %vm8604_vm13, %v6003_v18  ;;  %6199 = vrcp.f32 %v4434_v23 }
 0x760   : > { %6010 = vmatprep.subr.bf16.mxu1 %v9320_v62 }
 0x761   : > { %v6196_v15 = vpop.eup %6195 }
 0x762   : > { %v4437_v4 = vpop.xlane.xlu1 %4436  ;;  %5745 = vmatmul.mubr.msk.f32.vlgmr.msra.gmra.mrb[40].mxu1 %vm3830_vm10, %v4159_v39  ;;  %v4167_v59 = vmul.f32 %v6196_v15, %v8722_v0  ;;  %v4935_v15 = vld [vmem:[#allocation7 + $0x10] sm:$0xff] }
 0x763   : > { %5747 = vmatprep.mubr.msk.f32.mxu1 %vm6328_vm0, %v9326_v44  ;;  %6201 = vrcp.f32 %v4437_v4 }
 0x765   : > { %v6198_v17 = vpop.eup %6197 }
 0x766   : > { %v4440_v63 = vpop.xlane.xlu1 %4439  ;;  %5748 = vmatmul.mubr.msk.f32.gmra.mrb[42].mxu1 %vm3830_vm10, %v4161_v49  ;;  %v4445_v53 = vmul.f32 %v6198_v17, %v8727_v30  ;;  %v4937_v17 = vld [vmem:[#allocation7 + $0x20] sm:$0xff] }
 0x767   : > { %5750 = vmatprep.mubr.msk.f32.mxu1 %vm6328_vm0, %v9326_v44  ;;  %6203 = vrcp.f32 %v4440_v63 }
 0x769   : > { %v6200_v0 = vpop.eup %6199 }
 0x76a   : > { %v4443_v27 = vpop.xlane.xlu1 %4442  ;;  %5751 = vmatmul.mubr.msk.f32.gmra.mrb[44].mxu1 %vm3830_vm10, %v4163_v56  ;;  %v4447_v46 = vmul.f32 %v6200_v0, %v8732_v29 }
 0x76b   : > { %5753 = vmatprep.mubr.msk.f32.mxu1 %vm6328_vm0, %v9326_v44  ;;  %6205 = vrcp.f32 %v4443_v27  ;;  %v4933_v27 = vld [vmem:[#allocation7] sm:$0xff] }
 0x76d   : > { %v6202_v45 = vpop.eup %6201 }
 0x76e   : > { %v4716_v55 = vpop.xlane.xlu1 %4715  ;;  %5754 = vmatmul.mubr.msk.f32.gmra.mrb[46].mxu1 %vm3830_vm10, %v4165_v33  ;;  %v4449_v1 = vmul.f32 %v6202_v45, %v8737_v21  ;;  %v4934_v33 = vld [vmem:[#allocation7 + $0x8] sm:$0xff] }
 0x76f   : > { %5756 = vmatprep.mubr.msk.f32.mxu1 %vm6328_vm0, %v9326_v44  ;;  %6207 = vrcp.f32 %v4716_v55 }
 0x771   : > { %v6204_v30 = vpop.eup %6203 }
 0x772   : > { %v6111_v35 = vpop.permute.xlu1 %6110  ;;  %5757 = vmatmul.mubr.msk.f32.gmra.mrb[48].mxu1 %vm3830_vm10, %v4167_v59  ;;  %v4451_v11 = vmul.f32 %v6204_v30, %v8741_v6  ;;  %v6023_v59 = vpack.c.bf16 %v4934_v33, %v4933_v27 }
 0x773   : > { %v6113_v12 = vunpack.i.h.bf16 %v6111_v35  ;;  %v6112_v13 = vunpack.i.l.bf16 %v6111_v35  ;;  %5782 = vmatprep.mubr.msk.f32.mxu1 %vm6328_vm0, %v9326_v44  ;;  %v4936_v35 = vld [vmem:[#allocation7 + $0x18] sm:$0xff] }
 0x774   : > { %6024 = vmatpush3.bf16.msra.mxu0 %v6023_v59 }
 0x775   : > { %v6011_v48 = vpack.c.bf16 %v6113_v12, %v6112_v13  ;;  %v6206_v28 = vpop.eup %6205  ;;  %v6026_v13 = vpack.c.bf16 %v4936_v35, %v4935_v15  ;;  %6025 = vmatprep.subr.bf16.mxu0 %v9320_v62 }
 0x776   : > { %v4453_v29 = vmul.f32 %v6206_v28, %v8745_v25 }
 0x777   : > { %6013 = vmatpush3.bf16.msk.msra.mxu1 %vm8604_vm13, %v6011_v48  ;;  %v4938_v48 = vld [vmem:[#allocation7 + $0x28] sm:$0xff] }
 0x778   : > { %6018 = vmatprep.subr.bf16.mxu1 %v9320_v62  ;;  %6027 = vmatpush3.bf16.msra.mxu0 %v6026_v13 }
 0x779   : > { %v6208_v34 = vpop.eup %6207  ;;  %6028 = vmatprep.subr.bf16.mxu0 %v9320_v62 }
 0x77a   : > { %5783 = vmatmul.mubr.msk.f32.vlgmr.msra.gmra.mrb[50].mxu1 %vm3830_vm10, %v4445_v53  ;;  %v4730_v25 = vmul.f32 %v6208_v34, %v8750_v8 }
 0x77b   : > { %5785 = vmatprep.mubr.msk.f32.mxu1 %vm6328_vm0, %v9326_v44 }
 0x77e   : > { %5786 = vmatmul.mubr.msk.f32.gmra.mrb[52].mxu1 %vm3830_vm10, %v4447_v46  ;;  %v6029_v46 = vpack.c.bf16 %v4938_v48, %v4937_v17 }
 0x77f   : > { %5788 = vmatprep.mubr.msk.f32.mxu1 %vm6328_vm0, %v9326_v44 }
 0x780   : > { %6030 = vmatpush3.bf16.msra.mxu0 %v6029_v46 }
 0x781   : > { %6031 = vmatprep.subr.bf16.mxu0 %v9320_v62 }
 0x782   : > { %5789 = vmatmul.mubr.msk.f32.gmra.mrb[54].mxu1 %vm3830_vm10, %v4449_v1 }
 0x783   : > { %5791 = vmatprep.mubr.msk.f32.mxu1 %vm6328_vm0, %v9326_v44 }
 0x786   : > { %5792 = vmatmul.mubr.msk.f32.gmra.mrb[56].mxu1 %vm3830_vm10, %v4451_v11 }
 0x787   : > { %5794 = vmatprep.mubr.msk.f32.mxu1 %vm6328_vm0, %v9326_v44 }
 0x78a   : > { %5795 = vmatmul.mubr.msk.f32.gmra.mrb[58].mxu1 %vm3830_vm10, %v4453_v29 }
 0x78b   : > { %v4719_v40 = vpop.xlane.xlu0 %4718  ;;  %5820 = vmatprep.mubr.msk.f32.mxu1 %vm6328_vm0, %v9326_v44 }
 0x78c   : > { %6209 = vrcp.f32 %v4719_v40  ;;  %v4939_v40 = vld [vmem:[#allocation7 + $0x30] sm:$0xff] }
 0x78f   : > { %v4725_v21 = vpop.xlane.xlu0 %4724 }
 0x793   : > { %v4728_v47 = vpop.xlane.xlu0 %4727 }
 0x796   : > { %v6210_v52 = vpop.eup %6209 }
 0x797   : > { %v6116_v14 = vpop.permute.xlu0 %6115  ;;  %v4732_v38 = vmul.f32 %v6210_v52, %v8772_v50 }
 0x798   : > { %v6118_v6 = vunpack.i.h.bf16 %v6116_v14  ;;  %v6117_v3 = vunpack.i.l.bf16 %v6116_v14 }
 0x79a   : > { %v6019_v5 = vpack.c.bf16 %v6118_v6, %v6117_v3 }
 0x79c   : > { %6021 = vmatpush3.bf16.msk.msra.mxu1 %vm8604_vm13, %v6019_v5 }
 0x79f   : > { %5821 = vmatmul.mubr.msk.f32.vlgmr.msra.gmra.mrb[60].mxu1 %vm3830_vm10, %v4730_v25 }
 0x7a0   : > { %5823 = vmatprep.mubr.msk.f32.mxu1 %vm6328_vm0, %v9326_v44 }
 0x7a3   : > { %v4722_v20 = vpop.xlane.xlu1 %4721  ;;  %5824 = vmatmul.mubr.msk.f32.gmra.mrb[62].mxu1 %vm3830_vm10, %v4732_v38 }
 0x7a4   : > { %6211 = vrcp.f32 %v4722_v20  ;;  %5826 = vmatprep.mubr.msk.f32.mxu1 %vm6328_vm0, %v9326_v44 }
 0x7a5   : > { %6213 = vrcp.f32 %v4725_v21  ;;  %v4940_v21 = vld [vmem:[#allocation7 + $0x38] sm:$0xff] }
 0x7a6   : > { %6215 = vrcp.f32 %v4728_v47  ;;  %v6032_v47 = vpack.c.bf16 %v4940_v21, %v4939_v40 }
 0x7a8   : > { %6033 = vmatpush3.bf16.msra.mxu0 %v6032_v47 }
 0x7ae   : > { %v6212_v26 = vpop.eup %6211 }
 0x7af   : > { %v4734_v8 = vmul.f32 %v6212_v26, %v8785_v60  ;;  %v6214_v54 = vpop.eup %6213 }
 0x7b0   : > { %v4736_v10 = vmul.f32 %v6214_v54, %v8776_v16  ;;  %v6216_v42 = vpop.eup %6215 }
 0x7b1   : > { %5827 = vmatmul.mubr.msk.f32.gmra.mrb[64].mxu1 %vm3830_vm10, %v4734_v8  ;;  %v4738_v43 = vmul.f32 %v6216_v42, %v8781_v37 }
 0x7b2   : > { %v8857_v57 = vpop.f32.mrb[30].mxu1  ;;  %5829 = vmatprep.mubr.msk.f32.mxu1 %vm6328_vm0, %v9326_v44 }
 0x7b3   : > { %v5708_v50 = vpop.f32.mrb[31].mxu1 }
 0x7b5   : > { %5830 = vmatmul.mubr.msk.f32.gmra.mrb[66].mxu1 %vm3830_vm10, %v4736_v10 }
 0x7b6   : > { %v8863_v32 = vpop.f32.mrb[32].mxu1  ;;  %5832 = vmatprep.mubr.msk.f32.mxu1 %vm6328_vm0, %v9326_v44 }
 0x7b7   : > { %v5711_v60 = vpop.f32.mrb[33].mxu1 }
 0x7b9   : > { %5833 = vmatmul.mubr.msk.f32.gmra.mrb[68].mxu1 %vm3830_vm10, %v4738_v43 }
 0x7ba   : > { %v8869_v31 = vpop.f32.mrb[34].mxu1 }
 0x7bb   : > { %v5714_v41 = vpop.f32.mrb[35].mxu1 }
 0x802   : > { %v8871_v19 = vpop.f32.mrb[36].mxu1 }
 0x803   : > { %v5717_v58 = vpop.f32.mrb[37].mxu1 }
 0x806   : > { %v8873_v16 = vpop.f32.mrb[38].mxu1 }
 0x807   : > { %v5720_v18 = vpop.f32.mrb[39].mxu1 }
 0x835   : > { %v4257_v23 = vpop.f32.mrb[40].mxu1 }
 0x836   : > { %4856 = vrot.lane.b32.xlu1 %v4257_v23, %s6335_s19  ;;  %v5746_v39 = vpop.f32.mrb[41].mxu1 }
 0x839   : > { %v4262_v61 = vpop.f32.mrb[42].mxu1 }
 0x83a   : > { %4858 = vrot.lane.b32.xlu0 %v4262_v61, %s6335_s19  ;;  %v5749_v37 = vpop.f32.mrb[43].mxu1 }
 0x83d   : > { %v4267_v4 = vpop.f32.mrb[44].mxu1 }
 0x83e   : > { %4860 = vrot.lane.b32.xlu1 %v4267_v4, %s6335_s19  ;;  %v5752_v49 = vpop.f32.mrb[45].mxu1 }
 0x841   : > { %v4272_v7 = vpop.f32.mrb[46].mxu1 }
 0x842   : > { %v5755_v63 = vpop.f32.mrb[47].mxu1 }
 0x845   : > { %v4277_v56 = vpop.f32.mrb[48].mxu1 }
 0x846   : > { %v5758_v24 = vpop.f32.mrb[49].mxu1 }
 0x84d   : > { %v4542_v55 = vpop.f32.mrb[50].mxu1 }
 0x84e   : > { %4876 = vrot.lane.b32.xlu0 %v4542_v55, %s6336_s9  ;;  %v5784_v12 = vpop.f32.mrb[51].mxu1 }
 0x851   : > { %v4547_v53 = vpop.f32.mrb[52].mxu1 }
 0x852   : > { %4878 = vrot.lane.b32.xlu1 %v4547_v53, %s6336_s9  ;;  %v5787_v0 = vpop.f32.mrb[53].mxu1 }
 0x855   : > { %v4552_v45 = vpop.f32.mrb[54].mxu1 }
 0x856   : > { %4880 = vrot.lane.b32.xlu0 %v4552_v45, %s6336_s9  ;;  %v5790_v1 = vpop.f32.mrb[55].mxu1 }
 0x859   : > { %v4557_v30 = vpop.f32.mrb[56].mxu1 }
 0x85a   : > { %4882 = vrot.lane.b32.xlu1 %v4557_v30, %s6336_s9  ;;  %v5793_v11 = vpop.f32.mrb[57].mxu1 }
 0x85d   : > { %v4562_v28 = vpop.f32.mrb[58].mxu1 }
 0x85e   : > { %v5796_v29 = vpop.f32.mrb[59].mxu1 }
 0x872   : > { %v4827_v14 = vpop.f32.mrb[60].mxu1 }
 0x873   : > { %4896 = vrot.lane.b32.xlu0 %v4827_v14, %s6337_s21  ;;  %v5822_v6 = vpop.f32.mrb[61].mxu1 }
 0x876   : > { %v4832_v3 = vpop.f32.mrb[62].mxu1 }
 0x877   : > { %4898 = vrot.lane.b32.xlu0 %v4832_v3, %s6337_s21  ;;  %v5825_v34 = vpop.f32.mrb[63].mxu1 }
 0x87b   : > { %4862 = vrot.lane.b32.xlu0 %v4272_v7, %s6335_s19 }
 0x884   : > { %v4837_v62 = vpop.f32.mrb[64].mxu1 }
 0x885   : > { %4900 = vrot.lane.b32.xlu1 %v4837_v62, %s6337_s21  ;;  %v5828_v5 = vpop.f32.mrb[65].mxu1 }
 0x888   : > { %v4842_v25 = vpop.f32.mrb[66].mxu1 }
 0x889   : > { %4864 = vrot.lane.b32.xlu1 %v4277_v56, %s6335_s19  ;;  %4902 = vrot.lane.b32.xlu0 %v4842_v25, %s6337_s21  ;;  %v5831_v52 = vpop.f32.mrb[67].mxu1 }
 0x88c   : > { %v4847_v38 = vpop.f32.mrb[68].mxu1 }
 0x88d   : > { %4884 = vrot.lane.b32.xlu0 %v4562_v28, %s6336_s9  ;;  %4904 = vrot.lane.b32.xlu1 %v4847_v38, %s6337_s21  ;;  %v5834_v20 = vpop.f32.mrb[69].mxu1 }
 0x8a8   : > { %v4857_v54 = vpop.permute.xlu1 %4856 }
 0x8a9   : > { %v4911_v42 = vsel %vm3718_vm8, %v8857_v57, %v4857_v54 }
 0x8ac   : > { %v4859_v26 = vpop.permute.xlu0 %4858 }
 0x8ad   : > { %v4912_v23 = vsel %vm3718_vm8, %v8863_v32, %v4859_v26 }
 0x8b0   : > { %v4861_v10 = vpop.permute.xlu1 %4860 }
 0x8b1   : > { %v4913_v32 = vsel %vm3718_vm8, %v8869_v31, %v4861_v10 }
 0x8c0   : > { %v4877_v8 = vpop.permute.xlu0 %4876 }
 0x8c1   : > { %v4917_v60 = vsel %vm4916_vm14, %v4911_v42, %v4877_v8 }
 0x8c4   : > { %v4879_v41 = vpop.permute.xlu1 %4878 }
 0x8c5   : > { %v4918_v39 = vsel %vm4916_vm14, %v4912_v23, %v4879_v41 }
 0x8c8   : > { %v4881_v50 = vpop.permute.xlu0 %4880 }
 0x8c9   : > { %v4919_v49 = vsel %vm4916_vm14, %v4913_v32, %v4881_v50 }
 0x8e5   : > { %v4897_v43 = vpop.permute.xlu0 %4896 }
 0x8e6   : > { %v4923_v58 = vsel %vm4922_vm15, %v4917_v60, %v4897_v43 }
 0x8e7   : > { %v4928_v18 = vadd.f32 %v4923_v58, %v9325_v36  ;;  %v4883_v36 = vpop.permute.xlu1 %4882 }
 0x8e9   : > { %5852 = vmatmul.mubr.msk.f32.vlgmr.msra.gmra.mrb[68].mxu0 %vm396_vm2, %v4928_v18  ;;  %v4899_v61 = vpop.permute.xlu0 %4898 }
 0x8ea   : > { %v4924_v37 = vsel %vm4922_vm15, %v4918_v39, %v4899_v61  ;;  %5854 = vmatprep.mubr.msk.f32.mxu0 %vm6328_vm0, %v9326_v44 }
 0x8eb   : > { %v4929_v57 = vadd.f32 %v4924_v37, %v9327_v22 }
 0x8ed   : > { %5855 = vmatmul.mubr.msk.f32.gmra.mrb[70].mxu0 %vm396_vm2, %v4929_v57  ;;  %v4863_v4 = vpop.permute.xlu0 %4862 }
 0x8ee   : > { %5857 = vmatprep.mubr.msk.f32.mxu0 %vm6328_vm0, %v9326_v44  ;;  %v4914_v63 = vsel %vm3718_vm8, %v8871_v19, %v4863_v4 }
 0x8ef   : > { %v4920_v27 = vsel %vm4916_vm14, %v4914_v63, %v4883_v36 }
 0x8f7   : > { %v4901_v7 = vpop.permute.xlu1 %4900 }
 0x8f8   : > { %v4925_v56 = vsel %vm4922_vm15, %v4919_v49, %v4901_v7 }
 0x8f9   : > { %v4930_v22 = vadd.f32 %v4925_v56, %v9329_v9 }
 0x8fb   : > { %5858 = vmatmul.mubr.msk.f32.gmra.mrb[72].mxu0 %vm396_vm2, %v4930_v22  ;;  %v4865_v24 = vpop.permute.xlu1 %4864  ;;  %v4903_v33 = vpop.permute.xlu0 %4902 }
 0x8fc   : > { %v4926_v15 = vsel %vm4922_vm15, %v4920_v27, %v4903_v33  ;;  %5860 = vmatprep.mubr.msk.f32.mxu0 %vm6328_vm0, %v9326_v44  ;;  %v4915_v19 = vsel %vm3718_vm8, %v8873_v16, %v4865_v24 }
 0x8fd   : > { %v4931_v31 = vadd.f32 %v4926_v15, %v9330_v2  ;;  %v5270_v2 = vld [vmem:[%s8948_s7] ss:$0 sm:$0xff] }
 0x8ff   : > { %5861 = vmatmul.mubr.msk.f32.gmra.mrb[74].mxu0 %vm396_vm2, %v4931_v31  ;;  %v4885_v9 = vpop.permute.xlu0 %4884  ;;  %v4905_v55 = vpop.permute.xlu1 %4904 }
 0x900   : > { %v4921_v59 = vsel %vm4916_vm14, %v4915_v19, %v4885_v9  ;;  %5863 = vmatprep.mubr.msk.f32.mxu0 %vm6328_vm0, %v9326_v44  ;;  %vm5057_vm0 = vcmask 516096  }
 0x901   : > { %v4927_v35 = vsel %vm4922_vm15, %v4921_v59, %v4905_v55 }
 0x902   : > { %v4932_v12 = vadd.f32 %v4927_v35, %v9328_v51 }
 0x904   : > { %5864 = vmatmul.mubr.msk.f32.gmra.mrb[76].mxu0 %vm396_vm2, %v4932_v12 }
 0x9bc   : > { %v5029_v16 = vpop.f32.mrb[68].mxu0 }
 0x9bd   : > { %v5030_v13 = vadd.f32 %v5270_v2, %v5029_v16  ;;  %v5853_v17 = vpop.f32.mrb[69].mxu0 }
 0x9bf   : > { %5053 = vst.msk [vmem:[%s349_s24] sm:$0xff] %vm396_vm2, %v5030_v13 }
 0x9c0   : > { %v5034_v44 = vpop.f32.mrb[70].mxu0 }
 0x9c1   : > { %v5035_v48 = vadd.f32 %v5270_v2, %v5034_v44  ;;  %v5856_v53 = vpop.f32.mrb[71].mxu0 }
 0x9c3   : > { %5054 = vst.msk [vmem:[%s349_s24 + $0x8] sm:$0xff] %vm396_vm2, %v5035_v48 }
 0x9ce   : > { %v5039_v51 = vpop.f32.mrb[72].mxu0 }
 0x9cf   : > { %v5040_v0 = vadd.f32 %v5270_v2, %v5039_v51  ;;  %v5859_v46 = vpop.f32.mrb[73].mxu0 }
 0x9d1   : > { %5055 = vst.msk [vmem:[%s349_s24 + $0x10] sm:$0xff] %vm396_vm2, %v5040_v0 }
 0x9d2   : > { %v5044_v45 = vpop.f32.mrb[74].mxu0 }
 0x9d3   : > { %v5045_v1 = vadd.f32 %v5270_v2, %v5044_v45  ;;  %v5862_v30 = vpop.f32.mrb[75].mxu0 }
 0x9d5   : > { %5056 = vst.msk [vmem:[%s349_s24 + $0x18] sm:$0xff] %vm396_vm2, %v5045_v1 }
 0x9d7   : > { %v5049_v11 = vpop.f32.mrb[76].mxu0 }
 0x9d8   : > { %v5050_v28 = vadd.f32 %v5270_v2, %v5049_v11  ;;  %v5865_v29 = vpop.f32.mrb[77].mxu0 }
 0x9da   : > { %5058 = vst.msk [vmem:[%s349_s24 + $0x20] sm:$0x1] %vm5057_vm0, %v5050_v28 }
 0x9db PF: > { %s20_s27 = sadd.s32 1, %s6320_s27  }
 0x9dc   : > { %p17_p9 = scmp.ge.s32.totalorder %s20_s27, 4  }
 0x9de   :  { %19 = sbr.rel (!%p17_p9) target bundleno = 2 (0x2), region = 100 }
 0x9e5   :  { %5080 = vsyncpa [#allocation4], 1 }
 0x9e6   :  { %5082 = vsyncpa [#allocation4 + $0x1], 1 }
 0x9e7   :  { %5083 = vsyncpa [#allocation6], 1 }

</bundles_post_ra>
